<compile_context>
chip_gen: v7x
topology: tpu7x:2x2x1
jax: 0.10.0
libtpu: 0.0.40
codegen_flags: <defaults>
</compile_context>

<pallas_src>
import functools

import numpy as np
import jax
import jax.numpy as jnp
from jax.experimental import pallas as pl
from jax.experimental.pallas import tpu as pltpu

LANE = 128
SUBLANE = 8
PATCH_VMEM_BUDGET = 2 * 1024 * 1024     # target size of the bf16 im2col tile


def _round_up(x, m):
    return (x + m - 1) // m * m


def _stacked_conv_kernel(x_ref, w_ref, scale_ref, shift_ref, mask_ref,
                         o_ref, act_a, act_b, patch_ref,
                         *, S_pad, negative_slope):
    """Fused L x (3x3 conv + folded BN(eval) + LeakyReLU), one batch element.

    x_ref:     (P_pad, C)       bf16  spatially padded, flattened NHWC plane
    w_ref:     (L, 9*C, C)      bf16  tap-major K-packed conv weights
    scale_ref: (L, 1, C)        f32   folded BN scale
    shift_ref: (L, 1, C)        f32   folded BN shift (includes conv bias)
    mask_ref:  (P_pad, 1)       f32   1.0 on interior pixels, 0.0 on halo/tail
    o_ref:     (P_pad, C)       bf16  output plane (still padded / flattened)
    act_a/b:   (P_pad + 2G, C)  f32   ping-pong activation planes, zero guards
    patch_ref: (TILE_M, 9*C)    bf16  K-packed im2col tile
    """
    P_pad, C = x_ref.shape
    num_layers = w_ref.shape[0]
    G = (act_a.shape[0] - P_pad) // 2
    TILE_M = patch_ref.shape[0]
    num_tiles = P_pad // TILE_M

    # Zero ONLY the guard rows (a full-buffer clear costs ~a conv layer of
    # store-slot work); plane interiors are fully overwritten below.
    zeros_g = jnp.zeros((G, C), jnp.float32)
    for buf in (act_a, act_b):
        buf[pl.ds(0, G), :] = zeros_g
        buf[pl.ds(G + P_pad, G), :] = zeros_g

    # Layer-0 input (already halo/lane/tail padded, bf16) -> centre of plane A.
    act_a[pl.ds(G, P_pad), :] = x_ref[...].astype(jnp.float32)

    bufs = (act_a, act_b)
    for l in range(num_layers):
        src = bufs[l % 2]
        dst = bufs[(l + 1) % 2]
        last = l == num_layers - 1
        scale_l = scale_ref[l]
        shift_l = shift_ref[l]

        def tile_body(row0, src=src, dst=dst, l=l, last=last,
                      scale_l=scale_l, shift_l=shift_l):
            # K-pack the 9 taps of the 3x3 window:
            #   patch[p, t*C + c] = src[G + row0 + p + (dy-1)*S_pad + (dx-1), c]
            # S_pad % 8 == 0, so the dy-only offsets are sublane-aligned.
            for t in range(9):
                dy, dx = divmod(t, 3)
                d = (dy - 1) * S_pad + (dx - 1)
                patch_ref[:, t * C:(t + 1) * C] = (
                    src[pl.ds(G + row0 + d, TILE_M), :].astype(jnp.bfloat16))

            # One MXU matmul per tile per layer: (TILE_M, 9C) x (9C, C) -> f32.
            acc = jnp.dot(patch_ref[...], w_ref[l],
                          preferred_element_type=jnp.float32)

            # Folded conv-bias + BatchNorm(eval) + LeakyReLU epilogue in f32.
            # TODO(synk): Dropout2d is identity in eval mode; training-mode
            #             stochastic channel dropout is not reproduced.
            y = acc * scale_l + shift_l
            y = jnp.maximum(y, negative_slope * y)
            if last:
                # Final layer streams straight into the bf16 output block;
                # the wrapper slices the interior, so no halo re-zero needed.
                o_ref[pl.ds(row0, TILE_M), :] = y.astype(jnp.bfloat16)
            else:
                # Re-zero the halo ring / alignment tail so it acts as zero
                # padding for the next conv of the stack.
                dst[pl.ds(G + row0, TILE_M), :] = (
                    y * mask_ref[pl.ds(row0, TILE_M), :])

        if num_tiles == 1:
            tile_body(0)
        else:
            @pl.loop(0, num_tiles)
            def _(m):
                tile_body(pl.multiple_of(m * TILE_M, TILE_M))


def stacked_conv_layers(x_nchw, params, *, eps=1e-5, negative_slope=0.01):
    """Forward pass of StackedConvLayers (eval). Input/output are NCHW."""
    N, Cin, H, W = x_nchw.shape
    L = len(params)
    Cout = params[0]["w"].shape[-1]

    # TODO(synk): first_stride / stride != 1 is not implemented (the reference
    #             instantiation uses first_stride=None, i.e. stride 1).
    # TODO(synk): for tiny channel counts (Cin=4/Cout=8) padding channels to a
    #             full 128-lane vreg wastes MXU work; production shapes with
    #             small Cout should map a W-tile into the lane dim instead.

    C = _round_up(max(Cin, Cout), LANE)        # lane-dense channel width
    S_pad = _round_up(W + 2, SUBLANE)          # sublane-aligned padded row stride
    # Pixel tile = whole image rows, sized so the bf16 im2col scratch stays
    # around PATCH_VMEM_BUDGET (v7x's 64 MiB VMEM is the binding constraint).
    tile_rows = max(1, min(H + 2, PATCH_VMEM_BUDGET // (9 * C * 2 * S_pad)))
    H_tot = _round_up(H + 2, tile_rows)
    P_pad = H_tot * S_pad                      # flattened padded plane rows
    TILE_M = tile_rows * S_pad
    G = _round_up(S_pad + 1, SUBLANE)          # guard rows >= max |tap shift|

    # ---- glue: one transpose + one (bf16) pad + reshape -------------------
    x = jnp.transpose(x_nchw.astype(jnp.bfloat16), (0, 2, 3, 1))      # NHWC
    x = jnp.pad(x, ((0, 0), (1, H_tot - H - 1),
                    (1, S_pad - W - 1), (0, C - Cin)))
    x = x.reshape(N, P_pad, C)

    # Fold conv bias + BatchNorm(eval) into per-channel scale/shift; tap-major
    # K-pack the 3x3 weights.
    w_list, scale_list, shift_list = [], [], []
    for p in params:
        w = p["w"]                                   # (3, 3, cin_l, cout_l) HWIO
        cin_l, cout_l = w.shape[2], w.shape[3]
        w = jnp.pad(w, ((0, 0), (0, 0), (0, C - cin_l), (0, C - cout_l)))
        w_list.append(w.reshape(9 * C, C))
        scale = p["gamma"] / jnp.sqrt(p["var"] + eps)
        shift = (p["b"] - p["mean"]) * scale + p["beta"]
        scale_list.append(jnp.pad(scale, (0, C - cout_l)).reshape(1, C))
        shift_list.append(jnp.pad(shift, (0, C - cout_l)).reshape(1, C))
    w_all = jnp.stack(w_list).astype(jnp.bfloat16)           # (L, 9C, C)
    scale_all = jnp.stack(scale_list).astype(jnp.float32)    # (L, 1, C)
    shift_all = jnp.stack(shift_list).astype(jnp.float32)    # (L, 1, C)

    # Interior mask as a single lane-broadcast column (compile-time constant):
    # 1.0 inside the HxW output region, 0.0 on halo / tail columns / tail rows.
    mask_np = np.zeros((H_tot, S_pad), np.float32)
    mask_np[1:H + 1, 1:W + 1] = 1.0
    mask = jnp.asarray(mask_np.reshape(P_pad, 1))

    kernel = functools.partial(_stacked_conv_kernel, S_pad=S_pad,
                               negative_slope=negative_slope)

    flops = 2 * N * L * P_pad * (9 * C) * C
    bytes_accessed = (x.size * 2 + w_all.size * 2 + mask.size * 4
                      + (scale_all.size + shift_all.size) * 4
                      + N * P_pad * C * 2)

    # VMEM limit derived per generation (~48 MiB on v7x, ~96 MiB on v5e/v6e).
    try:
        vmem_cap = int(pltpu.get_tpu_info().vmem_capacity_bytes)
    except Exception:
        vmem_cap = 64 * 1024 * 1024
    vmem_limit = max(32 * 1024 * 1024,
                     min(vmem_cap * 3 // 4, 100 * 1024 * 1024))

    out = pl.pallas_call(
        kernel,
        out_shape=jax.ShapeDtypeStruct((N, P_pad, C), jnp.bfloat16),
        grid=(N,),
        in_specs=[
            pl.BlockSpec((None, P_pad, C), lambda n: (n, 0, 0)),   # x plane
            pl.BlockSpec((L, 9 * C, C), lambda n: (0, 0, 0)),      # weights
            pl.BlockSpec((L, 1, C), lambda n: (0, 0, 0)),          # BN scale
            pl.BlockSpec((L, 1, C), lambda n: (0, 0, 0)),          # BN shift
            pl.BlockSpec((P_pad, 1), lambda n: (0, 0)),            # halo mask
        ],
        out_specs=pl.BlockSpec((None, P_pad, C), lambda n: (n, 0, 0)),
        scratch_shapes=[
            pltpu.VMEM((P_pad + 2 * G, C), jnp.float32),   # activation ping
            pltpu.VMEM((P_pad + 2 * G, C), jnp.float32),   # activation pong
            pltpu.VMEM((TILE_M, 9 * C), jnp.bfloat16),     # K-packed patch tile
        ],
        compiler_params=pltpu.CompilerParams(
            dimension_semantics=("parallel",),
            vmem_limit_bytes=vmem_limit),
        cost_estimate=pl.CostEstimate(flops=flops, transcendentals=0,
                                      bytes_accessed=bytes_accessed),
    )(x, w_all, scale_all, shift_all, mask)

    # Drop halo / tail / channel padding, back to NCHW f32.
    out = out.reshape(N, H_tot, S_pad, C)[:, 1:H + 1, 1:W + 1, :Cout]
    return jnp.transpose(out, (0, 3, 1, 2)).astype(jnp.float32)


def init_stacked_conv_params(key, input_channels, output_channels, num_convs):
    """Deterministic synthetic parameters matching the PyTorch module shapes."""
    params = []
    cin = input_channels
    for _ in range(num_convs):
        key, kw, kb, kg, kbeta, km, kv = jax.random.split(key, 7)
        cout = output_channels
        # PyTorch Conv2d weight is (Cout, Cin, kH, kW); store HWIO for NHWC.
        w_oihw = 0.1 * jax.random.normal(kw, (cout, cin, 3, 3), jnp.float32)
        w_hwio = jnp.transpose(w_oihw, (2, 3, 1, 0))
        b = 0.1 * jax.random.normal(kb, (cout,), jnp.float32)
        gamma = 1.0 + 0.1 * jax.random.normal(kg, (cout,), jnp.float32)
        beta = 0.1 * jax.random.normal(kbeta, (cout,), jnp.float32)
        running_mean = 0.1 * jax.random.normal(km, (cout,), jnp.float32)
        running_var = 1.0 + 0.1 * jax.random.uniform(kv, (cout,), jnp.float32)
        params.append(dict(w=w_hwio, b=b, gamma=gamma, beta=beta,
                           mean=running_mean, var=running_var))
        cin = cout
    return params


def _reference_stacked_conv(x_nchw, params, *, eps=1e-5, negative_slope=0.01):
    """Plain-JAX f32 reference (PyTorch eval semantics)."""
    y = jnp.transpose(x_nchw, (0, 2, 3, 1))
    for p in params:
        y = jax.lax.conv_general_dilated(
            y, p["w"], window_strides=(1, 1), padding="SAME",
            dimension_numbers=("NHWC", "HWIO", "NHWC"))
        y = y + p["b"]
        scale = p["gamma"] / jnp.sqrt(p["var"] + eps)
        y = (y - p["mean"]) * scale + p["beta"]
        y = jnp.where(y >= 0, y, negative_slope * y)
    return jnp.transpose(y, (0, 3, 1, 2))


if __name__ == "__main__":
    key = jax.random.PRNGKey(0)
    kx, kp = jax.random.split(key)

    # Small shapes consistent with the module: N=2, Cin=4, H=W=16, Cout=8,
    # num_convs=2, first_stride=None.
    N, Cin, H, W = 2, 4, 16, 16
    Cout, num_convs = 8, 2

    x = jax.random.normal(kx, (N, Cin, H, W), jnp.float32)
    params = init_stacked_conv_params(kp, Cin, Cout, num_convs)

    fwd = jax.jit(stacked_conv_layers)
    out = jax.block_until_ready(fwd(x, params))

    assert out.shape == (N, Cout, H, W), out.shape
    assert bool(jnp.all(jnp.isfinite(out)))

    # Check against a plain-JAX f32 reference (kernel uses bf16 inputs/weights/
    # output with f32 accumulation, so allow a small tolerance).
    ref = jax.block_until_ready(_reference_stacked_conv(x, params))
    err = float(jnp.max(jnp.abs(out - ref)))
    assert err < 0.2, f"max abs error vs reference: {err}"

    print("KERNEL_OK")
</pallas_src>

<mosaic_0001>
module attributes {stable_mosaic.version = 11 : i64} {
  func.func @_stacked_conv_kernel(%arg0: i32, %arg1: memref<1x432x128xbf16, #tpu.memory_space<vmem>>, %arg2: memref<2x1152x128xbf16, #tpu.memory_space<vmem>>, %arg3: memref<2x1x128xf32, #tpu.memory_space<vmem>>, %arg4: memref<2x1x128xf32, #tpu.memory_space<vmem>>, %arg5: memref<432x1xf32, #tpu.memory_space<vmem>>, %arg6: memref<1x432x128xbf16, #tpu.memory_space<vmem>>, %arg7: memref<496x128xf32, #tpu.memory_space<vmem>>, %arg8: memref<496x128xf32, #tpu.memory_space<vmem>>, %arg9: memref<432x1152xbf16, #tpu.memory_space<vmem>>) attributes {dimension_semantics = [#tpu.dimension_semantics<parallel>], iteration_bounds = array<i64: 2>, scalar_prefetch = 0 : i64, scratch_operands = 3 : i64, tpu.core_type = #tpu.core_type<tc>, window_params = [{transform_indices = @transform_0, window_bounds = array<i64: 1, 432, 128>}, {pipeline_mode = #tpu.pipeline_mode<synchronous>, transform_indices = @transform_1, window_bounds = array<i64: 2, 1152, 128>}, {pipeline_mode = #tpu.pipeline_mode<synchronous>, transform_indices = @transform_2, window_bounds = array<i64: 2, 1, 128>}, {pipeline_mode = #tpu.pipeline_mode<synchronous>, transform_indices = @transform_3, window_bounds = array<i64: 2, 1, 128>}, {pipeline_mode = #tpu.pipeline_mode<synchronous>, transform_indices = @transform_4, window_bounds = array<i64: 432, 1>}, {transform_indices = @transform_5, window_bounds = array<i64: 1, 432, 128>}]} {
    %cst = arith.constant 0.000000e+00 : f32
    %0 = vector.broadcast %cst : f32 to vector<32x128xf32>
    %c0 = arith.constant 0 : index
    %c0_0 = arith.constant 0 : index
    %1 = vector.load %arg7[%c0, %c0_0] : memref<496x128xf32, #tpu.memory_space<vmem>>, vector<32x128xf32>
    tpu.vector_store %arg7[%c0, %c0_0], %0 {strides = array<i32>} : memref<496x128xf32, #tpu.memory_space<vmem>>, vector<32x128xf32>,
    %c464 = arith.constant 464 : index
    %c0_1 = arith.constant 0 : index
    %2 = vector.load %arg7[%c464, %c0_1] : memref<496x128xf32, #tpu.memory_space<vmem>>, vector<32x128xf32>
    tpu.vector_store %arg7[%c464, %c0_1], %0 {strides = array<i32>} : memref<496x128xf32, #tpu.memory_space<vmem>>, vector<32x128xf32>,
    %c0_2 = arith.constant 0 : index
    %c0_3 = arith.constant 0 : index
    %3 = vector.load %arg8[%c0_2, %c0_3] : memref<496x128xf32, #tpu.memory_space<vmem>>, vector<32x128xf32>
    tpu.vector_store %arg8[%c0_2, %c0_3], %0 {strides = array<i32>} : memref<496x128xf32, #tpu.memory_space<vmem>>, vector<32x128xf32>,
    %c464_4 = arith.constant 464 : index
    %c0_5 = arith.constant 0 : index
    %4 = vector.load %arg8[%c464_4, %c0_5] : memref<496x128xf32, #tpu.memory_space<vmem>>, vector<32x128xf32>
    tpu.vector_store %arg8[%c464_4, %c0_5], %0 {strides = array<i32>} : memref<496x128xf32, #tpu.memory_space<vmem>>, vector<32x128xf32>,
    %c0_6 = arith.constant 0 : index
    %c0_7 = arith.constant 0 : index
    %c0_8 = arith.constant 0 : index
    %5 = vector.load %arg1[%c0_6, %c0_7, %c0_8] : memref<1x432x128xbf16, #tpu.memory_space<vmem>>, vector<1x432x128xbf16>
    %6 = vector.shape_cast %5 : vector<1x432x128xbf16> to vector<432x128xbf16>
    %7 = arith.extf %6 : vector<432x128xbf16> to vector<432x128xf32>
    %c32 = arith.constant 32 : index
    %c0_9 = arith.constant 0 : index
    %8 = vector.load %arg7[%c32, %c0_9] : memref<496x128xf32, #tpu.memory_space<vmem>>, vector<432x128xf32>
    tpu.vector_store %arg7[%c32, %c0_9], %7 {strides = array<i32>} : memref<496x128xf32, #tpu.memory_space<vmem>>, vector<432x128xf32>,
    %c0_10 = arith.constant 0 : index
    %c0_11 = arith.constant 0 : index
    %c0_12 = arith.constant 0 : index
    %9 = vector.load %arg3[%c0_10, %c0_11, %c0_12] : memref<2x1x128xf32, #tpu.memory_space<vmem>>, vector<1x1x128xf32>
    %10 = vector.shape_cast %9 : vector<1x1x128xf32> to vector<1x128xf32>
    %c0_13 = arith.constant 0 : index
    %c0_14 = arith.constant 0 : index
    %c0_15 = arith.constant 0 : index
    %11 = vector.load %arg4[%c0_13, %c0_14, %c0_15] : memref<2x1x128xf32, #tpu.memory_space<vmem>>, vector<1x1x128xf32>
    %12 = vector.shape_cast %11 : vector<1x1x128xf32> to vector<1x128xf32>
    %c7 = arith.constant 7 : index
    %c0_16 = arith.constant 0 : index
    %13 = vector.load %arg7[%c7, %c0_16] : memref<496x128xf32, #tpu.memory_space<vmem>>, vector<432x128xf32>
    %14 = arith.truncf %13 : vector<432x128xf32> to vector<432x128xbf16>
    %c0_17 = arith.constant 0 : index
    %c0_18 = arith.constant 0 : index
    %15 = vector.load %arg9[%c0_17, %c0_18] : memref<432x1152xbf16, #tpu.memory_space<vmem>>, vector<432x128xbf16>
    tpu.vector_store %arg9[%c0_17, %c0_18], %14 {strides = array<i32>} : memref<432x1152xbf16, #tpu.memory_space<vmem>>, vector<432x128xbf16>,
    %c8 = arith.constant 8 : index
    %c0_19 = arith.constant 0 : index
    %16 = vector.load %arg7[%c8, %c0_19] : memref<496x128xf32, #tpu.memory_space<vmem>>, vector<432x128xf32>
    %17 = arith.truncf %16 : vector<432x128xf32> to vector<432x128xbf16>
    %c0_20 = arith.constant 0 : index
    %c128 = arith.constant 128 : index
    %18 = vector.load %arg9[%c0_20, %c128] : memref<432x1152xbf16, #tpu.memory_space<vmem>>, vector<432x128xbf16>
    tpu.vector_store %arg9[%c0_20, %c128], %17 {strides = array<i32>} : memref<432x1152xbf16, #tpu.memory_space<vmem>>, vector<432x128xbf16>,
    %c9 = arith.constant 9 : index
    %c0_21 = arith.constant 0 : index
    %19 = vector.load %arg7[%c9, %c0_21] : memref<496x128xf32, #tpu.memory_space<vmem>>, vector<432x128xf32>
    %20 = arith.truncf %19 : vector<432x128xf32> to vector<432x128xbf16>
    %c0_22 = arith.constant 0 : index
    %c256 = arith.constant 256 : index
    %21 = vector.load %arg9[%c0_22, %c256] : memref<432x1152xbf16, #tpu.memory_space<vmem>>, vector<432x128xbf16>
    tpu.vector_store %arg9[%c0_22, %c256], %20 {strides = array<i32>} : memref<432x1152xbf16, #tpu.memory_space<vmem>>, vector<432x128xbf16>,
    %c31 = arith.constant 31 : index
    %c0_23 = arith.constant 0 : index
    %22 = vector.load %arg7[%c31, %c0_23] : memref<496x128xf32, #tpu.memory_space<vmem>>, vector<432x128xf32>
    %23 = arith.truncf %22 : vector<432x128xf32> to vector<432x128xbf16>
    %c0_24 = arith.constant 0 : index
    %c384 = arith.constant 384 : index
    %24 = vector.load %arg9[%c0_24, %c384] : memref<432x1152xbf16, #tpu.memory_space<vmem>>, vector<432x128xbf16>
    tpu.vector_store %arg9[%c0_24, %c384], %23 {strides = array<i32>} : memref<432x1152xbf16, #tpu.memory_space<vmem>>, vector<432x128xbf16>,
    %c32_25 = arith.constant 32 : index
    %c0_26 = arith.constant 0 : index
    %25 = vector.load %arg7[%c32_25, %c0_26] : memref<496x128xf32, #tpu.memory_space<vmem>>, vector<432x128xf32>
    %26 = arith.truncf %25 : vector<432x128xf32> to vector<432x128xbf16>
    %c0_27 = arith.constant 0 : index
    %c512 = arith.constant 512 : index
    %27 = vector.load %arg9[%c0_27, %c512] : memref<432x1152xbf16, #tpu.memory_space<vmem>>, vector<432x128xbf16>
    tpu.vector_store %arg9[%c0_27, %c512], %26 {strides = array<i32>} : memref<432x1152xbf16, #tpu.memory_space<vmem>>, vector<432x128xbf16>,
    %c33 = arith.constant 33 : index
    %c0_28 = arith.constant 0 : index
    %28 = vector.load %arg7[%c33, %c0_28] : memref<496x128xf32, #tpu.memory_space<vmem>>, vector<432x128xf32>
    %29 = arith.truncf %28 : vector<432x128xf32> to vector<432x128xbf16>
    %c0_29 = arith.constant 0 : index
    %c640 = arith.constant 640 : index
    %30 = vector.load %arg9[%c0_29, %c640] : memref<432x1152xbf16, #tpu.memory_space<vmem>>, vector<432x128xbf16>
    tpu.vector_store %arg9[%c0_29, %c640], %29 {strides = array<i32>} : memref<432x1152xbf16, #tpu.memory_space<vmem>>, vector<432x128xbf16>,
    %c55 = arith.constant 55 : index
    %c0_30 = arith.constant 0 : index
    %31 = vector.load %arg7[%c55, %c0_30] : memref<496x128xf32, #tpu.memory_space<vmem>>, vector<432x128xf32>
    %32 = arith.truncf %31 : vector<432x128xf32> to vector<432x128xbf16>
    %c0_31 = arith.constant 0 : index
    %c768 = arith.constant 768 : index
    %33 = vector.load %arg9[%c0_31, %c768] : memref<432x1152xbf16, #tpu.memory_space<vmem>>, vector<432x128xbf16>
    tpu.vector_store %arg9[%c0_31, %c768], %32 {strides = array<i32>} : memref<432x1152xbf16, #tpu.memory_space<vmem>>, vector<432x128xbf16>,
    %c56 = arith.constant 56 : index
    %c0_32 = arith.constant 0 : index
    %34 = vector.load %arg7[%c56, %c0_32] : memref<496x128xf32, #tpu.memory_space<vmem>>, vector<432x128xf32>
    %35 = arith.truncf %34 : vector<432x128xf32> to vector<432x128xbf16>
    %c0_33 = arith.constant 0 : index
    %c896 = arith.constant 896 : index
    %36 = vector.load %arg9[%c0_33, %c896] : memref<432x1152xbf16, #tpu.memory_space<vmem>>, vector<432x128xbf16>
    tpu.vector_store %arg9[%c0_33, %c896], %35 {strides = array<i32>} : memref<432x1152xbf16, #tpu.memory_space<vmem>>, vector<432x128xbf16>,
    %c57 = arith.constant 57 : index
    %c0_34 = arith.constant 0 : index
    %37 = vector.load %arg7[%c57, %c0_34] : memref<496x128xf32, #tpu.memory_space<vmem>>, vector<432x128xf32>
    %38 = arith.truncf %37 : vector<432x128xf32> to vector<432x128xbf16>
    %c0_35 = arith.constant 0 : index
    %c1024 = arith.constant 1024 : index
    %39 = vector.load %arg9[%c0_35, %c1024] : memref<432x1152xbf16, #tpu.memory_space<vmem>>, vector<432x128xbf16>
    tpu.vector_store %arg9[%c0_35, %c1024], %38 {strides = array<i32>} : memref<432x1152xbf16, #tpu.memory_space<vmem>>, vector<432x128xbf16>,
    %c0_36 = arith.constant 0 : index
    %c0_37 = arith.constant 0 : index
    %40 = vector.load %arg9[%c0_36, %c0_37] : memref<432x1152xbf16, #tpu.memory_space<vmem>>, vector<432x1152xbf16>
    %c0_38 = arith.constant 0 : index
    %c0_39 = arith.constant 0 : index
    %c0_40 = arith.constant 0 : index
    %41 = vector.load %arg2[%c0_38, %c0_39, %c0_40] : memref<2x1152x128xbf16, #tpu.memory_space<vmem>>, vector<1x1152x128xbf16>
    %42 = vector.shape_cast %41 : vector<1x1152x128xbf16> to vector<1152x128xbf16>
    %cst_41 = arith.constant dense<0.000000e+00> : vector<432x128xf32>
    %43 = tpu.matmul %40, %42, %cst_41 {dimension_numbers = #tpu.dot_dimension_numbers<[1], [0], [0], [1], [0, 0, 1, 1], [], []>} : vector<432x1152xbf16>, vector<1152x128xbf16>, vector<432x128xf32> -> vector<432x128xf32>
    %44 = vector.broadcast %10 : vector<1x128xf32> to vector<432x128xf32>
    %45 = arith.mulf %43, %44 : vector<432x128xf32>
    %46 = vector.broadcast %12 : vector<1x128xf32> to vector<432x128xf32>
    %47 = arith.addf %45, %46 : vector<432x128xf32>
    %cst_42 = arith.constant 0.00999999977 : f32
    %48 = vector.broadcast %cst_42 : f32 to vector<432x128xf32>
    %49 = arith.mulf %48, %47 : vector<432x128xf32>
    %50 = arith.maximumf %47, %49 : vector<432x128xf32>
    %c0_43 = arith.constant 0 : index
    %c0_44 = arith.constant 0 : index
    %51 = vector.load %arg5[%c0_43, %c0_44] : memref<432x1xf32, #tpu.memory_space<vmem>>, vector<432x1xf32>
    %52 = vector.broadcast %51 : vector<432x1xf32> to vector<432x128xf32>
    %53 = arith.mulf %50, %52 : vector<432x128xf32>
    %c32_45 = arith.constant 32 : index
    %c0_46 = arith.constant 0 : index
    %54 = vector.load %arg8[%c32_45, %c0_46] : memref<496x128xf32, #tpu.memory_space<vmem>>, vector<432x128xf32>
    tpu.vector_store %arg8[%c32_45, %c0_46], %53 {strides = array<i32>} : memref<496x128xf32, #tpu.memory_space<vmem>>, vector<432x128xf32>,
    %c1 = arith.constant 1 : index
    %c0_47 = arith.constant 0 : index
    %c0_48 = arith.constant 0 : index
    %55 = vector.load %arg3[%c1, %c0_47, %c0_48] : memref<2x1x128xf32, #tpu.memory_space<vmem>>, vector<1x1x128xf32>
    %56 = vector.shape_cast %55 : vector<1x1x128xf32> to vector<1x128xf32>
    %c1_49 = arith.constant 1 : index
    %c0_50 = arith.constant 0 : index
    %c0_51 = arith.constant 0 : index
    %57 = vector.load %arg4[%c1_49, %c0_50, %c0_51] : memref<2x1x128xf32, #tpu.memory_space<vmem>>, vector<1x1x128xf32>
    %58 = vector.shape_cast %57 : vector<1x1x128xf32> to vector<1x128xf32>
    %c7_52 = arith.constant 7 : index
    %c0_53 = arith.constant 0 : index
    %59 = vector.load %arg8[%c7_52, %c0_53] : memref<496x128xf32, #tpu.memory_space<vmem>>, vector<432x128xf32>
    %60 = arith.truncf %59 : vector<432x128xf32> to vector<432x128xbf16>
    %c0_54 = arith.constant 0 : index
    %c0_55 = arith.constant 0 : index
    %61 = vector.load %arg9[%c0_54, %c0_55] : memref<432x1152xbf16, #tpu.memory_space<vmem>>, vector<432x128xbf16>
    tpu.vector_store %arg9[%c0_54, %c0_55], %60 {strides = array<i32>} : memref<432x1152xbf16, #tpu.memory_space<vmem>>, vector<432x128xbf16>,
    %c8_56 = arith.constant 8 : index
    %c0_57 = arith.constant 0 : index
    %62 = vector.load %arg8[%c8_56, %c0_57] : memref<496x128xf32, #tpu.memory_space<vmem>>, vector<432x128xf32>
    %63 = arith.truncf %62 : vector<432x128xf32> to vector<432x128xbf16>
    %c0_58 = arith.constant 0 : index
    %c128_59 = arith.constant 128 : index
    %64 = vector.load %arg9[%c0_58, %c128_59] : memref<432x1152xbf16, #tpu.memory_space<vmem>>, vector<432x128xbf16>
    tpu.vector_store %arg9[%c0_58, %c128_59], %63 {strides = array<i32>} : memref<432x1152xbf16, #tpu.memory_space<vmem>>, vector<432x128xbf16>,
    %c9_60 = arith.constant 9 : index
    %c0_61 = arith.constant 0 : index
    %65 = vector.load %arg8[%c9_60, %c0_61] : memref<496x128xf32, #tpu.memory_space<vmem>>, vector<432x128xf32>
    %66 = arith.truncf %65 : vector<432x128xf32> to vector<432x128xbf16>
    %c0_62 = arith.constant 0 : index
    %c256_63 = arith.constant 256 : index
    %67 = vector.load %arg9[%c0_62, %c256_63] : memref<432x1152xbf16, #tpu.memory_space<vmem>>, vector<432x128xbf16>
    tpu.vector_store %arg9[%c0_62, %c256_63], %66 {strides = array<i32>} : memref<432x1152xbf16, #tpu.memory_space<vmem>>, vector<432x128xbf16>,
    %c31_64 = arith.constant 31 : index
    %c0_65 = arith.constant 0 : index
    %68 = vector.load %arg8[%c31_64, %c0_65] : memref<496x128xf32, #tpu.memory_space<vmem>>, vector<432x128xf32>
    %69 = arith.truncf %68 : vector<432x128xf32> to vector<432x128xbf16>
    %c0_66 = arith.constant 0 : index
    %c384_67 = arith.constant 384 : index
    %70 = vector.load %arg9[%c0_66, %c384_67] : memref<432x1152xbf16, #tpu.memory_space<vmem>>, vector<432x128xbf16>
    tpu.vector_store %arg9[%c0_66, %c384_67], %69 {strides = array<i32>} : memref<432x1152xbf16, #tpu.memory_space<vmem>>, vector<432x128xbf16>,
    %c32_68 = arith.constant 32 : index
    %c0_69 = arith.constant 0 : index
    %71 = vector.load %arg8[%c32_68, %c0_69] : memref<496x128xf32, #tpu.memory_space<vmem>>, vector<432x128xf32>
    %72 = arith.truncf %71 : vector<432x128xf32> to vector<432x128xbf16>
    %c0_70 = arith.constant 0 : index
    %c512_71 = arith.constant 512 : index
    %73 = vector.load %arg9[%c0_70, %c512_71] : memref<432x1152xbf16, #tpu.memory_space<vmem>>, vector<432x128xbf16>
    tpu.vector_store %arg9[%c0_70, %c512_71], %72 {strides = array<i32>} : memref<432x1152xbf16, #tpu.memory_space<vmem>>, vector<432x128xbf16>,
    %c33_72 = arith.constant 33 : index
    %c0_73 = arith.constant 0 : index
    %74 = vector.load %arg8[%c33_72, %c0_73] : memref<496x128xf32, #tpu.memory_space<vmem>>, vector<432x128xf32>
    %75 = arith.truncf %74 : vector<432x128xf32> to vector<432x128xbf16>
    %c0_74 = arith.constant 0 : index
    %c640_75 = arith.constant 640 : index
    %76 = vector.load %arg9[%c0_74, %c640_75] : memref<432x1152xbf16, #tpu.memory_space<vmem>>, vector<432x128xbf16>
    tpu.vector_store %arg9[%c0_74, %c640_75], %75 {strides = array<i32>} : memref<432x1152xbf16, #tpu.memory_space<vmem>>, vector<432x128xbf16>,
    %c55_76 = arith.constant 55 : index
    %c0_77 = arith.constant 0 : index
    %77 = vector.load %arg8[%c55_76, %c0_77] : memref<496x128xf32, #tpu.memory_space<vmem>>, vector<432x128xf32>
    %78 = arith.truncf %77 : vector<432x128xf32> to vector<432x128xbf16>
    %c0_78 = arith.constant 0 : index
    %c768_79 = arith.constant 768 : index
    %79 = vector.load %arg9[%c0_78, %c768_79] : memref<432x1152xbf16, #tpu.memory_space<vmem>>, vector<432x128xbf16>
    tpu.vector_store %arg9[%c0_78, %c768_79], %78 {strides = array<i32>} : memref<432x1152xbf16, #tpu.memory_space<vmem>>, vector<432x128xbf16>,
    %c56_80 = arith.constant 56 : index
    %c0_81 = arith.constant 0 : index
    %80 = vector.load %arg8[%c56_80, %c0_81] : memref<496x128xf32, #tpu.memory_space<vmem>>, vector<432x128xf32>
    %81 = arith.truncf %80 : vector<432x128xf32> to vector<432x128xbf16>
    %c0_82 = arith.constant 0 : index
    %c896_83 = arith.constant 896 : index
    %82 = vector.load %arg9[%c0_82, %c896_83] : memref<432x1152xbf16, #tpu.memory_space<vmem>>, vector<432x128xbf16>
    tpu.vector_store %arg9[%c0_82, %c896_83], %81 {strides = array<i32>} : memref<432x1152xbf16, #tpu.memory_space<vmem>>, vector<432x128xbf16>,
    %c57_84 = arith.constant 57 : index
    %c0_85 = arith.constant 0 : index
    %83 = vector.load %arg8[%c57_84, %c0_85] : memref<496x128xf32, #tpu.memory_space<vmem>>, vector<432x128xf32>
    %84 = arith.truncf %83 : vector<432x128xf32> to vector<432x128xbf16>
    %c0_86 = arith.constant 0 : index
    %c1024_87 = arith.constant 1024 : index
    %85 = vector.load %arg9[%c0_86, %c1024_87] : memref<432x1152xbf16, #tpu.memory_space<vmem>>, vector<432x128xbf16>
    tpu.vector_store %arg9[%c0_86, %c1024_87], %84 {strides = array<i32>} : memref<432x1152xbf16, #tpu.memory_space<vmem>>, vector<432x128xbf16>,
    %c0_88 = arith.constant 0 : index
    %c0_89 = arith.constant 0 : index
    %86 = vector.load %arg9[%c0_88, %c0_89] : memref<432x1152xbf16, #tpu.memory_space<vmem>>, vector<432x1152xbf16>
    %c1_90 = arith.constant 1 : index
    %c0_91 = arith.constant 0 : index
    %c0_92 = arith.constant 0 : index
    %87 = vector.load %arg2[%c1_90, %c0_91, %c0_92] : memref<2x1152x128xbf16, #tpu.memory_space<vmem>>, vector<1x1152x128xbf16>
    %88 = vector.shape_cast %87 : vector<1x1152x128xbf16> to vector<1152x128xbf16>
    %cst_93 = arith.constant dense<0.000000e+00> : vector<432x128xf32>
    %89 = tpu.matmul %86, %88, %cst_93 {dimension_numbers = #tpu.dot_dimension_numbers<[1], [0], [0], [1], [0, 0, 1, 1], [], []>} : vector<432x1152xbf16>, vector<1152x128xbf16>, vector<432x128xf32> -> vector<432x128xf32>
    %90 = vector.broadcast %56 : vector<1x128xf32> to vector<432x128xf32>
    %91 = arith.mulf %89, %90 : vector<432x128xf32>
    %92 = vector.broadcast %58 : vector<1x128xf32> to vector<432x128xf32>
    %93 = arith.addf %91, %92 : vector<432x128xf32>
    %cst_94 = arith.constant 0.00999999977 : f32
    %94 = vector.broadcast %cst_94 : f32 to vector<432x128xf32>
    %95 = arith.mulf %94, %93 : vector<432x128xf32>
    %96 = arith.maximumf %93, %95 : vector<432x128xf32>
    %97 = arith.truncf %96 : vector<432x128xf32> to vector<432x128xbf16>
    %c0_95 = arith.constant 0 : index
    %c0_96 = arith.constant 0 : index
    %c0_97 = arith.constant 0 : index
    %98 = vector.load %arg6[%c0_95, %c0_96, %c0_97] : memref<1x432x128xbf16, #tpu.memory_space<vmem>>, vector<1x432x128xbf16>
    %99 = vector.shape_cast %98 : vector<1x432x128xbf16> to vector<432x128xbf16>
    %100 = vector.shape_cast %97 : vector<432x128xbf16> to vector<1x432x128xbf16>
    tpu.vector_store %arg6[%c0_95, %c0_96, %c0_97], %100 {strides = array<i32>} : memref<1x432x128xbf16, #tpu.memory_space<vmem>>, vector<1x432x128xbf16>,
    return
  }
  func.func @transform_0(%arg0: i32) -> (i32, i32, i32) {
    %c0_i32 = arith.constant 0 : i32
    %c0_i32_0 = arith.constant 0 : i32
    %c0_i32_1 = arith.constant 0 : i32
    return %arg0, %c0_i32, %c0_i32_0 : i32, i32, i32
  }
  func.func @transform_1(%arg0: i32) -> (i32, i32, i32) {
    %c0_i32 = arith.constant 0 : i32
    %c0_i32_0 = arith.constant 0 : i32
    %c0_i32_1 = arith.constant 0 : i32
    %c0_i32_2 = arith.constant 0 : i32
    return %c0_i32, %c0_i32_0, %c0_i32_1 : i32, i32, i32
  }
  func.func @transform_2(%arg0: i32) -> (i32, i32, i32) {
    %c0_i32 = arith.constant 0 : i32
    %c0_i32_0 = arith.constant 0 : i32
    %c0_i32_1 = arith.constant 0 : i32
    %c0_i32_2 = arith.constant 0 : i32
    return %c0_i32, %c0_i32_0, %c0_i32_1 : i32, i32, i32
  }
  func.func @transform_3(%arg0: i32) -> (i32, i32, i32) {
    %c0_i32 = arith.constant 0 : i32
    %c0_i32_0 = arith.constant 0 : i32
    %c0_i32_1 = arith.constant 0 : i32
    %c0_i32_2 = arith.constant 0 : i32
    return %c0_i32, %c0_i32_0, %c0_i32_1 : i32, i32, i32
  }
  func.func @transform_4(%arg0: i32) -> (i32, i32) {
    %c0_i32 = arith.constant 0 : i32
    %c0_i32_0 = arith.constant 0 : i32
    %c0_i32_1 = arith.constant 0 : i32
    return %c0_i32, %c0_i32_0 : i32, i32
  }
  func.func @transform_5(%arg0: i32) -> (i32, i32, i32) {
    %c0_i32 = arith.constant 0 : i32
    %c0_i32_0 = arith.constant 0 : i32
    %c0_i32_1 = arith.constant 0 : i32
    return %arg0, %c0_i32, %c0_i32_0 : i32, i32, i32
  }
}

</mosaic_0001>

<bundles_post_ra>
// kernel: stacked_conv_layers.1
= control target key start
LH: loop header
LB: loop body
LE: loop exit
PB: predicated region body
PF: predicated region fallthrough
CT: control target
= control target key end

     0   :  { %s9873_s18 = smov 0   ;;  %s12415_s0 = inlined_call_operand.vmem [shape: bf16[2,432,128], index: 0, kind: input, shape index: {}]   ;;  %s12416_s1 = inlined_call_operand.vmem [shape: bf16[2,1152,128], index: 1, kind: input, shape index: {}]   ;;  %s12417_s2 = inlined_call_operand.vmem [shape: f32[2,1,128], index: 2, kind: input, shape index: {}]   ;;  %s12418_s3 = inlined_call_operand.vmem [shape: f32[2,1,128], index: 3, kind: input, shape index: {}]   ;;  %s12419_s4 = inlined_call_operand.vmem [shape: f32[432,1], index: 4, kind: input, shape index: {}]   ;;  %s12420_s5 = inlined_call_operand.vmem [shape: bf16[2,432,128], index: 5, kind: output, shape index: {}]  }
   0x1 LB: > { %s7696_s19 = sadd.s32 4294967295, %s9837_s18   ;;  %p7700_p0 = scmp.ge.s32.totalorder %s9837_s18, 1  ;;  %s9837_s18 = sphi %s9873_s18, %s15_s18  }
   0x2   : > { %p187_p1 = scmp.lt.s32.totalorder %s9837_s18, 3 }
   0x4   : > { %p188_p2 = pnand %p7700_p0, %p187_p1 }
   0x6   : > { %191 = sbr.rel (%p188_p2) target bundleno = 2464 (0x9a0), region = 40 }
   0xd   : > { %v9598_v0 = vld [vmem:[%s12416_s1] sm:$0xff]   ;;  %v12421_v1 = vmov 0   ;;  %v9599_v2 = vld [vmem:[%s12416_s1 + $0x8] sm:$0xff]   ;;  %v9840_v3 = vmov 0.0   ;;  %p215_p3 = scmp.lt.s32.totalorder %s7696_s19, 1  ;;  %v9841_v4 = vmov 0.0|0.0  }
   0xe   : > { %2197 = vmatprep.subr.bf16.mxu0 %v12421_v1  ;;  %9596 = vset.pattern.permute.xlu0 %v12421_v1  ;;  %227 = vst [vmem:[#allocation2 + $0x8] sm:$0xff] %v9840_v3  ;;  %228 = vst [vmem:[#allocation2 + $0x10] sm:$0xff] %v9840_v3  ;;  %v9600_v5 = vld [vmem:[%s12416_s1 + $0x10] sm:$0xff]   ;;  %v9601_v6 = vld [vmem:[%s12416_s1 + $0x18] sm:$0xff]   ;;  %vm9842_vm0 = vmmov 0  }
   0xf   : > { %2198 = vmatpush1.bf16.msra.mxu0 %v9598_v0  ;;  %226 = vst [vmem:[#allocation2] sm:$0xff] %v9840_v3  ;;  %229 = vst [vmem:[#allocation2 + $0x18] sm:$0xff] %v9840_v3  ;;  %9597 = vset.pattern.permute.xlu1 %v12421_v1  ;;  %s12763_s19 = smov (!%p215_p3, %s7696_s19), 1  ;;  %v9602_v7 = vld [vmem:[%s12416_s1 + $0x20] sm:$0xff]   ;;  %v9603_v9 = vld [vmem:[%s12416_s1 + $0x28] sm:$0xff]  }
  0x10   : > { %230 = vst [vmem:[#allocation2 + $0x1d0] sm:$0xff] %v9840_v3  ;;  %231 = vst [vmem:[#allocation2 + $0x1d8] sm:$0xff] %v9840_v3  ;;  %2199 = vmatprep.subr.bf16.mxu0 %v12421_v1  ;;  %5898 = vmatprep.subr.bf16.mxu1 %v12421_v1  ;;  %s9584_s28 = smul.u32 216, %s12763_s19  ;;  %v9604_v19 = vld [vmem:[%s12416_s1 + $0x30] sm:$0xff]   ;;  %v9605_v31 = vld [vmem:[%s12416_s1 + $0x38] sm:$0xff]  }
  0x11   : > { %232 = vst [vmem:[#allocation2 + $0x1e0] sm:$0xff] %v9840_v3  ;;  %233 = vst [vmem:[#allocation2 + $0x1e8] sm:$0xff] %v9840_v3  ;;  %2229 = vmatprep.mubr.bf16.mxu0 %v9841_v4  ;;  %v9606_v36 = vld [vmem:[%s12416_s1 + $0x40] sm:$0xff]   ;;  %v9607_v43 = vld [vmem:[%s12416_s1 + $0x48] sm:$0xff]  }
  0x12   : > { %234 = vst [vmem:[#allocation3] sm:$0xff] %v9840_v3  ;;  %235 = vst [vmem:[#allocation3 + $0x8] sm:$0xff] %v9840_v3  ;;  %s9931_s8 = scalar_lea.vmem %s12415_s0, %s9584_s28  ;;  %v9608_v49 = vld [vmem:[%s12416_s1 + $0x50] sm:$0xff]   ;;  %v9609_v54 = vld [vmem:[%s12416_s1 + $0x58] sm:$0xff]   ;;  %s12280_s20 = scalar_lea.vmem %s12420_s5, %s9584_s28 }
  0x13   : > { %236 = vst [vmem:[#allocation3 + $0x10] sm:$0xff] %v9840_v3  ;;  %237 = vst [vmem:[#allocation3 + $0x18] sm:$0xff] %v9840_v3  ;;  %2200 = vmatpush1.bf16.msra.mxu0 %v9599_v2  ;;  %v9935_v8 = vld [vmem:[%s9931_s8] sm:$0xff]   ;;  %v8350_v12 = vld [vmem:[%s9931_s8 + $0x8] sm:$0xff]  }
  0x14   : > { %238 = vst [vmem:[#allocation3 + $0x1d0] sm:$0xff] %v9840_v3  ;;  %239 = vst [vmem:[#allocation3 + $0x1d8] sm:$0xff] %v9840_v3  ;;  %2201 = vmatprep.subr.bf16.mxu0 %v12421_v1  ;;  %v8109_v10 = vunpack.c.l.bf16 %v9935_v8  ;;  %v8110_v11 = vunpack.c.h.bf16 %v9935_v8  ;;  %v8113_v13 = vunpack.c.l.bf16 %v8350_v12  ;;  %v8114_v14 = vunpack.c.h.bf16 %v8350_v12  ;;  %v8351_v15 = vld [vmem:[%s9931_s8 + $0x10] sm:$0xff]   ;;  %v8352_v18 = vld [vmem:[%s9931_s8 + $0x18] sm:$0xff]  }
  0x15   : > { %240 = vst [vmem:[#allocation3 + $0x1e0] sm:$0xff] %v9840_v3  ;;  %241 = vst [vmem:[#allocation3 + $0x1e8] sm:$0xff] %v9840_v3  ;;  %v8117_v16 = vunpack.c.l.bf16 %v8351_v15  ;;  %v8118_v17 = vunpack.c.h.bf16 %v8351_v15  ;;  %v8121_v20 = vunpack.c.l.bf16 %v8352_v18  ;;  %v8122_v21 = vunpack.c.h.bf16 %v8352_v18  ;;  %v8353_v22 = vld [vmem:[%s9931_s8 + $0x20] sm:$0xff]   ;;  %v8354_v25 = vld [vmem:[%s9931_s8 + $0x28] sm:$0xff]  }
  0x16   : > { %350 = vst [vmem:[#allocation2 + $0x20] sm:$0xff] %v8109_v10  ;;  %351 = vst [vmem:[#allocation2 + $0x28] sm:$0xff] %v8110_v11  ;;  %v8125_v23 = vunpack.c.l.bf16 %v8353_v22  ;;  %v8126_v24 = vunpack.c.h.bf16 %v8353_v22  ;;  %v8355_v26 = vld [vmem:[%s9931_s8 + $0x30] sm:$0xff]   ;;  %v8129_v27 = vunpack.c.l.bf16 %v8354_v25  ;;  %v8130_v28 = vunpack.c.h.bf16 %v8354_v25  ;;  %v8356_v32 = vld [vmem:[%s9931_s8 + $0x38] sm:$0xff]  }
  0x17   : > { %2202 = vmatpush1.bf16.msra.mxu0 %v9600_v5  ;;  %352 = vst [vmem:[#allocation2 + $0x30] sm:$0xff] %v8113_v13  ;;  %353 = vst [vmem:[#allocation2 + $0x38] sm:$0xff] %v8114_v14  ;;  %v8133_v29 = vunpack.c.l.bf16 %v8355_v26  ;;  %v8134_v30 = vunpack.c.h.bf16 %v8355_v26  ;;  %v8137_v33 = vunpack.c.l.bf16 %v8356_v32  ;;  %v8138_v34 = vunpack.c.h.bf16 %v8356_v32  ;;  %v8357_v35 = vld [vmem:[%s9931_s8 + $0x40] sm:$0xff]   ;;  %v8358_v39 = vld [vmem:[%s9931_s8 + $0x48] sm:$0xff]  }
  0x18   : > { %2203 = vmatprep.subr.bf16.mxu0 %v12421_v1  ;;  %354 = vst [vmem:[#allocation2 + $0x40] sm:$0xff] %v8117_v16  ;;  %355 = vst [vmem:[#allocation2 + $0x48] sm:$0xff] %v8118_v17  ;;  %v8141_v37 = vunpack.c.l.bf16 %v8357_v35  ;;  %v8142_v38 = vunpack.c.h.bf16 %v8357_v35  ;;  %v8145_v40 = vunpack.c.l.bf16 %v8358_v39  ;;  %v8146_v41 = vunpack.c.h.bf16 %v8358_v39  ;;  %v8359_v42 = vld [vmem:[%s9931_s8 + $0x50] sm:$0xff]   ;;  %v8360_v46 = vld [vmem:[%s9931_s8 + $0x58] sm:$0xff]  }
  0x19   : > { %356 = vst [vmem:[#allocation2 + $0x50] sm:$0xff] %v8121_v20  ;;  %357 = vst [vmem:[#allocation2 + $0x58] sm:$0xff] %v8122_v21  ;;  %v8149_v44 = vunpack.c.l.bf16 %v8359_v42  ;;  %v8150_v45 = vunpack.c.h.bf16 %v8359_v42  ;;  %v8153_v47 = vunpack.c.l.bf16 %v8360_v46  ;;  %v8154_v48 = vunpack.c.h.bf16 %v8360_v46  ;;  %v8361_v50 = vld [vmem:[%s9931_s8 + $0x60] sm:$0xff]   ;;  %v8362_v53 = vld [vmem:[%s9931_s8 + $0x68] sm:$0xff]  }
  0x1a   : > { %358 = vst [vmem:[#allocation2 + $0x60] sm:$0xff] %v8125_v23  ;;  %359 = vst [vmem:[#allocation2 + $0x68] sm:$0xff] %v8126_v24  ;;  %v8157_v51 = vunpack.c.l.bf16 %v8361_v50  ;;  %v8158_v52 = vunpack.c.h.bf16 %v8361_v50  ;;  %v8161_v55 = vunpack.c.l.bf16 %v8362_v53  ;;  %v8363_v56 = vld [vmem:[%s9931_s8 + $0x70] sm:$0xff]   ;;  %v9610_v57 = vld [vmem:[%s12416_s1 + $0x60] sm:$0xff]   ;;  %v8162_v58 = vunpack.c.h.bf16 %v8362_v53 }
  0x1b   : > { %2204 = vmatpush1.bf16.msra.mxu0 %v9601_v6  ;;  %360 = vst [vmem:[#allocation2 + $0x70] sm:$0xff] %v8129_v27  ;;  %361 = vst [vmem:[#allocation2 + $0x78] sm:$0xff] %v8130_v28  ;;  %v8165_v59 = vunpack.c.l.bf16 %v8363_v56  ;;  %v9611_v60 = vld [vmem:[%s12416_s1 + $0x68] sm:$0xff]   ;;  %v8364_v61 = vld [vmem:[%s9931_s8 + $0x78] sm:$0xff]   ;;  %v8166_v62 = vunpack.c.h.bf16 %v8363_v56  ;;  %v569_v13 = vpack.c.bf16 %v8109_v10, %v9840_v3 }
  0x1c   : > { %2205 = vmatprep.subr.bf16.mxu0 %v12421_v1  ;;  %362 = vst [vmem:[#allocation2 + $0x80] sm:$0xff] %v8133_v29  ;;  %363 = vst [vmem:[#allocation2 + $0x88] sm:$0xff] %v8134_v30  ;;  %v8169_v63 = vunpack.c.l.bf16 %v8364_v61  ;;  %v9612_v0 = vld [vmem:[%s12416_s1 + $0x70] sm:$0xff]   ;;  %v9613_v2 = vld [vmem:[%s12416_s1 + $0x78] sm:$0xff]  }
  0x1d   : > { %364 = vst [vmem:[#allocation2 + $0x90] sm:$0xff] %v8137_v33  ;;  %365 = vst [vmem:[#allocation2 + $0x98] sm:$0xff] %v8138_v34  ;;  %v406_v4 = vld [vmem:[#allocation2 + $0x7] sm:$0xff]  ;;  %v407_v5 = vld [vmem:[#allocation2 + $0xf] sm:$0xff] }
  0x1e   : > { %366 = vst [vmem:[#allocation2 + $0xa0] sm:$0xff] %v8141_v37  ;;  %367 = vst [vmem:[#allocation2 + $0xa8] sm:$0xff] %v8142_v38  ;;  %v8365_v6 = vld [vmem:[%s9931_s8 + $0x80] sm:$0xff]   ;;  %v408_v14 = vld [vmem:[#allocation2 + $0x17] sm:$0xff] }
  0x1f   : > { %2206 = vmatpush1.bf16.msra.mxu0 %v9602_v7  ;;  %368 = vst [vmem:[#allocation2 + $0xb0] sm:$0xff] %v8145_v40  ;;  %369 = vst [vmem:[#allocation2 + $0xb8] sm:$0xff] %v8146_v41  ;;  %v460_v7 = vpack.c.bf16 %v407_v5, %v406_v4  ;;  %v8173_v11 = vunpack.c.l.bf16 %v8365_v6  ;;  %v9614_v12 = vld [vmem:[%s12416_s1 + $0x80] sm:$0xff]   ;;  %v9616_v15 = vld [vmem:[%s12416_s1 + $0x88] sm:$0xff]   ;;  %v8174_v3 = vunpack.c.h.bf16 %v8365_v6 }
  0x20   : > { %2207 = vmatprep.subr.bf16.mxu0 %v12421_v1  ;;  %370 = vst [vmem:[#allocation2 + $0xc0] sm:$0xff] %v8149_v44  ;;  %371 = vst [vmem:[#allocation2 + $0xc8] sm:$0xff] %v8150_v45  ;;  %v10011_v16 = vld [vmem:[#allocation2 + $0x1f] sm:$0xff]  ;;  %v8366_v17 = vld [vmem:[%s9931_s8 + $0x88] sm:$0xff]  }
  0x21   : > { %372 = vst [vmem:[#allocation2 + $0xd0] sm:$0xff] %v8153_v47  ;;  %373 = vst [vmem:[#allocation2 + $0xd8] sm:$0xff] %v8154_v48  ;;  %v461_v8 = vpack.c.bf16 %v10011_v16, %v408_v14  ;;  %v8177_v10 = vunpack.c.l.bf16 %v8366_v17  ;;  %v9615_v18 = vld [vmem:[%s9931_s8 + $0x4] ss:$4 sps:$4 sm:$0xff]   ;;  %v9621_v20 = vld [vmem:[%s12416_s1 + $0x98] sm:$0xff]   ;;  %v8178_v25 = vunpack.c.h.bf16 %v8366_v17 }
  0x22   : > { %374 = vst [vmem:[#allocation2 + $0xe0] sm:$0xff] %v8157_v51  ;;  %375 = vst [vmem:[#allocation2 + $0xe8] sm:$0xff] %v8158_v52  ;;  %v10024_v21 = vld [vmem:[#allocation2 + $0x27] sm:$0xff]  ;;  %v10026_v22 = vld [vmem:[#allocation2 + $0x2f] sm:$0xff] }
  0x23   : > { %2208 = vmatpush1.bf16.msra.mxu0 %v9603_v9  ;;  %376 = vst [vmem:[#allocation2 + $0xf0] sm:$0xff] %v8161_v55  ;;  %377 = vst [vmem:[#allocation2 + $0xf8] sm:$0xff] %v8162_v58  ;;  %v8170_v9 = vunpack.c.h.bf16 %v8364_v61  ;;  %v8367_v23 = vld [vmem:[%s9931_s8 + $0x90] sm:$0xff]   ;;  %v462_v24 = vpack.c.bf16 %v10026_v22, %v10024_v21  ;;  %v9624_v28 = vld [vmem:[%s12416_s1 + $0xa0] sm:$0xff]  }
  0x24   : > { %2209 = vmatprep.subr.bf16.mxu0 %v12421_v1  ;;  %378 = vst [vmem:[#allocation2 + $0x100] sm:$0xff] %v8165_v59  ;;  %379 = vst [vmem:[#allocation2 + $0x108] sm:$0xff] %v8166_v62  ;;  %v8181_v26 = vunpack.c.l.bf16 %v8367_v23  ;;  %v9617_v27 = vld [vmem:[%s9931_s8 + $0xc] ss:$4 sps:$4 sm:$0xff]   ;;  %v10037_v29 = vld [vmem:[#allocation2 + $0x37] sm:$0xff]  ;;  %v8182_v34 = vunpack.c.h.bf16 %v8367_v23 }
  0x25   : > { %380 = vst [vmem:[#allocation2 + $0x110] sm:$0xff] %v8169_v63  ;;  %381 = vst [vmem:[#allocation2 + $0x118] sm:$0xff] %v8170_v9  ;;  %v10039_v30 = vld [vmem:[#allocation2 + $0x3f] sm:$0xff]  ;;  %v9629_v37 = vld [vmem:[%s12416_s1 + $0xb0] sm:$0xff]  }
  0x26   : > { %382 = vst [vmem:[#allocation2 + $0x120] sm:$0xff] %v8173_v11  ;;  %383 = vst [vmem:[#allocation2 + $0x128] sm:$0xff] %v8174_v3  ;;  %v8368_v32 = vld [vmem:[%s9931_s8 + $0x98] sm:$0xff]   ;;  %v463_v33 = vpack.c.bf16 %v10039_v30, %v10037_v29  ;;  %v10053_v38 = vld [vmem:[#allocation2 + $0x47] sm:$0xff] }
  0x27   : > { %2210 = vmatpush1.bf16.msra.mxu0 %v9604_v19  ;;  %v9618_v19 = vld [vmem:[%s12416_s1 + $0x90] sm:$0xff]   ;;  %384 = vst [vmem:[#allocation2 + $0x130] sm:$0xff] %v8177_v10  ;;  %385 = vst [vmem:[#allocation2 + $0x138] sm:$0xff] %v8178_v25  ;;  %v8185_v35 = vunpack.c.l.bf16 %v8368_v32  ;;  %v9632_v40 = vld [vmem:[%s12416_s1 + $0xb8] sm:$0xff]  }
  0x28   : > { %2211 = vmatprep.subr.bf16.mxu0 %v12421_v1  ;;  %386 = vst [vmem:[#allocation2 + $0x140] sm:$0xff] %v8181_v26  ;;  %387 = vst [vmem:[#allocation2 + $0x148] sm:$0xff] %v8182_v34  ;;  %v10055_v39 = vld [vmem:[#allocation2 + $0x4f] sm:$0xff]  ;;  %v8369_v41 = vld [vmem:[%s9931_s8 + $0xa0] sm:$0xff]  }
  0x29   : > { %388 = vst [vmem:[#allocation2 + $0x150] sm:$0xff] %v8185_v35  ;;  %v464_v42 = vpack.c.bf16 %v10055_v39, %v10053_v38  ;;  %v8189_v44 = vunpack.c.l.bf16 %v8369_v41  ;;  %v9620_v45 = vld [vmem:[%s9931_s8 + $0x1c] ss:$4 sps:$4 sm:$0xff]   ;;  %v8370_v50 = vld [vmem:[%s9931_s8 + $0xa8] sm:$0xff]   ;;  %v8190_v52 = vunpack.c.h.bf16 %v8369_v41  ;;  %v9640_v55 = vld [vmem:[%s12416_s1 + $0xd0] sm:$0xff]  }
  0x2a   : > { %v9634_v46 = vld [vmem:[%s12416_s1 + $0xc0] sm:$0xff]   ;;  %v10069_v47 = vld [vmem:[#allocation2 + $0x57] sm:$0xff]  ;;  %v8193_v53 = vunpack.c.l.bf16 %v8370_v50  ;;  %v8194_v61 = vunpack.c.h.bf16 %v8370_v50  ;;  %v9623_v63 = vld [vmem:[%s9931_s8 + $0x2c] ss:$4 sps:$4 sm:$0xff]  }
  0x2b   : > { %2212 = vmatpush1.bf16.msra.mxu0 %v9605_v31  ;;  %v9626_v31 = vld [vmem:[%s12416_s1 + $0xa8] sm:$0xff]   ;;  %390 = vst [vmem:[#allocation2 + $0x160] sm:$0xff] %v8189_v44  ;;  %v10071_v48 = vld [vmem:[#allocation2 + $0x5f] sm:$0xff]  ;;  %391 = vst [vmem:[#allocation2 + $0x168] sm:$0xff] %v8190_v52 }
  0x2c   : > { %2213 = vmatprep.subr.bf16.mxu0 %v12421_v1  ;;  %v465_v51 = vpack.c.bf16 %v10071_v48, %v10069_v47  ;;  %392 = vst [vmem:[#allocation2 + $0x170] sm:$0xff] %v8193_v53  ;;  %v10085_v56 = vld [vmem:[#allocation2 + $0x67] sm:$0xff]  ;;  %v9642_v58 = vld [vmem:[%s12416_s1 + $0xd8] sm:$0xff]   ;;  %v8371_v59 = vld [vmem:[%s9931_s8 + $0xb0] sm:$0xff]  }
  0x2d   : > { %v8197_v62 = vunpack.c.l.bf16 %v8371_v59  ;;  %393 = vst [vmem:[#allocation2 + $0x178] sm:$0xff] %v8194_v61  ;;  %v10103_v4 = vld [vmem:[#allocation2 + $0x7f] sm:$0xff]  ;;  %v9648_v5 = vld [vmem:[%s12416_s1 + $0xe8] sm:$0xff]   ;;  %v8198_v9 = vunpack.c.h.bf16 %v8371_v59  ;;  %v10148_v35 = vld [vmem:[#allocation2 + $0xb7] sm:$0xff] }
  0x2e   : > { %v8372_v6 = vld [vmem:[%s9931_s8 + $0xb8] sm:$0xff]   ;;  %v10116_v14 = vld [vmem:[#allocation2 + $0x8f] sm:$0xff]  ;;  %v8373_v17 = vld [vmem:[%s9931_s8 + $0xc0] sm:$0xff]  }
  0x2f   : > { %2214 = vmatpush1.bf16.msra.mxu0 %v9606_v36  ;;  %v9619_v36 = vld [vmem:[%s9931_s8 + $0x14] ss:$4 sps:$4 sm:$0xff]   ;;  %394 = vst [vmem:[#allocation2 + $0x180] sm:$0xff] %v8197_v62  ;;  %v8201_v11 = vunpack.c.l.bf16 %v8372_v6  ;;  %395 = vst [vmem:[#allocation2 + $0x188] sm:$0xff] %v8198_v9  ;;  %v8202_v3 = vunpack.c.h.bf16 %v8372_v6  ;;  %v8205_v10 = vunpack.c.l.bf16 %v8373_v17  ;;  %v10131_v23 = vld [vmem:[%s9931_s8 + $0xc8] sm:$0xff]   ;;  %v8206_v25 = vunpack.c.h.bf16 %v8373_v17 }
  0x30   : > { %2215 = vmatprep.subr.bf16.mxu0 %v12421_v1  ;;  %v8209_v26 = vunpack.c.l.bf16 %v10131_v23  ;;  %v9630_v34 = vld [vmem:[%s9931_s8 + $0x4c] ss:$4 sps:$4 sm:$0xff]   ;;  %v9633_v44 = vld [vmem:[%s9931_s8 + $0x5c] ss:$4 sps:$4 sm:$0xff]   ;;  %v9635_v50 = vld [vmem:[%s9931_s8 + $0x64] ss:$4 sps:$4 sm:$0xff]  }
  0x31   : > { %396 = vst [vmem:[#allocation2 + $0x190] sm:$0xff] %v8201_v11  ;;  %397 = vst [vmem:[#allocation2 + $0x198] sm:$0xff] %v8202_v3  ;;  %v10155_v41 = vld [vmem:[#allocation2 + $0xc7] sm:$0xff]  ;;  %v10171_v52 = vld [vmem:[#allocation2 + $0xef] sm:$0xff] }
  0x32   : > { %398 = vst [vmem:[#allocation2 + $0x1a0] sm:$0xff] %v8205_v10  ;;  %399 = vst [vmem:[#allocation2 + $0x1a8] sm:$0xff] %v8206_v25  ;;  %v10183_v61 = vld [vmem:[#allocation2 + $0x107] sm:$0xff]  ;;  %v10185_v62 = vld [vmem:[#allocation2 + $0x10f] sm:$0xff] }
  0x33   : > { %2216 = vmatpush1.bf16.msra.mxu0 %v9607_v43  ;;  %v8186_v43 = vunpack.c.h.bf16 %v8368_v32  ;;  %400 = vst [vmem:[#allocation2 + $0x1b0] sm:$0xff] %v8209_v26  ;;  %v9653_v32 = vld [vmem:[%s12416_s1 + $0xf8] sm:$0xff]   ;;  %v9641_v9 = vld [vmem:[%s9931_s8 + $0x84] ss:$4 sps:$4 sm:$0xff]   ;;  %v9643_v17 = vld [vmem:[%s9931_s8 + $0x8c] ss:$4 sps:$4 sm:$0xff]  }
  0x34   : > { %2217 = vmatprep.subr.bf16.mxu0 %v12421_v1  ;;  %v10192_v6 = vld [vmem:[#allocation2 + $0x11f] sm:$0xff]  ;;  %v10197_v11 = vld [vmem:[#allocation2 + $0x127] sm:$0xff]  ;;  %v10213_v25 = vld [vmem:[#allocation2 + $0x14f] sm:$0xff] }
  0x35   : > { %389 = vst [vmem:[#allocation2 + $0x158] sm:$0xff] %v8186_v43  ;;  %v10206_v3 = vld [vmem:[#allocation2 + $0x13f] sm:$0xff] }
  0x37   : > { %2218 = vmatpush1.bf16.msra.mxu0 %v9608_v49  ;;  %v9637_v49 = vld [vmem:[%s12416_s1 + $0xc8] sm:$0xff]  }
  0x38   : > { %2219 = vmatprep.subr.bf16.mxu0 %v12421_v1 }
  0x3b   : > { %2220 = vmatpush1.bf16.msra.mxu0 %v9609_v54  ;;  %v9622_v54 = vld [vmem:[%s9931_s8 + $0x24] ss:$4 sps:$4 sm:$0xff]  }
  0x3c   : > { %2221 = vmatprep.subr.bf16.mxu0 %v12421_v1 }
  0x3f   : > { %2222 = vmatpush1.bf16.msra.mxu0 %v9610_v57  ;;  %v10087_v57 = vld [vmem:[#allocation2 + $0x6f] sm:$0xff] }
  0x40   : > { %2223 = vmatprep.subr.bf16.mxu0 %v12421_v1 }
  0x43   : > { %2224 = vmatpush1.bf16.msra.mxu0 %v9611_v60  ;;  %v466_v60 = vpack.c.bf16 %v10087_v57, %v10085_v56 }
  0x44   : > { %2225 = vmatprep.subr.bf16.mxu0 %v12421_v1 }
  0x47   : > { %2226 = vmatpush1.bf16.msra.mxu0 %v9612_v0  ;;  %v9645_v0 = vld [vmem:[%s12416_s1 + $0xe0] sm:$0xff]  }
  0x48   : > { %2227 = vmatprep.subr.bf16.mxu0 %v12421_v1 }
  0x4b   : > { %2228 = vmatpush1.bf16.msra.mxu0 %v9613_v2  ;;  %v10101_v2 = vld [vmem:[#allocation2 + $0x77] sm:$0xff] }
  0x4c   : > { %2446 = vmatprep.subr.bf16.mxu0 %v12421_v1 }
  0x4e   : > { %2230 = vmatmul.mubr.bf16.vlgmr.msra.gmra.mrb[0].mxu0 %v460_v7  ;;  %v467_v7 = vpack.c.bf16 %v10103_v4, %v10101_v2 }
  0x4f   : > { %2447 = vmatpush1.bf16.msra.mxu0 %v9614_v12  ;;  %2237 = vmatprep.mubr.bf16.mxu0 %v569_v13  ;;  %v9625_v12 = vld [vmem:[%s9931_s8 + $0x34] ss:$4 sps:$4 sm:$0xff]   ;;  %v10114_v13 = vld [vmem:[#allocation2 + $0x87] sm:$0xff] }
  0x50   : > { %2448 = vmatprep.subr.bf16.mxu0 %v12421_v1 }
  0x53   : > { %2449 = vmatpush1.bf16.msra.mxu0 %v9616_v15  ;;  %v9650_v15 = vld [vmem:[%s12416_s1 + $0xf0] sm:$0xff]  }
  0x54   : > { %2450 = vmatprep.subr.bf16.mxu0 %v12421_v1 }
  0x56   : > { %2238 = vmatmul.mubr.bf16.gmra.mrb[4].mxu0 %v461_v8  ;;  %v468_v8 = vpack.c.bf16 %v10116_v14, %v10114_v13 }
  0x57   : > { %2245 = vmatprep.mubr.bf16.mxu0 %v9615_v18  ;;  %2451 = vmatpush1.bf16.msra.mxu0 %v9618_v19  ;;  %v9627_v18 = vld [vmem:[%s9931_s8 + $0x3c] ss:$4 sps:$4 sm:$0xff]  }
  0x58   : > { %2452 = vmatprep.subr.bf16.mxu0 %v12421_v1  ;;  %v10126_v19 = vld [vmem:[#allocation2 + $0x97] sm:$0xff] }
  0x5b   : > { %2453 = vmatpush1.bf16.msra.mxu0 %v9621_v20  ;;  %v10128_v20 = vld [vmem:[#allocation2 + $0x9f] sm:$0xff] }
  0x5c   : > { %2454 = vmatprep.subr.bf16.mxu0 %v12421_v1 }
  0x5e   : > { %2246 = vmatmul.mubr.bf16.gmra.mrb[8].mxu0 %v462_v24  ;;  %v469_v24 = vpack.c.bf16 %v10128_v20, %v10126_v19 }
  0x5f   : > { %2253 = vmatprep.mubr.bf16.mxu0 %v9617_v27  ;;  %2455 = vmatpush1.bf16.msra.mxu0 %v9624_v28  ;;  %v9628_v27 = vld [vmem:[%s9931_s8 + $0x44] ss:$4 sps:$4 sm:$0xff]  }
  0x60   : > { %2456 = vmatprep.subr.bf16.mxu0 %v12421_v1  ;;  %v10137_v28 = vld [vmem:[#allocation2 + $0xa7] sm:$0xff] }
  0x63   : > { %2457 = vmatpush1.bf16.msra.mxu0 %v9626_v31  ;;  %v10139_v31 = vld [vmem:[#allocation2 + $0xaf] sm:$0xff] }
  0x64   : > { %2458 = vmatprep.subr.bf16.mxu0 %v12421_v1 }
  0x66   : > { %2254 = vmatmul.mubr.bf16.gmra.mrb[12].mxu0 %v463_v33  ;;  %v470_v33 = vpack.c.bf16 %v10139_v31, %v10137_v28 }
  0x67   : > { %2261 = vmatprep.mubr.bf16.mxu0 %v9619_v36  ;;  %2459 = vmatpush1.bf16.msra.mxu0 %v9629_v37  ;;  %v10150_v36 = vld [vmem:[#allocation2 + $0xbf] sm:$0xff] }
  0x68   : > { %2460 = vmatprep.subr.bf16.mxu0 %v12421_v1  ;;  %v471_v37 = vpack.c.bf16 %v10150_v36, %v10148_v35 }
  0x6b   : > { %2461 = vmatpush1.bf16.msra.mxu0 %v9632_v40  ;;  %v9631_v40 = vld [vmem:[%s9931_s8 + $0x54] ss:$4 sps:$4 sm:$0xff]  }
  0x6c   : > { %2462 = vmatprep.subr.bf16.mxu0 %v12421_v1 }
  0x6e   : > { %2262 = vmatmul.mubr.bf16.gmra.mrb[16].mxu0 %v464_v42  ;;  %v10157_v42 = vld [vmem:[#allocation2 + $0xcf] sm:$0xff] }
  0x6f   : > { %2269 = vmatprep.mubr.bf16.mxu0 %v9620_v45  ;;  %2463 = vmatpush1.bf16.msra.mxu0 %v9634_v46  ;;  %v472_v43 = vpack.c.bf16 %v10157_v42, %v10155_v41  ;;  %v10162_v45 = vld [vmem:[#allocation2 + $0xd7] sm:$0xff]  ;;  %v10164_v46 = vld [vmem:[#allocation2 + $0xdf] sm:$0xff] }
  0x70   : > { %2464 = vmatprep.subr.bf16.mxu0 %v12421_v1 }
  0x73   : > { %2465 = vmatpush1.bf16.msra.mxu0 %v9637_v49  ;;  %v473_v49 = vpack.c.bf16 %v10164_v46, %v10162_v45 }
  0x74   : > { %2466 = vmatprep.subr.bf16.mxu0 %v12421_v1 }
  0x76   : > { %2270 = vmatmul.mubr.bf16.gmra.mrb[20].mxu0 %v465_v51  ;;  %v10169_v51 = vld [vmem:[#allocation2 + $0xe7] sm:$0xff] }
  0x77   : > { %2277 = vmatprep.mubr.bf16.mxu0 %v9622_v54  ;;  %2467 = vmatpush1.bf16.msra.mxu0 %v9640_v55  ;;  %v474_v53 = vpack.c.bf16 %v10171_v52, %v10169_v51  ;;  %v9636_v54 = vld [vmem:[%s9931_s8 + $0x6c] ss:$4 sps:$4 sm:$0xff]   ;;  %v10176_v55 = vld [vmem:[#allocation2 + $0xf7] sm:$0xff] }
  0x78   : > { %2468 = vmatprep.subr.bf16.mxu0 %v12421_v1 }
  0x7b   : > { %2469 = vmatpush1.bf16.msra.mxu0 %v9642_v58  ;;  %v10178_v58 = vld [vmem:[#allocation2 + $0xff] sm:$0xff] }
  0x7c   : > { %2470 = vmatprep.subr.bf16.mxu0 %v12421_v1  ;;  %v475_v59 = vpack.c.bf16 %v10178_v58, %v10176_v55 }
  0x7e   : > { %2278 = vmatmul.mubr.bf16.gmra.mrb[24].mxu0 %v466_v60  ;;  %v9638_v60 = vld [vmem:[%s9931_s8 + $0x74] ss:$4 sps:$4 sm:$0xff]  }
  0x7f   : > { %2285 = vmatprep.mubr.bf16.mxu0 %v9623_v63  ;;  %2471 = vmatpush1.bf16.msra.mxu0 %v9645_v0  ;;  %v476_v63 = vpack.c.bf16 %v10185_v62, %v10183_v61  ;;  %v9639_v0 = vld [vmem:[%s9931_s8 + $0x7c] ss:$4 sps:$4 sm:$0xff]  }
  0x80   : > { %2472 = vmatprep.subr.bf16.mxu0 %v12421_v1 }
  0x83   : > { %2473 = vmatpush1.bf16.msra.mxu0 %v9648_v5  ;;  %v10190_v5 = vld [vmem:[#allocation2 + $0x117] sm:$0xff] }
  0x84   : > { %2474 = vmatprep.subr.bf16.mxu0 %v12421_v1 }
  0x86   : > { %2286 = vmatmul.mubr.bf16.gmra.mrb[28].mxu0 %v467_v7  ;;  %v477_v7 = vpack.c.bf16 %v10192_v6, %v10190_v5 }
  0x87   : > { %2293 = vmatprep.mubr.bf16.mxu0 %v9625_v12  ;;  %2475 = vmatpush1.bf16.msra.mxu0 %v9650_v15  ;;  %v10199_v12 = vld [vmem:[#allocation2 + $0x12f] sm:$0xff] }
  0x88   : > { %2476 = vmatprep.subr.bf16.mxu0 %v12421_v1  ;;  %v478_v15 = vpack.c.bf16 %v10199_v12, %v10197_v11 }
  0x8b   : > { %2477 = vmatpush1.bf16.msra.mxu0 %v9653_v32  ;;  %v10218_v32 = vld [vmem:[#allocation2 + $0x157] sm:$0xff] }
  0x8c   : > { %2695 = vmatprep.subr.bf16.mxu0 %v12421_v1 }
  0x8e   : > { %2294 = vmatmul.mubr.bf16.gmra.mrb[32].mxu0 %v468_v8  ;;  %v10204_v8 = vld [vmem:[#allocation2 + $0x137] sm:$0xff] }
  0x8f   : > { %2301 = vmatprep.mubr.bf16.mxu0 %v9627_v18  ;;  %v479_v10 = vpack.c.bf16 %v10206_v3, %v10204_v8  ;;  %v9644_v18 = vld [vmem:[%s9931_s8 + $0x94] ss:$4 sps:$4 sm:$0xff]  }
  0x96   : > { %2302 = vmatmul.mubr.bf16.gmra.mrb[36].mxu0 %v469_v24  ;;  %v10211_v24 = vld [vmem:[#allocation2 + $0x147] sm:$0xff] }
  0x97   : > { %2309 = vmatprep.mubr.bf16.mxu0 %v9628_v27  ;;  %v480_v26 = vpack.c.bf16 %v10213_v25, %v10211_v24  ;;  %v9646_v27 = vld [vmem:[%s9931_s8 + $0x9c] ss:$4 sps:$4 sm:$0xff]  }
  0x9e   : > { %2310 = vmatmul.mubr.bf16.gmra.mrb[40].mxu0 %v470_v33  ;;  %v10220_v33 = vld [vmem:[#allocation2 + $0x15f] sm:$0xff] }
  0x9f   : > { %2317 = vmatprep.mubr.bf16.mxu0 %v9630_v34  ;;  %v481_v34 = vpack.c.bf16 %v10220_v33, %v10218_v32 }
  0xa6   : > { %2318 = vmatmul.mubr.bf16.gmra.mrb[44].mxu0 %v471_v37  ;;  %v9647_v37 = vld [vmem:[%s9931_s8 + $0xa4] ss:$4 sps:$4 sm:$0xff]  }
  0xa7   : > { %2325 = vmatprep.mubr.bf16.mxu0 %v9631_v40  ;;  %v10225_v40 = vld [vmem:[#allocation2 + $0x167] sm:$0xff] }
  0xae   : > { %2326 = vmatmul.mubr.bf16.gmra.mrb[48].mxu0 %v472_v43  ;;  %v10227_v43 = vld [vmem:[#allocation2 + $0x16f] sm:$0xff] }
  0xaf   : > { %2333 = vmatprep.mubr.bf16.mxu0 %v9633_v44  ;;  %v482_v44 = vpack.c.bf16 %v10227_v43, %v10225_v40 }
  0xb6   : > { %2334 = vmatmul.mubr.bf16.gmra.mrb[52].mxu0 %v473_v49  ;;  %v9649_v49 = vld [vmem:[%s9931_s8 + $0xac] ss:$4 sps:$4 sm:$0xff]  }
  0xb7   : > { %2341 = vmatprep.mubr.bf16.mxu0 %v9635_v50  ;;  %v10232_v50 = vld [vmem:[#allocation2 + $0x177] sm:$0xff] }
  0xbe   : > { %2342 = vmatmul.mubr.bf16.gmra.mrb[56].mxu0 %v474_v53  ;;  %v10234_v53 = vld [vmem:[#allocation2 + $0x17f] sm:$0xff] }
  0xbf   : > { %2349 = vmatprep.mubr.bf16.mxu0 %v9636_v54  ;;  %v483_v54 = vpack.c.bf16 %v10234_v53, %v10232_v50 }
  0xc6   : > { %2350 = vmatmul.mubr.bf16.gmra.mrb[60].mxu0 %v475_v59  ;;  %v9651_v59 = vld [vmem:[%s9931_s8 + $0xb4] ss:$4 sps:$4 sm:$0xff]  }
  0xc7   : > { %2357 = vmatprep.mubr.bf16.mxu0 %v9638_v60  ;;  %v10239_v60 = vld [vmem:[#allocation2 + $0x187] sm:$0xff] }
  0xce   : > { %2358 = vmatmul.mubr.bf16.gmra.mrb[64].mxu0 %v476_v63  ;;  %v10241_v63 = vld [vmem:[#allocation2 + $0x18f] sm:$0xff] }
  0xcf   : > { %2365 = vmatprep.mubr.bf16.mxu0 %v9639_v0  ;;  %v484_v0 = vpack.c.bf16 %v10241_v63, %v10239_v60 }
  0xd6   : > { %2366 = vmatmul.mubr.bf16.gmra.mrb[68].mxu0 %v477_v7  ;;  %v9652_v7 = vld [vmem:[%s9931_s8 + $0xbc] ss:$4 sps:$4 sm:$0xff]  }
  0xd7   : > { %2373 = vmatprep.mubr.bf16.mxu0 %v9641_v9  ;;  %v10246_v9 = vld [vmem:[#allocation2 + $0x197] sm:$0xff] }
  0xde   : > { %2374 = vmatmul.mubr.bf16.gmra.mrb[72].mxu0 %v478_v15  ;;  %v10248_v15 = vld [vmem:[#allocation2 + $0x19f] sm:$0xff] }
  0xdf   : > { %2381 = vmatprep.mubr.bf16.mxu0 %v9643_v17  ;;  %v485_v17 = vpack.c.bf16 %v10248_v15, %v10246_v9 }
  0xe6   : > { %2382 = vmatmul.mubr.bf16.gmra.mrb[76].mxu0 %v479_v10  ;;  %v9654_v10 = vld [vmem:[%s9931_s8 + $0xc4] ss:$4 sps:$4 sm:$0xff]  }
  0xe7   : > { %2389 = vmatprep.mubr.bf16.mxu0 %v9644_v18  ;;  %v10253_v18 = vld [vmem:[#allocation2 + $0x1a7] sm:$0xff] }
  0xee   : > { %2390 = vmatmul.mubr.bf16.gmra.mrb[80].mxu0 %v480_v26  ;;  %v10255_v26 = vld [vmem:[#allocation2 + $0x1af] sm:$0xff] }
  0xef   : > { %2397 = vmatprep.mubr.bf16.mxu0 %v9646_v27  ;;  %v486_v27 = vpack.c.bf16 %v10255_v26, %v10253_v18 }
  0xf6   : > { %2398 = vmatmul.mubr.bf16.gmra.mrb[84].mxu0 %v481_v34  ;;  %v784_v34 = vpack.c.bf16 %v10024_v21, %v10011_v16  ;;  %v9656_v16 = vld [vmem:[%s12416_s1 + $0x108] sm:$0xff]  }
  0xf7   : > { %2405 = vmatprep.mubr.bf16.mxu0 %v9647_v37  ;;  %v622_v37 = vld [vmem:[#allocation2 + $0x9] sm:$0xff] }
  0xfe   : > { %2406 = vmatmul.mubr.bf16.gmra.mrb[88].mxu0 %v482_v44  ;;  %v623_v44 = vld [vmem:[#allocation2 + $0x11] sm:$0xff] }
  0xff   : > { %2413 = vmatprep.mubr.bf16.mxu0 %v9649_v49  ;;  %v676_v49 = vpack.c.bf16 %v623_v44, %v622_v37  ;;  %v10295_v37 = vld [vmem:[#allocation2 + $0x39] sm:$0xff]  ;;  %v10297_v44 = vld [vmem:[#allocation2 + $0x41] sm:$0xff] }
 0x106   : > { %2414 = vmatmul.mubr.bf16.gmra.mrb[92].mxu0 %v483_v54  ;;  %v9655_v54 = vld [vmem:[%s12416_s1 + $0x100] sm:$0xff]  }
 0x107   : > { %2421 = vmatprep.mubr.bf16.mxu0 %v9651_v59  ;;  %v785_v59 = vpack.c.bf16 %v10037_v29, %v10026_v22  ;;  %v9657_v22 = vld [vmem:[%s12416_s1 + $0x110] sm:$0xff]  }
 0x108   : > { %v10279_v29 = vld [vmem:[#allocation2 + $0x29] sm:$0xff] }
 0x10e   : > { %2422 = vmatmul.mubr.bf16.gmra.mrb[96].mxu0 %v484_v0  ;;  %v624_v0 = vld [vmem:[#allocation2 + $0x19] sm:$0xff] }
 0x10f   : > { %2429 = vmatprep.mubr.bf16.mxu0 %v9652_v7  ;;  %v10266_v7 = vld [vmem:[#allocation2 + $0x21] sm:$0xff] }
 0x110   : > { %v677_v21 = vpack.c.bf16 %v10266_v7, %v624_v0  ;;  %v10313_v0 = vld [vmem:[#allocation2 + $0x51] sm:$0xff] }
 0x116   : > { %2430 = vmatmul.mubr.bf16.gmra.mrb[100].mxu0 %v485_v17  ;;  %v786_v17 = vpack.c.bf16 %v10053_v38, %v10039_v30  ;;  %v787_v38 = vpack.c.bf16 %v10069_v47, %v10055_v39  ;;  %v679_v39 = vpack.c.bf16 %v10297_v44, %v10295_v37  ;;  %v788_v47 = vpack.c.bf16 %v10085_v56, %v10071_v48 }
 0x117   : > { %2437 = vmatprep.mubr.bf16.mxu0 %v9654_v10  ;;  %v10281_v10 = vld [vmem:[#allocation2 + $0x31] sm:$0xff]  ;;  %v789_v56 = vpack.c.bf16 %v10101_v2, %v10087_v57  ;;  %v790_v2 = vpack.c.bf16 %v10114_v13, %v10103_v4  ;;  %v791_v13 = vpack.c.bf16 %v10126_v19, %v10116_v14  ;;  %v792_v19 = vpack.c.bf16 %v10137_v28, %v10128_v20 }
 0x118   : > { %v678_v30 = vpack.c.bf16 %v10281_v10, %v10279_v29  ;;  %v793_v28 = vpack.c.bf16 %v10148_v35, %v10139_v31  ;;  %v9670_v31 = vld [vmem:[%s12416_s1 + $0x178] sm:$0xff]   ;;  %v10399_v35 = vld [vmem:[#allocation2 + $0xa9] sm:$0xff] }
 0x11e   : > { %2438 = vmatmul.mubr.bf16.gmra.mrb[104].mxu0 %v486_v27  ;;  %v9658_v27 = vld [vmem:[%s12416_s1 + $0x118] sm:$0xff]  }
 0x11f   : > { %2478 = vmatprep.mubr.bf16.mxu0 %v784_v34  ;;  %v9659_v34 = vld [vmem:[%s12416_s1 + $0x120] sm:$0xff]  }
 0x126   : > { %2479 = vmatmul.mubr.bf16.vlgmr.msra.gmra.mrb[0].mxu0 %v676_v49  ;;  %v9660_v49 = vld [vmem:[%s12416_s1 + $0x128] sm:$0xff]  }
 0x127   : > { %2696 = vmatpush1.bf16.msra.mxu0 %v9655_v54  ;;  %2486 = vmatprep.mubr.bf16.mxu0 %v785_v59  ;;  %v9661_v54 = vld [vmem:[%s12416_s1 + $0x130] sm:$0xff]  }
 0x128   : > { %2697 = vmatprep.subr.bf16.mxu0 %v12421_v1  ;;  %v10311_v59 = vld [vmem:[#allocation2 + $0x49] sm:$0xff] }
 0x129   : > { %v680_v48 = vpack.c.bf16 %v10313_v0, %v10311_v59 }
 0x12b   : > { %2698 = vmatpush1.bf16.msra.mxu0 %v9656_v16  ;;  %v9662_v16 = vld [vmem:[%s12416_s1 + $0x138] sm:$0xff]  }
 0x12c   : > { %2699 = vmatprep.subr.bf16.mxu0 %v12421_v1 }
 0x12e   : > { %2487 = vmatmul.mubr.bf16.gmra.mrb[4].mxu0 %v677_v21  ;;  %v9663_v21 = vld [vmem:[%s12416_s1 + $0x140] sm:$0xff]  }
 0x12f   : > { %2494 = vmatprep.mubr.bf16.mxu0 %v786_v17  ;;  %2700 = vmatpush1.bf16.msra.mxu0 %v9657_v22  ;;  %v10327_v17 = vld [vmem:[#allocation2 + $0x59] sm:$0xff]  ;;  %v10329_v22 = vld [vmem:[#allocation2 + $0x61] sm:$0xff] }
 0x130   : > { %2701 = vmatprep.subr.bf16.mxu0 %v12421_v1  ;;  %v681_v57 = vpack.c.bf16 %v10329_v22, %v10327_v17 }
 0x133   : > { %2702 = vmatpush1.bf16.msra.mxu0 %v9658_v27  ;;  %v9664_v27 = vld [vmem:[%s12416_s1 + $0x148] sm:$0xff]  }
 0x134   : > { %2703 = vmatprep.subr.bf16.mxu0 %v12421_v1 }
 0x136   : > { %2495 = vmatmul.mubr.bf16.gmra.mrb[8].mxu0 %v678_v30  ;;  %v9665_v30 = vld [vmem:[%s12416_s1 + $0x150] sm:$0xff]  }
 0x137   : > { %2502 = vmatprep.mubr.bf16.mxu0 %v787_v38  ;;  %2704 = vmatpush1.bf16.msra.mxu0 %v9659_v34  ;;  %v10343_v38 = vld [vmem:[#allocation2 + $0x69] sm:$0xff]  ;;  %v10345_v34 = vld [vmem:[#allocation2 + $0x71] sm:$0xff] }
 0x138   : > { %2705 = vmatprep.subr.bf16.mxu0 %v12421_v1  ;;  %v682_v4 = vpack.c.bf16 %v10345_v34, %v10343_v38 }
 0x13b   : > { %2706 = vmatpush1.bf16.msra.mxu0 %v9660_v49  ;;  %v9666_v49 = vld [vmem:[%s12416_s1 + $0x158] sm:$0xff]  }
 0x13c   : > { %2707 = vmatprep.subr.bf16.mxu0 %v12421_v1 }
 0x13e   : > { %2503 = vmatmul.mubr.bf16.gmra.mrb[12].mxu0 %v679_v39  ;;  %v9667_v39 = vld [vmem:[%s12416_s1 + $0x160] sm:$0xff]  }
 0x13f   : > { %2510 = vmatprep.mubr.bf16.mxu0 %v788_v47  ;;  %2708 = vmatpush1.bf16.msra.mxu0 %v9661_v54  ;;  %v10359_v47 = vld [vmem:[#allocation2 + $0x79] sm:$0xff]  ;;  %v10361_v54 = vld [vmem:[#allocation2 + $0x81] sm:$0xff] }
 0x140   : > { %2709 = vmatprep.subr.bf16.mxu0 %v12421_v1  ;;  %v683_v14 = vpack.c.bf16 %v10361_v54, %v10359_v47 }
 0x143   : > { %2710 = vmatpush1.bf16.msra.mxu0 %v9662_v16  ;;  %v9668_v16 = vld [vmem:[%s12416_s1 + $0x168] sm:$0xff]  }
 0x144   : > { %2711 = vmatprep.subr.bf16.mxu0 %v12421_v1 }
 0x146   : > { %2511 = vmatmul.mubr.bf16.gmra.mrb[16].mxu0 %v680_v48  ;;  %v9669_v48 = vld [vmem:[%s12416_s1 + $0x170] sm:$0xff]  }
 0x147   : > { %2518 = vmatprep.mubr.bf16.mxu0 %v789_v56  ;;  %2712 = vmatpush1.bf16.msra.mxu0 %v9663_v21  ;;  %v10375_v56 = vld [vmem:[#allocation2 + $0x89] sm:$0xff]  ;;  %v10377_v21 = vld [vmem:[#allocation2 + $0x91] sm:$0xff] }
 0x148   : > { %2713 = vmatprep.subr.bf16.mxu0 %v12421_v1  ;;  %v684_v20 = vpack.c.bf16 %v10377_v21, %v10375_v56 }
 0x14b   : > { %2714 = vmatpush1.bf16.msra.mxu0 %v9664_v27  ;;  %v8210_v27 = vunpack.c.h.bf16 %v10131_v23 }
 0x14c   : > { %2715 = vmatprep.subr.bf16.mxu0 %v12421_v1 }
 0x14d   : > { %401 = vst [vmem:[#allocation2 + $0x1b8] sm:$0xff] %v8210_v27 }
 0x14e   : > { %2519 = vmatmul.mubr.bf16.gmra.mrb[20].mxu0 %v681_v57  ;;  %v10387_v57 = vld [vmem:[#allocation2 + $0x99] sm:$0xff] }
 0x14f   : > { %2526 = vmatprep.mubr.bf16.mxu0 %v790_v2  ;;  %2716 = vmatpush1.bf16.msra.mxu0 %v9665_v30  ;;  %v10389_v2 = vld [vmem:[#allocation2 + $0xa1] sm:$0xff]  ;;  %v8375_v30 = vld [vmem:[%s9931_s8 + $0xd0] sm:$0xff]  }
 0x150   : > { %2717 = vmatprep.subr.bf16.mxu0 %v12421_v1 }
 0x153   : > { %2718 = vmatpush1.bf16.msra.mxu0 %v9666_v49  ;;  %v8213_v49 = vunpack.c.l.bf16 %v8375_v30 }
 0x154   : > { %2719 = vmatprep.subr.bf16.mxu0 %v12421_v1 }
 0x155   : > { %402 = vst [vmem:[#allocation2 + $0x1c0] sm:$0xff] %v8213_v49  ;;  %v10424_v49 = vld [vmem:[#allocation2 + $0xd9] sm:$0xff] }
 0x156   : > { %2527 = vmatmul.mubr.bf16.gmra.mrb[24].mxu0 %v682_v4  ;;  %v8214_v4 = vunpack.c.h.bf16 %v8375_v30  ;;  %v10418_v30 = vld [vmem:[#allocation2 + $0xd1] sm:$0xff] }
 0x157   : > { %2534 = vmatprep.mubr.bf16.mxu0 %v791_v13  ;;  %2720 = vmatpush1.bf16.msra.mxu0 %v9667_v39  ;;  %v685_v13 = vpack.c.bf16 %v10389_v2, %v10387_v57  ;;  %v794_v39 = vpack.c.bf16 %v10155_v41, %v10150_v36  ;;  %v795_v36 = vpack.c.bf16 %v10162_v45, %v10157_v42  ;;  %v10408_v41 = vld [vmem:[#allocation2 + $0xb9] sm:$0xff] }
 0x158   : > { %2721 = vmatprep.subr.bf16.mxu0 %v12421_v1  ;;  %403 = vst [vmem:[#allocation2 + $0x1c8] sm:$0xff] %v8214_v4  ;;  %v797_v45 = vpack.c.bf16 %v10176_v55, %v10171_v52  ;;  %v10426_v4 = vld [vmem:[#allocation2 + $0xe1] sm:$0xff]  ;;  %v799_v55 = vpack.c.bf16 %v10190_v5, %v10185_v62  ;;  %v801_v5 = vpack.c.bf16 %v10204_v8, %v10199_v12 }
 0x159   : > { %v803_v8 = vpack.c.bf16 %v10218_v32, %v10213_v25  ;;  %v805_v32 = vpack.c.bf16 %v10232_v50, %v10227_v43  ;;  %v807_v50 = vpack.c.bf16 %v10246_v9, %v10241_v63 }
 0x15b   : > { %2722 = vmatpush1.bf16.msra.mxu0 %v9668_v16  ;;  %v10401_v16 = vld [vmem:[#allocation2 + $0xb1] sm:$0xff] }
 0x15c   : > { %2723 = vmatprep.subr.bf16.mxu0 %v12421_v1 }
 0x15e   : > { %2535 = vmatmul.mubr.bf16.gmra.mrb[28].mxu0 %v683_v14  ;;  %v686_v14 = vpack.c.bf16 %v10401_v16, %v10399_v35 }
 0x15f   : > { %2542 = vmatprep.mubr.bf16.mxu0 %v792_v19  ;;  %2724 = vmatpush1.bf16.msra.mxu0 %v9669_v48  ;;  %v10410_v19 = vld [vmem:[#allocation2 + $0xc1] sm:$0xff] }
 0x160   : > { %2725 = vmatprep.subr.bf16.mxu0 %v12421_v1  ;;  %v687_v48 = vpack.c.bf16 %v10410_v19, %v10408_v41 }
 0x163   : > { %2726 = vmatpush1.bf16.msra.mxu0 %v9670_v31  ;;  %v10440_v31 = vld [vmem:[#allocation2 + $0xf9] sm:$0xff] }
 0x164   : > { %2944 = vmatprep.subr.bf16.mxu0 %v12421_v1 }
 0x166   : > { %2543 = vmatmul.mubr.bf16.gmra.mrb[32].mxu0 %v684_v20  ;;  %v796_v20 = vpack.c.bf16 %v10169_v51, %v10164_v46  ;;  %v689_v46 = vpack.c.bf16 %v10426_v4, %v10424_v49  ;;  %v798_v51 = vpack.c.bf16 %v10183_v61, %v10178_v58  ;;  %v800_v61 = vpack.c.bf16 %v10197_v11, %v10192_v6 }
 0x167   : > { %2550 = vmatprep.mubr.bf16.mxu0 %v793_v28  ;;  %v10416_v28 = vld [vmem:[#allocation2 + $0xc9] sm:$0xff]  ;;  %v802_v11 = vpack.c.bf16 %v10211_v24, %v10206_v3  ;;  %v804_v24 = vpack.c.bf16 %v10225_v40, %v10220_v33  ;;  %v806_v40 = vpack.c.bf16 %v10239_v60, %v10234_v53  ;;  %v808_v60 = vpack.c.bf16 %v10253_v18, %v10248_v15 }
 0x168   : > { %v688_v42 = vpack.c.bf16 %v10418_v30, %v10416_v28  ;;  %v783_v15 = vld [vmem:[#allocation2 + $0x1c7] sm:$0xff] }
 0x16e   : > { %2551 = vmatmul.mubr.bf16.gmra.mrb[36].mxu0 %v685_v13  ;;  %v10432_v13 = vld [vmem:[#allocation2 + $0xe9] sm:$0xff] }
 0x16f   : > { %2558 = vmatprep.mubr.bf16.mxu0 %v794_v39  ;;  %v10434_v39 = vld [vmem:[#allocation2 + $0xf1] sm:$0xff] }
 0x170   : > { %v690_v52 = vpack.c.bf16 %v10434_v39, %v10432_v13 }
 0x176   : > { %2559 = vmatmul.mubr.bf16.gmra.mrb[40].mxu0 %v686_v14  ;;  %v10442_v14 = vld [vmem:[#allocation2 + $0x101] sm:$0xff] }
 0x177   : > { %2566 = vmatprep.mubr.bf16.mxu0 %v795_v36  ;;  %v691_v58 = vpack.c.bf16 %v10442_v14, %v10440_v31  ;;  %v10448_v36 = vld [vmem:[#allocation2 + $0x109] sm:$0xff] }
 0x17e   : > { %2567 = vmatmul.mubr.bf16.gmra.mrb[44].mxu0 %v687_v48  ;;  %v10450_v48 = vld [vmem:[#allocation2 + $0x111] sm:$0xff] }
 0x17f   : > { %2574 = vmatprep.mubr.bf16.mxu0 %v796_v20  ;;  %v692_v62 = vpack.c.bf16 %v10450_v48, %v10448_v36  ;;  %v10456_v20 = vld [vmem:[#allocation2 + $0x119] sm:$0xff] }
 0x186   : > { %2575 = vmatmul.mubr.bf16.gmra.mrb[48].mxu0 %v688_v42  ;;  %v10458_v42 = vld [vmem:[#allocation2 + $0x121] sm:$0xff] }
 0x187   : > { %2582 = vmatprep.mubr.bf16.mxu0 %v797_v45  ;;  %v693_v6 = vpack.c.bf16 %v10458_v42, %v10456_v20  ;;  %v10464_v45 = vld [vmem:[#allocation2 + $0x129] sm:$0xff] }
 0x18e   : > { %2583 = vmatmul.mubr.bf16.gmra.mrb[52].mxu0 %v689_v46  ;;  %v10466_v46 = vld [vmem:[#allocation2 + $0x131] sm:$0xff] }
 0x18f   : > { %2590 = vmatprep.mubr.bf16.mxu0 %v798_v51  ;;  %v694_v12 = vpack.c.bf16 %v10466_v46, %v10464_v45  ;;  %v10472_v51 = vld [vmem:[#allocation2 + $0x139] sm:$0xff] }
 0x196   : > { %2591 = vmatmul.mubr.bf16.gmra.mrb[56].mxu0 %v690_v52  ;;  %v10474_v52 = vld [vmem:[#allocation2 + $0x141] sm:$0xff] }
 0x197   : > { %2598 = vmatprep.mubr.bf16.mxu0 %v799_v55  ;;  %v695_v3 = vpack.c.bf16 %v10474_v52, %v10472_v51  ;;  %v10480_v55 = vld [vmem:[#allocation2 + $0x149] sm:$0xff] }
 0x19e   : > { %2599 = vmatmul.mubr.bf16.gmra.mrb[60].mxu0 %v691_v58  ;;  %v10482_v58 = vld [vmem:[#allocation2 + $0x151] sm:$0xff] }
 0x19f   : > { %2606 = vmatprep.mubr.bf16.mxu0 %v800_v61  ;;  %v696_v25 = vpack.c.bf16 %v10482_v58, %v10480_v55  ;;  %v10488_v61 = vld [vmem:[#allocation2 + $0x159] sm:$0xff] }
 0x1a6   : > { %2607 = vmatmul.mubr.bf16.gmra.mrb[64].mxu0 %v692_v62  ;;  %v10490_v62 = vld [vmem:[#allocation2 + $0x161] sm:$0xff] }
 0x1a7   : > { %2614 = vmatprep.mubr.bf16.mxu0 %v801_v5  ;;  %v697_v33 = vpack.c.bf16 %v10490_v62, %v10488_v61  ;;  %v10496_v5 = vld [vmem:[#allocation2 + $0x169] sm:$0xff] }
 0x1ae   : > { %2615 = vmatmul.mubr.bf16.gmra.mrb[68].mxu0 %v693_v6  ;;  %v10498_v6 = vld [vmem:[#allocation2 + $0x171] sm:$0xff] }
 0x1af   : > { %2622 = vmatprep.mubr.bf16.mxu0 %v802_v11  ;;  %v698_v43 = vpack.c.bf16 %v10498_v6, %v10496_v5  ;;  %v10504_v11 = vld [vmem:[#allocation2 + $0x179] sm:$0xff] }
 0x1b6   : > { %2623 = vmatmul.mubr.bf16.gmra.mrb[72].mxu0 %v694_v12  ;;  %v10506_v12 = vld [vmem:[#allocation2 + $0x181] sm:$0xff] }
 0x1b7   : > { %2630 = vmatprep.mubr.bf16.mxu0 %v803_v8  ;;  %v699_v53 = vpack.c.bf16 %v10506_v12, %v10504_v11  ;;  %v10512_v8 = vld [vmem:[#allocation2 + $0x189] sm:$0xff] }
 0x1be   : > { %2631 = vmatmul.mubr.bf16.gmra.mrb[76].mxu0 %v695_v3  ;;  %v10514_v3 = vld [vmem:[#allocation2 + $0x191] sm:$0xff] }
 0x1bf   : > { %2638 = vmatprep.mubr.bf16.mxu0 %v804_v24  ;;  %v781_v24 = vld [vmem:[#allocation2 + $0x1b7] sm:$0xff]  ;;  %v700_v63 = vpack.c.bf16 %v10514_v3, %v10512_v8 }
 0x1c0   : > { %v809_v9 = vpack.c.bf16 %v781_v24, %v10255_v26  ;;  %v839_v24 = vld [vmem:[#allocation2 + $0x28] sm:$0xff] }
 0x1c6   : > { %2639 = vmatmul.mubr.bf16.gmra.mrb[80].mxu0 %v696_v25  ;;  %v10519_v25 = vld [vmem:[#allocation2 + $0x199] sm:$0xff] }
 0x1c7   : > { %2646 = vmatprep.mubr.bf16.mxu0 %v805_v32  ;;  %v10521_v32 = vld [vmem:[#allocation2 + $0x1a1] sm:$0xff] }
 0x1c8   : > { %v701_v18 = vpack.c.bf16 %v10521_v32, %v10519_v25 }
 0x1ce   : > { %2647 = vmatmul.mubr.bf16.gmra.mrb[84].mxu0 %v697_v33  ;;  %v782_v33 = vld [vmem:[#allocation2 + $0x1bf] sm:$0xff] }
 0x1cf   : > { %2654 = vmatprep.mubr.bf16.mxu0 %v806_v40  ;;  %v810_v40 = vpack.c.bf16 %v783_v15, %v782_v33  ;;  %v1001_v33 = vpack.c.bf16 %v10295_v37, %v10281_v10  ;;  %v840_v15 = vld [vmem:[#allocation2 + $0x30] sm:$0xff]  ;;  %v10551_v37 = vld [vmem:[#allocation2 + $0x40] sm:$0xff] }
 0x1d0   : > { %v9673_v10 = vld [vmem:[%s12416_s1 + $0x190] sm:$0xff]  }
 0x1d6   : > { %2655 = vmatmul.mubr.bf16.gmra.mrb[88].mxu0 %v698_v43  ;;  %v10525_v43 = vld [vmem:[#allocation2 + $0x1a9] sm:$0xff] }
 0x1d7   : > { %2662 = vmatprep.mubr.bf16.mxu0 %v807_v50  ;;  %v10527_v50 = vld [vmem:[#allocation2 + $0x1b1] sm:$0xff] }
 0x1d8   : > { %v702_v26 = vpack.c.bf16 %v10527_v50, %v10525_v43 }
 0x1de   : > { %2663 = vmatmul.mubr.bf16.gmra.mrb[92].mxu0 %v699_v53  ;;  %v1000_v53 = vpack.c.bf16 %v10279_v29, %v10266_v7  ;;  %v9672_v7 = vld [vmem:[%s12416_s1 + $0x188] sm:$0xff]  }
 0x1df   : > { %2670 = vmatprep.mubr.bf16.mxu0 %v808_v60  ;;  %v838_v60 = vld [vmem:[#allocation2 + $0x20] sm:$0xff] }
 0x1e6   : > { %2671 = vmatmul.mubr.bf16.gmra.mrb[96].mxu0 %v700_v63  ;;  %v892_v63 = vpack.c.bf16 %v839_v24, %v838_v60  ;;  %v9675_v60 = vld [vmem:[%s12416_s1 + $0x1a0] sm:$0xff]   ;;  %v10567_v24 = vld [vmem:[#allocation2 + $0x50] sm:$0xff] }
 0x1e7   : > { %2678 = vmatprep.mubr.bf16.mxu0 %v809_v9  ;;  %v9671_v9 = vld [vmem:[%s12416_s1 + $0x180] sm:$0xff]  }
 0x1ee   : > { %2679 = vmatmul.mubr.bf16.gmra.mrb[100].mxu0 %v701_v18  ;;  %v10538_v18 = vld [vmem:[#allocation2 + $0x38] sm:$0xff] }
 0x1ef   : > { %2686 = vmatprep.mubr.bf16.mxu0 %v810_v40  ;;  %v893_v29 = vpack.c.bf16 %v10538_v18, %v840_v15  ;;  %v1002_v40 = vpack.c.bf16 %v10311_v59, %v10297_v44  ;;  %v1003_v59 = vpack.c.bf16 %v10327_v17, %v10313_v0  ;;  %v1004_v17 = vpack.c.bf16 %v10343_v38, %v10329_v22  ;;  %v10583_v15 = vld [vmem:[#allocation2 + $0x60] sm:$0xff] }
 0x1f0   : > { %v1005_v38 = vpack.c.bf16 %v10359_v47, %v10345_v34  ;;  %v1006_v47 = vpack.c.bf16 %v10375_v56, %v10361_v54  ;;  %v1007_v56 = vpack.c.bf16 %v10387_v57, %v10377_v21  ;;  %v1008_v57 = vpack.c.bf16 %v10399_v35, %v10389_v2  ;;  %v10656_v35 = vld [vmem:[#allocation2 + $0xb0] sm:$0xff] }
 0x1f1   : > { %v1009_v2 = vpack.c.bf16 %v10408_v41, %v10401_v16  ;;  %v10669_v16 = vld [vmem:[#allocation2 + $0xc8] sm:$0xff] }
 0x1f2   : > { %v10671_v41 = vld [vmem:[#allocation2 + $0x8] sm:$0xff] }
 0x1f6   : > { %2687 = vmatmul.mubr.bf16.gmra.mrb[104].mxu0 %v702_v26  ;;  %v10553_v26 = vld [vmem:[#allocation2 + $0x48] sm:$0xff] }
 0x1f7   : > { %2727 = vmatprep.mubr.bf16.mxu0 %v1000_v53  ;;  %v9674_v53 = vld [vmem:[%s12416_s1 + $0x198] sm:$0xff]   ;;  %v894_v44 = vpack.c.bf16 %v10553_v26, %v10551_v37  ;;  %v1217_v23 = vpack.c.bf16 %v10567_v24, %v10553_v26  ;;  %v9690_v26 = vld [vmem:[%s12416_s1 + $0x210] sm:$0xff]  }
 0x1fe   : > { %2728 = vmatmul.mubr.bf16.vlgmr.msra.gmra.mrb[0].mxu0 %v892_v63  ;;  %v10569_v63 = vld [vmem:[#allocation2 + $0x58] sm:$0xff] }
 0x1ff   : > { %2945 = vmatpush1.bf16.msra.mxu0 %v9671_v9  ;;  %2735 = vmatprep.mubr.bf16.mxu0 %v1001_v33  ;;  %v9676_v9 = vld [vmem:[%s12416_s1 + $0x1a8] sm:$0xff]   ;;  %v895_v0 = vpack.c.bf16 %v10569_v63, %v10567_v24  ;;  %v9677_v33 = vld [vmem:[%s12416_s1 + $0x1b0] sm:$0xff]  }
 0x200   : > { %2946 = vmatprep.subr.bf16.mxu0 %v12421_v1  ;;  %v1058_v24 = vld [vmem:[#allocation2 + $0x57] sm:$0xff] }
 0x203   : > { %2947 = vmatpush1.bf16.msra.mxu0 %v9672_v7  ;;  %v10585_v7 = vld [vmem:[#allocation2 + $0x68] sm:$0xff] }
 0x204   : > { %2948 = vmatprep.subr.bf16.mxu0 %v12421_v1  ;;  %v896_v22 = vpack.c.bf16 %v10585_v7, %v10583_v15 }
 0x206   : > { %2736 = vmatmul.mubr.bf16.gmra.mrb[4].mxu0 %v893_v29  ;;  %v9678_v29 = vld [vmem:[%s12416_s1 + $0x1b8] sm:$0xff]  }
 0x207   : > { %2743 = vmatprep.mubr.bf16.mxu0 %v1002_v40  ;;  %2949 = vmatpush1.bf16.msra.mxu0 %v9673_v10  ;;  %v9679_v40 = vld [vmem:[%s12416_s1 + $0x1c0] sm:$0xff]   ;;  %v10599_v10 = vld [vmem:[#allocation2 + $0x70] sm:$0xff] }
 0x208   : > { %2950 = vmatprep.subr.bf16.mxu0 %v12421_v1 }
 0x20b   : > { %2951 = vmatpush1.bf16.msra.mxu0 %v9674_v53  ;;  %v10601_v53 = vld [vmem:[#allocation2 + $0x78] sm:$0xff] }
 0x20c   : > { %2952 = vmatprep.subr.bf16.mxu0 %v12421_v1  ;;  %v897_v34 = vpack.c.bf16 %v10601_v53, %v10599_v10 }
 0x20e   : > { %2744 = vmatmul.mubr.bf16.gmra.mrb[8].mxu0 %v894_v44  ;;  %v9680_v44 = vld [vmem:[%s12416_s1 + $0x1c8] sm:$0xff]  }
 0x20f   : > { %2751 = vmatprep.mubr.bf16.mxu0 %v1003_v59  ;;  %2953 = vmatpush1.bf16.msra.mxu0 %v9675_v60  ;;  %v9681_v59 = vld [vmem:[%s12416_s1 + $0x1d0] sm:$0xff]   ;;  %v10615_v60 = vld [vmem:[#allocation2 + $0x80] sm:$0xff] }
 0x210   : > { %2954 = vmatprep.subr.bf16.mxu0 %v12421_v1 }
 0x213   : > { %2955 = vmatpush1.bf16.msra.mxu0 %v9676_v9  ;;  %v10617_v9 = vld [vmem:[#allocation2 + $0x88] sm:$0xff] }
 0x214   : > { %2956 = vmatprep.subr.bf16.mxu0 %v12421_v1  ;;  %v898_v54 = vpack.c.bf16 %v10617_v9, %v10615_v60 }
 0x216   : > { %2752 = vmatmul.mubr.bf16.gmra.mrb[12].mxu0 %v895_v0  ;;  %v9682_v0 = vld [vmem:[%s12416_s1 + $0x1d8] sm:$0xff]  }
 0x217   : > { %2759 = vmatprep.mubr.bf16.mxu0 %v1004_v17  ;;  %2957 = vmatpush1.bf16.msra.mxu0 %v9677_v33  ;;  %v9683_v17 = vld [vmem:[%s12416_s1 + $0x1e0] sm:$0xff]   ;;  %v10631_v33 = vld [vmem:[#allocation2 + $0x90] sm:$0xff] }
 0x218   : > { %2958 = vmatprep.subr.bf16.mxu0 %v12421_v1 }
 0x21b   : > { %2959 = vmatpush1.bf16.msra.mxu0 %v9678_v29  ;;  %v10633_v29 = vld [vmem:[#allocation2 + $0x98] sm:$0xff] }
 0x21c   : > { %2960 = vmatprep.subr.bf16.mxu0 %v12421_v1  ;;  %v899_v21 = vpack.c.bf16 %v10633_v29, %v10631_v33 }
 0x21e   : > { %2760 = vmatmul.mubr.bf16.gmra.mrb[16].mxu0 %v896_v22  ;;  %v9684_v22 = vld [vmem:[%s12416_s1 + $0x1e8] sm:$0xff]  }
 0x21f   : > { %2767 = vmatprep.mubr.bf16.mxu0 %v1005_v38  ;;  %2961 = vmatpush1.bf16.msra.mxu0 %v9679_v40  ;;  %v9685_v38 = vld [vmem:[%s12416_s1 + $0x1f0] sm:$0xff]   ;;  %v10647_v40 = vld [vmem:[#allocation2 + $0xa0] sm:$0xff] }
 0x220   : > { %2962 = vmatprep.subr.bf16.mxu0 %v12421_v1 }
 0x223   : > { %2963 = vmatpush1.bf16.msra.mxu0 %v9680_v44  ;;  %v10649_v44 = vld [vmem:[#allocation2 + $0xa8] sm:$0xff] }
 0x224   : > { %2964 = vmatprep.subr.bf16.mxu0 %v12421_v1 }
 0x226   : > { %2768 = vmatmul.mubr.bf16.gmra.mrb[20].mxu0 %v897_v34  ;;  %v900_v34 = vpack.c.bf16 %v10649_v44, %v10647_v40 }
 0x227   : > { %2775 = vmatprep.mubr.bf16.mxu0 %v1006_v47  ;;  %2965 = vmatpush1.bf16.msra.mxu0 %v9681_v59  ;;  %v10658_v47 = vld [vmem:[#allocation2 + $0xb8] sm:$0xff] }
 0x228   : > { %2966 = vmatprep.subr.bf16.mxu0 %v12421_v1  ;;  %v901_v59 = vpack.c.bf16 %v10658_v47, %v10656_v35 }
 0x22b   : > { %2967 = vmatpush1.bf16.msra.mxu0 %v9682_v0  ;;  %v1010_v0 = vpack.c.bf16 %v10416_v28, %v10410_v19  ;;  %v1011_v19 = vpack.c.bf16 %v10424_v49, %v10418_v30  ;;  %v10678_v28 = vld [vmem:[#allocation2 + $0xd0] sm:$0xff]  ;;  %v1013_v49 = vpack.c.bf16 %v10440_v31, %v10434_v39  ;;  %v1015_v31 = vpack.c.bf16 %v10456_v20, %v10450_v48 }
 0x22c   : > { %2968 = vmatprep.subr.bf16.mxu0 %v12421_v1  ;;  %v1017_v20 = vpack.c.bf16 %v10472_v51, %v10466_v46  ;;  %v1019_v51 = vpack.c.bf16 %v10488_v61, %v10482_v58  ;;  %v1021_v61 = vpack.c.bf16 %v10504_v11, %v10498_v6  ;;  %v1023_v11 = vpack.c.bf16 %v10519_v25, %v10514_v3  ;;  %v997_v3 = vld [vmem:[#allocation2 + $0x1b9] sm:$0xff] }
 0x22e   : > { %2776 = vmatmul.mubr.bf16.gmra.mrb[24].mxu0 %v898_v54  ;;  %v9686_v54 = vld [vmem:[%s12416_s1 + $0x1f8] sm:$0xff]  }
 0x22f   : > { %2783 = vmatprep.mubr.bf16.mxu0 %v1007_v56  ;;  %2969 = vmatpush1.bf16.msra.mxu0 %v9683_v17  ;;  %v10667_v56 = vld [vmem:[#allocation2 + $0xc0] sm:$0xff] }
 0x230   : > { %2970 = vmatprep.subr.bf16.mxu0 %v12421_v1  ;;  %v902_v17 = vpack.c.bf16 %v10669_v16, %v10667_v56 }
 0x233   : > { %2971 = vmatpush1.bf16.msra.mxu0 %v9684_v22  ;;  %v10680_v22 = vld [vmem:[#allocation2 + $0xd8] sm:$0xff] }
 0x234   : > { %2972 = vmatprep.subr.bf16.mxu0 %v12421_v1 }
 0x236   : > { %2784 = vmatmul.mubr.bf16.gmra.mrb[28].mxu0 %v899_v21  ;;  %v903_v21 = vpack.c.bf16 %v10680_v22, %v10678_v28 }
 0x237   : > { %2791 = vmatprep.mubr.bf16.mxu0 %v1008_v57  ;;  %2973 = vmatpush1.bf16.msra.mxu0 %v9685_v38  ;;  %v1012_v57 = vpack.c.bf16 %v10432_v13, %v10426_v4  ;;  %v10686_v38 = vld [vmem:[#allocation2 + $0xe0] sm:$0xff]  ;;  %v1014_v13 = vpack.c.bf16 %v10448_v36, %v10442_v14  ;;  %v1016_v36 = vpack.c.bf16 %v10464_v45, %v10458_v42 }
 0x238   : > { %2974 = vmatprep.subr.bf16.mxu0 %v12421_v1  ;;  %v1018_v45 = vpack.c.bf16 %v10480_v55, %v10474_v52  ;;  %v1020_v55 = vpack.c.bf16 %v10496_v5, %v10490_v62  ;;  %v1022_v5 = vpack.c.bf16 %v10512_v8, %v10506_v12  ;;  %v1024_v8 = vpack.c.bf16 %v10525_v43, %v10521_v32 }
 0x23b   : > { %2975 = vmatpush1.bf16.msra.mxu0 %v9686_v54  ;;  %v10704_v54 = vld [vmem:[#allocation2 + $0x108] sm:$0xff] }
 0x23c   : > { %8472 = vmatprep.subr.bf16.mxu0 %v10671_v41 }
 0x23e   : > { %2792 = vmatmul.mubr.bf16.gmra.mrb[32].mxu0 %v900_v34  ;;  %v10688_v34 = vld [vmem:[#allocation2 + $0xe8] sm:$0xff] }
 0x23f   : > { %2799 = vmatprep.mubr.bf16.mxu0 %v1009_v2  ;;  %v904_v30 = vpack.c.bf16 %v10688_v34, %v10686_v38  ;;  %v10694_v2 = vld [vmem:[#allocation2 + $0xf0] sm:$0xff] }
 0x246   : > { %2800 = vmatmul.mubr.bf16.gmra.mrb[36].mxu0 %v901_v59  ;;  %v10696_v59 = vld [vmem:[#allocation2 + $0xf8] sm:$0xff] }
 0x247   : > { %2807 = vmatprep.mubr.bf16.mxu0 %v1010_v0  ;;  %v905_v4 = vpack.c.bf16 %v10696_v59, %v10694_v2  ;;  %v10702_v0 = vld [vmem:[#allocation2 + $0x100] sm:$0xff] }
 0x248   : > { %v906_v39 = vpack.c.bf16 %v10704_v54, %v10702_v0 }
 0x24e   : > { %2808 = vmatmul.mubr.bf16.gmra.mrb[40].mxu0 %v902_v17  ;;  %v10710_v17 = vld [vmem:[#allocation2 + $0x110] sm:$0xff] }
 0x24f   : > { %2815 = vmatprep.mubr.bf16.mxu0 %v1011_v19  ;;  %v10712_v19 = vld [vmem:[#allocation2 + $0x118] sm:$0xff] }
 0x250   : > { %v907_v14 = vpack.c.bf16 %v10712_v19, %v10710_v17 }
 0x256   : > { %2816 = vmatmul.mubr.bf16.gmra.mrb[44].mxu0 %v903_v21  ;;  %v10718_v21 = vld [vmem:[#allocation2 + $0x120] sm:$0xff] }
 0x257   : > { %2823 = vmatprep.mubr.bf16.mxu0 %v1012_v57  ;;  %v10720_v57 = vld [vmem:[#allocation2 + $0x128] sm:$0xff] }
 0x258   : > { %v908_v48 = vpack.c.bf16 %v10720_v57, %v10718_v21 }
 0x25e   : > { %2824 = vmatmul.mubr.bf16.gmra.mrb[48].mxu0 %v904_v30  ;;  %v10726_v30 = vld [vmem:[#allocation2 + $0x130] sm:$0xff] }
 0x25f   : > { %2831 = vmatprep.mubr.bf16.mxu0 %v1013_v49  ;;  %v10728_v49 = vld [vmem:[#allocation2 + $0x138] sm:$0xff] }
 0x260   : > { %v909_v42 = vpack.c.bf16 %v10728_v49, %v10726_v30 }
 0x266   : > { %2832 = vmatmul.mubr.bf16.gmra.mrb[52].mxu0 %v905_v4  ;;  %v10734_v4 = vld [vmem:[#allocation2 + $0x140] sm:$0xff] }
 0x267   : > { %2839 = vmatprep.mubr.bf16.mxu0 %v1014_v13  ;;  %v10736_v13 = vld [vmem:[#allocation2 + $0x148] sm:$0xff] }
 0x268   : > { %v910_v46 = vpack.c.bf16 %v10736_v13, %v10734_v4 }
 0x26e   : > { %2840 = vmatmul.mubr.bf16.gmra.mrb[56].mxu0 %v906_v39  ;;  %v10742_v39 = vld [vmem:[#allocation2 + $0x150] sm:$0xff] }
 0x26f   : > { %2847 = vmatprep.mubr.bf16.mxu0 %v1015_v31  ;;  %v10744_v31 = vld [vmem:[#allocation2 + $0x158] sm:$0xff] }
 0x270   : > { %v911_v52 = vpack.c.bf16 %v10744_v31, %v10742_v39 }
 0x276   : > { %2848 = vmatmul.mubr.bf16.gmra.mrb[60].mxu0 %v907_v14  ;;  %v10750_v14 = vld [vmem:[#allocation2 + $0x160] sm:$0xff] }
 0x277   : > { %2855 = vmatprep.mubr.bf16.mxu0 %v1016_v36  ;;  %v10752_v36 = vld [vmem:[#allocation2 + $0x168] sm:$0xff] }
 0x278   : > { %v912_v58 = vpack.c.bf16 %v10752_v36, %v10750_v14 }
 0x27e   : > { %2856 = vmatmul.mubr.bf16.gmra.mrb[64].mxu0 %v908_v48  ;;  %v10758_v48 = vld [vmem:[#allocation2 + $0x170] sm:$0xff] }
 0x27f   : > { %2863 = vmatprep.mubr.bf16.mxu0 %v1017_v20  ;;  %v10760_v20 = vld [vmem:[#allocation2 + $0x178] sm:$0xff] }
 0x280   : > { %v913_v62 = vpack.c.bf16 %v10760_v20, %v10758_v48 }
 0x286   : > { %2864 = vmatmul.mubr.bf16.gmra.mrb[68].mxu0 %v909_v42  ;;  %v10766_v42 = vld [vmem:[#allocation2 + $0x180] sm:$0xff] }
 0x287   : > { %2871 = vmatprep.mubr.bf16.mxu0 %v1018_v45  ;;  %v10768_v45 = vld [vmem:[#allocation2 + $0x188] sm:$0xff] }
 0x288   : > { %v914_v6 = vpack.c.bf16 %v10768_v45, %v10766_v42 }
 0x28e   : > { %2872 = vmatmul.mubr.bf16.gmra.mrb[72].mxu0 %v910_v46  ;;  %v10774_v46 = vld [vmem:[#allocation2 + $0x190] sm:$0xff] }
 0x28f   : > { %2879 = vmatprep.mubr.bf16.mxu0 %v1019_v51  ;;  %v10776_v51 = vld [vmem:[#allocation2 + $0x198] sm:$0xff] }
 0x290   : > { %v915_v12 = vpack.c.bf16 %v10776_v51, %v10774_v46 }
 0x296   : > { %2880 = vmatmul.mubr.bf16.gmra.mrb[76].mxu0 %v911_v52  ;;  %v10782_v52 = vld [vmem:[#allocation2 + $0x1a0] sm:$0xff] }
 0x297   : > { %2887 = vmatprep.mubr.bf16.mxu0 %v1020_v55  ;;  %v10784_v55 = vld [vmem:[#allocation2 + $0x1a8] sm:$0xff] }
 0x298   : > { %v916_v25 = vpack.c.bf16 %v10784_v55, %v10782_v52 }
 0x29e   : > { %2888 = vmatmul.mubr.bf16.gmra.mrb[80].mxu0 %v912_v58  ;;  %v1025_v58 = vpack.c.bf16 %v997_v3, %v10527_v50  ;;  %v1054_v50 = vld [vmem:[#allocation2 + $0x37] sm:$0xff]  ;;  %v9688_v3 = vld [vmem:[%s12416_s1 + $0x200] sm:$0xff]  }
 0x29f   : > { %2895 = vmatprep.mubr.bf16.mxu0 %v1021_v61  ;;  %v10789_v61 = vld [vmem:[#allocation2 + $0x1b0] sm:$0xff] }
 0x2a0   : > { %v917_v32 = vpack.c.bf16 %v8210_v27, %v10789_v61  ;;  %v1056_v27 = vld [vmem:[#allocation2 + $0x47] sm:$0xff] }
 0x2a6   : > { %2896 = vmatmul.mubr.bf16.gmra.mrb[84].mxu0 %v913_v62  ;;  %v998_v62 = vld [vmem:[#allocation2 + $0x1c1] sm:$0xff] }
 0x2a7   : > { %2903 = vmatprep.mubr.bf16.mxu0 %v1022_v5  ;;  %v999_v5 = vld [vmem:[#allocation2 + $0x1c9] sm:$0xff] }
 0x2a8   : > { %v1026_v43 = vpack.c.bf16 %v999_v5, %v998_v62  ;;  %v1059_v62 = vld [vmem:[#allocation2 + $0x5f] sm:$0xff] }
 0x2a9   : > { %v9691_v5 = vld [vmem:[%s12416_s1 + $0x218] sm:$0xff]  }
 0x2ae   : > { %2904 = vmatmul.mubr.bf16.gmra.mrb[88].mxu0 %v914_v6  ;;  %v9687_v6 = vld [vmem:[%s9931_s8 + $0xd0] sm:$0xff] }
 0x2af   : > { %2911 = vmatprep.mubr.bf16.mxu0 %v1023_v11  ;;  %v1216_v11 = vpack.c.bf16 %v10551_v37, %v10538_v18  ;;  %v9689_v18 = vld [vmem:[%s12416_s1 + $0x208] sm:$0xff]  }
 0x2b6   : > { %2912 = vmatmul.mubr.bf16.gmra.mrb[92].mxu0 %v915_v12  ;;  %v1055_v12 = vld [vmem:[#allocation2 + $0x3f] sm:$0xff] }
 0x2b7   : > { %2919 = vmatprep.mubr.bf16.mxu0 %v1024_v8  ;;  %v1108_v8 = vpack.c.bf16 %v1055_v12, %v1054_v50  ;;  %v1063_v12 = vld [vmem:[#allocation2 + $0x7f] sm:$0xff] }
 0x2be   : > { %2920 = vmatmul.mubr.bf16.gmra.mrb[96].mxu0 %v916_v25  ;;  %v1057_v25 = vld [vmem:[#allocation2 + $0x4f] sm:$0xff] }
 0x2bf   : > { %2927 = vmatprep.mubr.bf16.mxu0 %v1025_v58  ;;  %v1109_v37 = vpack.c.bf16 %v1057_v25, %v1056_v27  ;;  %v1218_v58 = vpack.c.bf16 %v10583_v15, %v10569_v63  ;;  %v1219_v63 = vpack.c.bf16 %v10599_v10, %v10585_v7  ;;  %v9692_v15 = vld [vmem:[%s12416_s1 + $0x220] sm:$0xff]   ;;  %v1220_v7 = vpack.c.bf16 %v10615_v60, %v10601_v53  ;;  %v1062_v10 = vld [vmem:[#allocation2 + $0x77] sm:$0xff]  ;;  %v1065_v25 = vld [vmem:[#allocation2 + $0x8f] sm:$0xff] }
 0x2c0   : > { %v1064_v27 = vld [vmem:[#allocation2 + $0x87] sm:$0xff]  ;;  %v1222_v60 = vpack.c.bf16 %v10647_v40, %v10633_v29  ;;  %v9695_v29 = vld [vmem:[%s12416_s1 + $0x238] sm:$0xff]  }
 0x2c1   : > { %v1113_v53 = vpack.c.bf16 %v1065_v25, %v1064_v27  ;;  %v1070_v40 = vld [vmem:[#allocation2 + $0xb7] sm:$0xff]  ;;  %v3675_v27 = vld [vmem:[%s12419_s4 + $0x28] sm:$0xff]  ;;  %v1229_v25 = vpack.c.bf16 %v10710_v17, %v10704_v54  ;;  %v3682_v54 = vld [vmem:[%s12419_s4 + $0x60] sm:$0xff] }
 0x2c6   : > { %2928 = vmatmul.mubr.bf16.gmra.mrb[100].mxu0 %v917_v32  ;;  %v1110_v32 = vpack.c.bf16 %v1059_v62, %v1058_v24  ;;  %v1224_v62 = vpack.c.bf16 %v10667_v56, %v10658_v47  ;;  %v1226_v47 = vpack.c.bf16 %v10686_v38, %v10680_v22  ;;  %v3670_v56 = vld [vmem:[%s12419_s4] sm:$0xff]  ;;  %v3671_v22 = vld [vmem:[%s12419_s4 + $0x8] sm:$0xff]  ;;  %v3672_v38 = vld [vmem:[%s12419_s4 + $0x10] sm:$0xff] }
 0x2c7   : > { %2935 = vmatprep.mubr.bf16.mxu0 %v1026_v43  ;;  %v1060_v43 = vld [vmem:[#allocation2 + $0x67] sm:$0xff]  ;;  %3726 = vperm.xlu0 %9596, %v3670_v56   ;;  %v3692_v56 = vld [vmem:[%s12419_s4 + $0xb0] sm:$0xff] }
 0x2c8   : > { %3736 = vperm.xlu1 %9597, %v3672_v38   ;;  %v3696_v38 = vld [vmem:[%s12419_s4 + $0xd0] sm:$0xff] }
 0x2cb   : > { %3731 = vperm.xlu0 %9596, %v3671_v22   ;;  %v3693_v22 = vld [vmem:[%s12419_s4 + $0xb8] sm:$0xff] }
 0x2ce   : > { %2936 = vmatmul.mubr.bf16.gmra.mrb[104].mxu0 %v9687_v6  ;;  %v1061_v6 = vld [vmem:[#allocation2 + $0x6f] sm:$0xff] }
 0x2cf   : > { %2976 = vmatprep.mubr.bf16.mxu0 %v1216_v11  ;;  %v9693_v11 = vld [vmem:[%s12416_s1 + $0x228] sm:$0xff]   ;;  %v1111_v50 = vpack.c.bf16 %v1061_v6, %v1060_v43  ;;  %v10853_v43 = vpack.c.bf16 %v10671_v41, %v10671_v41  ;;  %v1074_v6 = vld [vmem:[#allocation2 + $0xd7] sm:$0xff] }
 0x2d1   : > { %5930 = vmatprep.mubr.bf16.mxu1 %v10853_v43 }
 0x2d6   : > { %2977 = vmatmul.mubr.bf16.vlgmr.msra.gmra.mrb[0].mxu0 %v1108_v8  ;;  %v1112_v8 = vpack.c.bf16 %v1063_v12, %v1062_v10  ;;  %v3674_v10 = vld [vmem:[%s12419_s4 + $0x20] sm:$0xff] }
 0x2d7   : > { %8473 = vmatpush3.bf16.msra.mxu0 %v9688_v3  ;;  %2984 = vmatprep.mubr.bf16.mxu0 %v1217_v23  ;;  %v1221_v3 = vpack.c.bf16 %v10631_v33, %v10617_v9  ;;  %v9694_v23 = vld [vmem:[%s12416_s1 + $0x230] sm:$0xff]   ;;  %v1223_v33 = vpack.c.bf16 %v10656_v35, %v10649_v44  ;;  %v1225_v44 = vpack.c.bf16 %v10678_v28, %v10669_v16  ;;  %v1072_v35 = vld [vmem:[#allocation2 + $0xc7] sm:$0xff]  ;;  %v1075_v16 = vld [vmem:[#allocation2 + $0xdf] sm:$0xff] }
 0x2d8   : > { %8474 = vmatprep.subr.bf16.mxu0 %v10671_v41  ;;  %v1118_v28 = vpack.c.bf16 %v1075_v16, %v1074_v6  ;;  %3746 = vperm.xlu0 %9596, %v3674_v10   ;;  %v1086_v6 = vld [vmem:[#allocation2 + $0x137] sm:$0xff]  ;;  %v1087_v16 = vld [vmem:[#allocation2 + $0x13f] sm:$0xff]  ;;  %v3695_v10 = vld [vmem:[%s12419_s4 + $0xc8] sm:$0xff] }
 0x2db   : > { %8475 = vmatpush3.bf16.msra.mxu0 %v9689_v18  ;;  %v1066_v18 = vld [vmem:[#allocation2 + $0x97] sm:$0xff] }
 0x2dc   : > { %8476 = vmatprep.subr.bf16.mxu0 %v10671_v41 }
 0x2de   : > { %2985 = vmatmul.mubr.bf16.gmra.mrb[4].mxu0 %v1109_v37  ;;  %v1067_v37 = vld [vmem:[#allocation2 + $0x9f] sm:$0xff] }
 0x2df   : > { %2992 = vmatprep.mubr.bf16.mxu0 %v1218_v58  ;;  %8477 = vmatpush3.bf16.msra.mxu0 %v9690_v26  ;;  %v1114_v9 = vpack.c.bf16 %v1067_v37, %v1066_v18  ;;  %v1068_v58 = vld [vmem:[#allocation2 + $0xa7] sm:$0xff]  ;;  %v1069_v26 = vld [vmem:[#allocation2 + $0xaf] sm:$0xff] }
 0x2e0   : > { %8478 = vmatprep.subr.bf16.mxu0 %v10671_v41  ;;  %v1115_v24 = vpack.c.bf16 %v1069_v26, %v1068_v58  ;;  %v1080_v18 = vld [vmem:[#allocation2 + $0x107] sm:$0xff]  ;;  %v1081_v37 = vld [vmem:[#allocation2 + $0x10f] sm:$0xff]  ;;  %v3681_v58 = vld [vmem:[%s12419_s4 + $0x58] sm:$0xff] }
 0x2e1   : > { %v1121_v17 = vpack.c.bf16 %v1081_v37, %v1080_v18  ;;  %v3684_v26 = vld [vmem:[%s12419_s4 + $0x70] sm:$0xff]  ;;  %v1236_v18 = vpack.c.bf16 %v10766_v42, %v10760_v20  ;;  %v3705_v37 = vld [vmem:[%s12419_s4 + $0x118] sm:$0xff]  ;;  %v3710_v20 = vld [vmem:[%s12419_s4 + $0x140] sm:$0xff] }
 0x2e3   : > { %8479 = vmatpush3.bf16.msra.mxu0 %v9691_v5  ;;  %v1071_v5 = vld [vmem:[#allocation2 + $0xbf] sm:$0xff] }
 0x2e4   : > { %8480 = vmatprep.subr.bf16.mxu0 %v10671_v41 }
 0x2e6   : > { %2993 = vmatmul.mubr.bf16.gmra.mrb[8].mxu0 %v1110_v32  ;;  %v1116_v32 = vpack.c.bf16 %v1071_v5, %v1070_v40  ;;  %v1231_v40 = vpack.c.bf16 %v10726_v30, %v10720_v57  ;;  %v3685_v5 = vld [vmem:[%s12419_s4 + $0x78] sm:$0xff]  ;;  %v3690_v57 = vld [vmem:[%s12419_s4 + $0xa0] sm:$0xff] }
 0x2e7   : > { %3000 = vmatprep.mubr.bf16.mxu0 %v1219_v63  ;;  %8481 = vmatpush3.bf16.msra.mxu0 %v9692_v15  ;;  %v1073_v63 = vld [vmem:[#allocation2 + $0xcf] sm:$0xff] }
 0x2e8   : > { %8482 = vmatprep.subr.bf16.mxu0 %v10671_v41  ;;  %v1117_v15 = vpack.c.bf16 %v1073_v63, %v1072_v35  ;;  %v1085_v35 = vld [vmem:[#allocation2 + $0x12f] sm:$0xff] }
 0x2e9   : > { %v3687_v63 = vld [vmem:[%s12419_s4 + $0x88] sm:$0xff] }
 0x2eb   : > { %8483 = vmatpush3.bf16.msra.mxu0 %v9693_v11  ;;  %v1227_v11 = vpack.c.bf16 %v10694_v2, %v10688_v34  ;;  %v1228_v34 = vpack.c.bf16 %v10702_v0, %v10696_v59  ;;  %v3673_v2 = vld [vmem:[%s12419_s4 + $0x18] sm:$0xff]  ;;  %v3678_v59 = vld [vmem:[%s12419_s4 + $0x40] sm:$0xff] }
 0x2ec   : > { %8484 = vmatprep.subr.bf16.mxu0 %v10671_v41  ;;  %3741 = vperm.xlu1 %9597, %v3673_v2   ;;  %v3700_v2 = vld [vmem:[%s12419_s4 + $0xf0] sm:$0xff] }
 0x2ee   : > { %3001 = vmatmul.mubr.bf16.gmra.mrb[12].mxu0 %v1111_v50  ;;  %v1076_v50 = vld [vmem:[#allocation2 + $0xe7] sm:$0xff] }
 0x2ef   : > { %3008 = vmatprep.mubr.bf16.mxu0 %v1220_v7  ;;  %8485 = vmatpush3.bf16.msra.mxu0 %v9694_v23  ;;  %v1077_v7 = vld [vmem:[#allocation2 + $0xef] sm:$0xff]  ;;  %v1079_v23 = vld [vmem:[#allocation2 + $0xff] sm:$0xff] }
 0x2f0   : > { %8486 = vmatprep.subr.bf16.mxu0 %v10671_v41  ;;  %v1119_v12 = vpack.c.bf16 %v1077_v7, %v1076_v50  ;;  %3751 = vperm.xlu1 %9597, %v3675_v27   ;;  %v1088_v50 = vld [vmem:[#allocation2 + $0x147] sm:$0xff]  ;;  %v1089_v7 = vld [vmem:[#allocation2 + $0x14f] sm:$0xff]  ;;  %v1235_v27 = vpack.c.bf16 %v10758_v48, %v10752_v36 }
 0x2f1   : > { %v3706_v36 = vld [vmem:[%s12419_s4 + $0x120] sm:$0xff] }
 0x2f3   : > { %8487 = vmatpush3.bf16.msra.mxu0 %v9695_v29  ;;  %v3683_v29 = vld [vmem:[%s12419_s4 + $0x68] sm:$0xff] }
 0x2f6   : > { %3009 = vmatmul.mubr.bf16.gmra.mrb[16].mxu0 %v1112_v8  ;;  %v3676_v8 = vld [vmem:[%s12419_s4 + $0x30] sm:$0xff] }
 0x2f7   : > { %3016 = vmatprep.mubr.bf16.mxu0 %v1221_v3  ;;  %v1078_v3 = vld [vmem:[#allocation2 + $0xf7] sm:$0xff]  ;;  %3756 = vperm.xlu0 %9596, %v3676_v8  }
 0x2f8   : > { %v1120_v0 = vpack.c.bf16 %v1079_v23, %v1078_v3  ;;  %v1090_v8 = vld [vmem:[#allocation2 + $0x157] sm:$0xff]  ;;  %v1091_v3 = vld [vmem:[#allocation2 + $0x15f] sm:$0xff]  ;;  %v3699_v23 = vld [vmem:[%s12419_s4 + $0xe8] sm:$0xff] }
 0x2fb   : > { %3766 = vperm.xlu0 %9596, %v3678_v59   ;;  %v3701_v59 = vld [vmem:[%s12419_s4 + $0xf8] sm:$0xff] }
 0x2fe   : > { %3017 = vmatmul.mubr.bf16.gmra.mrb[20].mxu0 %v1113_v53  ;;  %v3677_v53 = vld [vmem:[%s12419_s4 + $0x38] sm:$0xff] }
 0x2ff   : > { %3024 = vmatprep.mubr.bf16.mxu0 %v1222_v60  ;;  %v3680_v60 = vld [vmem:[%s12419_s4 + $0x50] sm:$0xff]  ;;  %3761 = vperm.xlu1 %9597, %v3677_v53  }
 0x300   : > { %3776 = vperm.xlu0 %9596, %v3680_v60   ;;  %v1093_v53 = vld [vmem:[#allocation2 + $0x16f] sm:$0xff] }
 0x301   : > { %v3703_v60 = vld [vmem:[%s12419_s4 + $0x108] sm:$0xff] }
 0x304   : > { %3786 = vperm.xlu0 %9596, %v3682_v54   ;;  %v1094_v54 = vld [vmem:[#allocation2 + $0x177] sm:$0xff] }
 0x306   : > { %3025 = vmatmul.mubr.bf16.gmra.mrb[24].mxu0 %v1114_v9  ;;  %v3679_v9 = vld [vmem:[%s12419_s4 + $0x48] sm:$0xff] }
 0x307   : > { %3032 = vmatprep.mubr.bf16.mxu0 %v1223_v33  ;;  %3771 = vperm.xlu1 %9597, %v3679_v9   ;;  %v1230_v33 = vpack.c.bf16 %v10718_v21, %v10712_v19  ;;  %v3686_v19 = vld [vmem:[%s12419_s4 + $0x80] sm:$0xff]  ;;  %v3708_v9 = vld [vmem:[%s12419_s4 + $0x130] sm:$0xff] }
 0x308   : > { %3796 = vperm.xlu0 %9596, %v3684_v26   ;;  %v3709_v26 = vld [vmem:[%s12419_s4 + $0x138] sm:$0xff] }
 0x30b   : > { %3781 = vperm.xlu1 %9597, %v3681_v58   ;;  %v1237_v58 = vpack.c.bf16 %v10774_v46, %v10768_v45  ;;  %v3714_v45 = vld [vmem:[%s12419_s4 + $0x160] sm:$0xff] }
 0x30c   : > { %3806 = vperm.xlu0 %9596, %v3686_v19   ;;  %v3711_v19 = vld [vmem:[%s12419_s4 + $0x148] sm:$0xff] }
 0x30e   : > { %3033 = vmatmul.mubr.bf16.gmra.mrb[28].mxu0 %v1115_v24  ;;  %v1082_v24 = vld [vmem:[#allocation2 + $0x117] sm:$0xff] }
 0x30f   : > { %3040 = vmatprep.mubr.bf16.mxu0 %v1224_v62  ;;  %v1083_v62 = vld [vmem:[#allocation2 + $0x11f] sm:$0xff]  ;;  %3791 = vperm.xlu1 %9597, %v3683_v29   ;;  %v1097_v29 = vld [vmem:[#allocation2 + $0x18f] sm:$0xff] }
 0x310   : > { %v1122_v21 = vpack.c.bf16 %v1083_v62, %v1082_v24  ;;  %v3712_v24 = vld [vmem:[%s12419_s4 + $0x150] sm:$0xff]  ;;  %v1096_v62 = vld [vmem:[#allocation2 + $0x187] sm:$0xff] }
 0x311   : > { %v1129_v46 = vpack.c.bf16 %v1097_v29, %v1096_v62  ;;  %v9700_v62 = vld [vmem:[%s12416_s1 + $0x260] sm:$0xff]   ;;  %v9701_v29 = vld [vmem:[%s12416_s1 + $0x268] sm:$0xff]  }
 0x313   : > { %3801 = vperm.xlu1 %9597, %v3685_v5   ;;  %v3716_v5 = vld [vmem:[%s12419_s4 + $0x170] sm:$0xff] }
 0x316   : > { %3041 = vmatmul.mubr.bf16.gmra.mrb[32].mxu0 %v1116_v32  ;;  %v3688_v32 = vld [vmem:[%s12419_s4 + $0x90] sm:$0xff] }
 0x317   : > { %3048 = vmatprep.mubr.bf16.mxu0 %v1225_v44  ;;  %v1084_v44 = vld [vmem:[#allocation2 + $0x127] sm:$0xff]  ;;  %3816 = vperm.xlu0 %9596, %v3688_v32   ;;  %v1098_v32 = vld [vmem:[#allocation2 + $0x197] sm:$0xff] }
 0x318   : > { %v1123_v30 = vpack.c.bf16 %v1085_v35, %v1084_v44  ;;  %3811 = vperm.xlu1 %9597, %v3687_v63   ;;  %v1099_v44 = vld [vmem:[#allocation2 + $0x19f] sm:$0xff]  ;;  %v3715_v35 = vld [vmem:[%s12419_s4 + $0x168] sm:$0xff]  ;;  %v1239_v63 = vpack.c.bf16 %v10789_v61, %v10784_v55 }
 0x319   : > { %v1210_v55 = vld [vmem:[#allocation2 + $0x1b8] sm:$0xff]  ;;  %v1211_v61 = vld [vmem:[#allocation2 + $0x1c0] sm:$0xff] }
 0x31b   : > { %3826 = vperm.xlu0 %9596, %v3690_v57   ;;  %v3717_v57 = vld [vmem:[%s12419_s4 + $0x178] sm:$0xff] }
 0x31e   : > { %3049 = vmatmul.mubr.bf16.gmra.mrb[36].mxu0 %v1117_v15  ;;  %v1232_v15 = vpack.c.bf16 %v10734_v4, %v10728_v49  ;;  %v3694_v49 = vld [vmem:[%s12419_s4 + $0xc0] sm:$0xff]  ;;  %v1124_v4 = vpack.c.bf16 %v1087_v16, %v1086_v6 }
 0x31f   : > { %3056 = vmatprep.mubr.bf16.mxu0 %v1226_v47  ;;  %v3689_v47 = vld [vmem:[%s12419_s4 + $0x98] sm:$0xff]  ;;  %3836 = vperm.xlu0 %9596, %v3692_v56   ;;  %v3719_v56 = vld [vmem:[%s12419_s4 + $0x188] sm:$0xff]  ;;  %v3722_v6 = vld [vmem:[%s12419_s4 + $0x1a0] sm:$0xff] }
 0x320   : > { %3821 = vperm.xlu1 %9597, %v3689_v47   ;;  %v1101_v47 = vld [vmem:[#allocation2 + $0x1af] sm:$0xff] }
 0x323   : > { %3846 = vperm.xlu0 %9596, %v3694_v49   ;;  %v3721_v49 = vld [vmem:[%s12419_s4 + $0x198] sm:$0xff] }
 0x326   : > { %3057 = vmatmul.mubr.bf16.gmra.mrb[40].mxu0 %v1118_v28  ;;  %v3691_v28 = vld [vmem:[%s12419_s4 + $0xa8] sm:$0xff] }
 0x327   : > { %3064 = vmatprep.mubr.bf16.mxu0 %v1227_v11  ;;  %3831 = vperm.xlu1 %9597, %v3691_v28   ;;  %v1233_v11 = vpack.c.bf16 %v10742_v39, %v10736_v13  ;;  %v3698_v13 = vld [vmem:[%s12419_s4 + $0xe0] sm:$0xff]  ;;  %v1125_v39 = vpack.c.bf16 %v1089_v7, %v1088_v50  ;;  %v1240_v28 = vpack.c.bf16 %v1211_v61, %v1210_v55 }
 0x328   : > { %3856 = vperm.xlu0 %9596, %v3696_v38   ;;  %v1212_v38 = vld [vmem:[#allocation2 + $0x1c8] sm:$0xff]  ;;  %v9708_v61 = vld [vmem:[%s12416_s1 + $0x2a0] sm:$0xff]  }
 0x329   : > { %v1241_v7 = vpack.c.bf16 %v10671_v41, %v1212_v38  ;;  %v9711_v38 = vld [vmem:[%s12416_s1 + $0x2b8] sm:$0xff]  }
 0x32b   : > { %3841 = vperm.xlu1 %9597, %v3693_v22   ;;  %v3723_v22 = vld [vmem:[%s12419_s4 + $0x1a8] sm:$0xff] }
 0x32c   : > { %3866 = vperm.xlu0 %9596, %v3698_v13   ;;  %v1105_v13 = vld [vmem:[#allocation2 + $0x1cf] sm:$0xff] }
 0x32e   : > { %3065 = vmatmul.mubr.bf16.gmra.mrb[44].mxu0 %v1119_v12  ;;  %v1234_v12 = vpack.c.bf16 %v10750_v14, %v10744_v31  ;;  %v3702_v31 = vld [vmem:[%s12419_s4 + $0x100] sm:$0xff]  ;;  %v1126_v14 = vpack.c.bf16 %v1091_v3, %v1090_v8 }
 0x32f   : > { %3072 = vmatprep.mubr.bf16.mxu0 %v1228_v34  ;;  %3851 = vperm.xlu1 %9597, %v3695_v10   ;;  %v3697_v34 = vld [vmem:[%s12419_s4 + $0xd8] sm:$0xff]  ;;  %v1104_v10 = vld [vmem:[#allocation2 + $0x1c7] sm:$0xff] }
 0x330   : > { %3876 = vperm.xlu0 %9596, %v3700_v2   ;;  %v1270_v8 = vld [vmem:[#allocation2 + $0x39] sm:$0xff]  ;;  %v1271_v3 = vld [vmem:[#allocation2 + $0x41] sm:$0xff] }
 0x333   : > { %3861 = vperm.xlu1 %9597, %v3697_v34   ;;  %v1107_v34 = vld [vmem:[#allocation2 + $0x1df] sm:$0xff] }
 0x334   : > { %3886 = vperm.xlu0 %9596, %v3702_v31   ;;  %v1272_v31 = vld [vmem:[#allocation2 + $0x49] sm:$0xff] }
 0x336   : > { %3073 = vmatmul.mubr.bf16.gmra.mrb[48].mxu0 %v1120_v0  ;;  %v3704_v0 = vld [vmem:[%s12419_s4 + $0x110] sm:$0xff] }
 0x337   : > { %3080 = vmatprep.mubr.bf16.mxu0 %v1229_v25  ;;  %3871 = vperm.xlu1 %9597, %v3699_v23   ;;  %v1092_v25 = vld [vmem:[#allocation2 + $0x167] sm:$0xff]  ;;  %v1324_v23 = vpack.c.bf16 %v1271_v3, %v1270_v8  ;;  %v1298_v8 = vld [vmem:[#allocation2 + $0x119] sm:$0xff] }
 0x338   : > { %3896 = vperm.xlu0 %9596, %v3704_v0   ;;  %v1127_v48 = vpack.c.bf16 %v1093_v53, %v1092_v25  ;;  %v1276_v25 = vld [vmem:[#allocation2 + $0x69] sm:$0xff]  ;;  %v1277_v53 = vld [vmem:[#allocation2 + $0x71] sm:$0xff]  ;;  %v1299_v3 = vld [vmem:[#allocation2 + $0x121] sm:$0xff] }
 0x33b   : > { %3881 = vperm.xlu1 %9597, %v3701_v59   ;;  %v1275_v59 = vld [vmem:[#allocation2 + $0x61] sm:$0xff] }
 0x33c   : > { %3906 = vperm.xlu0 %9596, %v3706_v36   ;;  %v1278_v36 = vld [vmem:[#allocation2 + $0x79] sm:$0xff] }
 0x33e   : > { %3081 = vmatmul.mubr.bf16.gmra.mrb[52].mxu0 %v1121_v17  ;;  %v1095_v17 = vld [vmem:[#allocation2 + $0x17f] sm:$0xff] }
 0x33f   : > { %3088 = vmatprep.mubr.bf16.mxu0 %v1230_v33  ;;  %3891 = vperm.xlu1 %9597, %v3703_v60   ;;  %v3707_v33 = vld [vmem:[%s12419_s4 + $0x128] sm:$0xff]  ;;  %v1128_v42 = vpack.c.bf16 %v1095_v17, %v1094_v54  ;;  %v1327_v60 = vpack.c.bf16 %v1277_v53, %v1276_v25  ;;  %v1281_v17 = vld [vmem:[#allocation2 + $0x91] sm:$0xff] }
 0x340   : > { %3916 = vperm.xlu0 %9596, %v3708_v9   ;;  %v9697_v9 = vld [vmem:[%s12416_s1 + $0x248] sm:$0xff]  }
 0x341   : > { %v1280_v54 = vld [vmem:[#allocation2 + $0x89] sm:$0xff] }
 0x342   : > { %v1304_v53 = vld [vmem:[#allocation2 + $0x149] sm:$0xff] }
 0x343   : > { %3901 = vperm.xlu1 %9597, %v3705_v37   ;;  %v9696_v37 = vld [vmem:[%s12416_s1 + $0x240] sm:$0xff]  }
 0x344   : > { %3926 = vperm.xlu0 %9596, %v3710_v20   ;;  %5899 = vmatpush1.bf16.msra.mxu1 %v9696_v37  ;;  %v9698_v20 = vld [vmem:[%s12416_s1 + $0x250] sm:$0xff]   ;;  %v1307_v37 = vld [vmem:[#allocation2 + $0x161] sm:$0xff] }
 0x345   : > { %5900 = vmatprep.subr.bf16.mxu1 %v12421_v1 }
 0x346   : > { %3089 = vmatmul.mubr.bf16.gmra.mrb[56].mxu0 %v1122_v21  ;;  %v1238_v21 = vpack.c.bf16 %v10782_v52, %v10776_v51  ;;  %v3718_v51 = vld [vmem:[%s12419_s4 + $0x180] sm:$0xff]  ;;  %v1130_v52 = vpack.c.bf16 %v1099_v44, %v1098_v32 }
 0x347   : > { %3096 = vmatprep.mubr.bf16.mxu0 %v1231_v40  ;;  %3911 = vperm.xlu1 %9597, %v3707_v33   ;;  %v3713_v40 = vld [vmem:[%s12419_s4 + $0x158] sm:$0xff]  ;;  %v1329_v33 = vpack.c.bf16 %v1281_v17, %v1280_v54  ;;  %v1287_v32 = vld [vmem:[#allocation2 + $0xc1] sm:$0xff]  ;;  %v1308_v54 = vld [vmem:[#allocation2 + $0x169] sm:$0xff] }
 0x348   : > { %3936 = vperm.xlu0 %9596, %v3712_v24   ;;  %5901 = vmatpush1.bf16.msra.mxu1 %v9697_v9  ;;  %v1309_v17 = vld [vmem:[#allocation2 + $0x171] sm:$0xff] }
 0x349   : > { %5902 = vmatprep.subr.bf16.mxu1 %v12421_v1 }
 0x34b   : > { %3921 = vperm.xlu1 %9597, %v3709_v26   ;;  %v1283_v26 = vld [vmem:[#allocation2 + $0xa1] sm:$0xff] }
 0x34c   : > { %3946 = vperm.xlu0 %9596, %v3714_v45   ;;  %5903 = vmatpush1.bf16.msra.mxu1 %v9698_v20  ;;  %v1285_v45 = vld [vmem:[#allocation2 + $0xb1] sm:$0xff] }
 0x34d   : > { %5904 = vmatprep.subr.bf16.mxu1 %v12421_v1  ;;  %v9715_v20 = vld [vmem:[%s12416_s1 + $0x2d8] sm:$0xff]  }
 0x34e   : > { %3097 = vmatmul.mubr.bf16.gmra.mrb[60].mxu0 %v1123_v30  ;;  %v3720_v30 = vld [vmem:[%s12419_s4 + $0x190] sm:$0xff] }
 0x34f   : > { %3104 = vmatprep.mubr.bf16.mxu0 %v1232_v15  ;;  %3931 = vperm.xlu1 %9597, %v3711_v19   ;;  %v1100_v15 = vld [vmem:[#allocation2 + $0x1a7] sm:$0xff] }
 0x350   : > { %3956 = vperm.xlu0 %9596, %v3716_v5   ;;  %v1131_v16 = vpack.c.bf16 %v1101_v47, %v1100_v15  ;;  %v1284_v19 = vld [vmem:[#allocation2 + $0xa9] sm:$0xff]  ;;  %v1286_v5 = vld [vmem:[#allocation2 + $0xb9] sm:$0xff] }
 0x351   : > { %v1332_v44 = vpack.c.bf16 %v1287_v32, %v1286_v5  ;;  %v9707_v15 = vld [vmem:[%s12416_s1 + $0x298] sm:$0xff]   ;;  %v1316_v5 = vld [vmem:[#allocation2 + $0x1a9] sm:$0xff] }
 0x352   : > { %v1290_v47 = vld [vmem:[#allocation2 + $0xd9] sm:$0xff]  ;;  %v1317_v32 = vld [vmem:[#allocation2 + $0x1b1] sm:$0xff] }
 0x353   : > { %3941 = vperm.xlu1 %9597, %v3713_v40   ;;  %v9703_v40 = vld [vmem:[%s12416_s1 + $0x278] sm:$0xff]  }
 0x354   : > { %3966 = vperm.xlu0 %9596, %v3718_v51   ;;  %v9705_v51 = vld [vmem:[%s12416_s1 + $0x288] sm:$0xff]  }
 0x356   : > { %3105 = vmatmul.mubr.bf16.gmra.mrb[64].mxu0 %v1124_v4  ;;  %v1102_v4 = vld [vmem:[#allocation2 + $0x1b7] sm:$0xff] }
 0x357   : > { %3112 = vmatprep.mubr.bf16.mxu0 %v1233_v11  ;;  %3951 = vperm.xlu1 %9597, %v3715_v35   ;;  %v1103_v11 = vld [vmem:[#allocation2 + $0x1bf] sm:$0xff] }
 0x358   : > { %3976 = vperm.xlu0 %9596, %v3720_v30   ;;  %v1132_v50 = vpack.c.bf16 %v1103_v11, %v1102_v4  ;;  %v9704_v35 = vld [vmem:[%s12416_s1 + $0x280] sm:$0xff]   ;;  %v9706_v30 = vld [vmem:[%s12416_s1 + $0x290] sm:$0xff]  }
 0x359   : > { %v9710_v4 = vld [vmem:[%s12416_s1 + $0x2b0] sm:$0xff]   ;;  %v1294_v11 = vld [vmem:[#allocation2 + $0xf9] sm:$0xff] }
 0x35b   : > { %3961 = vperm.xlu1 %9597, %v3717_v57  }
 0x35c   : > { %3986 = vperm.xlu0 %9596, %v3722_v6   ;;  %v1292_v6 = vld [vmem:[#allocation2 + $0xe9] sm:$0xff] }
 0x35e   : > { %3113 = vmatmul.mubr.bf16.gmra.mrb[68].mxu0 %v1125_v39  ;;  %v1133_v39 = vpack.c.bf16 %v1105_v13, %v1104_v10  ;;  %v4107_v10 = vld [vmem:[#allocation3 + $0xf] sm:$0xff] }
 0x35f   : > { %3120 = vmatprep.mubr.bf16.mxu0 %v1234_v12  ;;  %3971 = vperm.xlu1 %9597, %v3719_v56   ;;  %v1106_v12 = vld [vmem:[#allocation2 + $0x1d7] sm:$0xff]  ;;  %v1291_v56 = vld [vmem:[#allocation2 + $0xe1] sm:$0xff] }
 0x360   : > { %v1134_v2 = vpack.c.bf16 %v1107_v34, %v1106_v12  ;;  %v1334_v55 = vpack.c.bf16 %v1291_v56, %v1290_v47  ;;  %v1297_v12 = vld [vmem:[#allocation2 + $0x111] sm:$0xff]  ;;  %v1322_v56 = vld [vmem:[#allocation2 + $0x1d9] sm:$0xff] }
 0x361   : > { %v9719_v47 = vld [vmem:[%s12416_s1 + $0x2f8] sm:$0xff]  }
 0x363   : > { %3981 = vperm.xlu1 %9597, %v3721_v49  }
 0x366   : > { %3121 = vmatmul.mubr.bf16.gmra.mrb[72].mxu0 %v1126_v14  ;;  %v1273_v14 = vld [vmem:[#allocation2 + $0x51] sm:$0xff] }
 0x367   : > { %3128 = vmatprep.mubr.bf16.mxu0 %v1235_v27  ;;  %3991 = vperm.xlu1 %9597, %v3723_v22   ;;  %v1325_v27 = vpack.c.bf16 %v1273_v14, %v1272_v31  ;;  %v1295_v22 = vld [vmem:[#allocation2 + $0x101] sm:$0xff]  ;;  %v1300_v31 = vld [vmem:[#allocation2 + $0x129] sm:$0xff]  ;;  %v1301_v14 = vld [vmem:[#allocation2 + $0x131] sm:$0xff] }
 0x36e   : > { %3129 = vmatmul.mubr.bf16.gmra.mrb[76].mxu0 %v1127_v48  ;;  %v1279_v48 = vld [vmem:[#allocation2 + $0x81] sm:$0xff] }
 0x36f   : > { %3136 = vmatprep.mubr.bf16.mxu0 %v1236_v18  ;;  %v1328_v18 = vpack.c.bf16 %v1279_v48, %v1278_v36  ;;  %v9714_v48 = vld [vmem:[%s12416_s1 + $0x2d0] sm:$0xff]  }
 0x376   : > { %3137 = vmatmul.mubr.bf16.gmra.mrb[80].mxu0 %v1128_v42  ;;  %v9699_v42 = vld [vmem:[%s12416_s1 + $0x258] sm:$0xff]  }
 0x377   : > { %3144 = vmatprep.mubr.bf16.mxu0 %v1237_v58  ;;  %v1282_v58 = vld [vmem:[#allocation2 + $0x99] sm:$0xff]  ;;  %5905 = vmatpush1.bf16.msra.mxu1 %v9699_v42 }
 0x378   : > { %v1330_v24 = vpack.c.bf16 %v1283_v26, %v1282_v58  ;;  %5906 = vmatprep.subr.bf16.mxu1 %v12421_v1  ;;  %v1310_v42 = vld [vmem:[#allocation2 + $0x179] sm:$0xff]  ;;  %v1311_v58 = vld [vmem:[#allocation2 + $0x181] sm:$0xff] }
 0x379   : > { %v1344_v26 = vpack.c.bf16 %v1311_v58, %v1310_v42 }
 0x37b   : > { %5907 = vmatpush1.bf16.msra.mxu1 %v9700_v62  ;;  %v1312_v62 = vld [vmem:[#allocation2 + $0x189] sm:$0xff] }
 0x37c   : > { %5908 = vmatprep.subr.bf16.mxu1 %v12421_v1 }
 0x37e   : > { %3145 = vmatmul.mubr.bf16.gmra.mrb[84].mxu0 %v1129_v46  ;;  %v1331_v46 = vpack.c.bf16 %v1285_v45, %v1284_v19  ;;  %v1314_v45 = vld [vmem:[#allocation2 + $0x199] sm:$0xff] }
 0x37f   : > { %3152 = vmatprep.mubr.bf16.mxu0 %v1238_v21  ;;  %5909 = vmatpush1.bf16.msra.mxu1 %v9701_v29  ;;  %v9702_v21 = vld [vmem:[%s12416_s1 + $0x270] sm:$0xff]  }
 0x380   : > { %5910 = vmatprep.subr.bf16.mxu1 %v12421_v1  ;;  %v1313_v29 = vld [vmem:[#allocation2 + $0x191] sm:$0xff] }
 0x381   : > { %v1345_v19 = vpack.c.bf16 %v1313_v29, %v1312_v62 }
 0x383   : > { %5911 = vmatpush1.bf16.msra.mxu1 %v9702_v21 }
 0x384   : > { %5912 = vmatprep.subr.bf16.mxu1 %v12421_v1 }
 0x386   : > { %3153 = vmatmul.mubr.bf16.gmra.mrb[88].mxu0 %v1130_v52  ;;  %v1288_v52 = vld [vmem:[#allocation2 + $0xc9] sm:$0xff] }
 0x387   : > { %3160 = vmatprep.mubr.bf16.mxu0 %v1239_v63  ;;  %5913 = vmatpush1.bf16.msra.mxu1 %v9703_v40  ;;  %v1289_v63 = vld [vmem:[#allocation2 + $0xd1] sm:$0xff]  ;;  %v9717_v40 = vld [vmem:[%s12416_s1 + $0x2e8] sm:$0xff]  }
 0x388   : > { %5914 = vmatprep.subr.bf16.mxu1 %v12421_v1  ;;  %v1333_v57 = vpack.c.bf16 %v1289_v63, %v1288_v52  ;;  %v9718_v63 = vld [vmem:[%s12416_s1 + $0x2f0] sm:$0xff]  }
 0x38b   : > { %5915 = vmatpush1.bf16.msra.mxu1 %v9704_v35  ;;  %v1318_v35 = vld [vmem:[#allocation2 + $0x1b9] sm:$0xff] }
 0x38c   : > { %5916 = vmatprep.subr.bf16.mxu1 %v12421_v1 }
 0x38e   : > { %3161 = vmatmul.mubr.bf16.gmra.mrb[92].mxu0 %v1131_v16  ;;  %v1293_v16 = vld [vmem:[#allocation2 + $0xf1] sm:$0xff] }
 0x38f   : > { %3168 = vmatprep.mubr.bf16.mxu0 %v1240_v28  ;;  %5917 = vmatpush1.bf16.msra.mxu1 %v9705_v51  ;;  %v9709_v28 = vld [vmem:[%s12416_s1 + $0x2a8] sm:$0xff]   ;;  %v1335_v49 = vpack.c.bf16 %v1293_v16, %v1292_v6  ;;  %v11198_v6 = vld [vmem:[%s12417_s2] ss:$0 sm:$0xff] }
 0x390   : > { %5918 = vmatprep.subr.bf16.mxu1 %v12421_v1  ;;  %v1319_v51 = vld [vmem:[#allocation2 + $0x1c1] sm:$0xff]  ;;  %v11203_v16 = vld [vmem:[%s12418_s3] ss:$0 sm:$0xff] }
 0x391   : > { %v1348_v52 = vpack.c.bf16 %v1319_v51, %v1318_v35 }
 0x393   : > { %5919 = vmatpush1.bf16.msra.mxu1 %v9706_v30  ;;  %v1321_v30 = vld [vmem:[#allocation2 + $0x1d1] sm:$0xff] }
 0x394   : > { %5920 = vmatprep.subr.bf16.mxu1 %v12421_v1 }
 0x396   : > { %3169 = vmatmul.mubr.bf16.gmra.mrb[96].mxu0 %v1132_v50  ;;  %v1336_v50 = vpack.c.bf16 %v1295_v22, %v1294_v11 }
 0x397   : > { %3176 = vmatprep.mubr.bf16.mxu0 %v1241_v7  ;;  %5921 = vmatpush1.bf16.msra.mxu1 %v9707_v15  ;;  %v4106_v7 = vld [vmem:[#allocation3 + $0x7] sm:$0xff] }
 0x398   : > { %5922 = vmatprep.subr.bf16.mxu1 %v12421_v1  ;;  %v4160_v13 = vpack.c.bf16 %v4107_v10, %v4106_v7  ;;  %v3727_v7 = vpop.permute.xlu0 %3726 }
 0x39b   : > { %5923 = vmatpush1.bf16.msra.mxu1 %v9708_v61 }
 0x39c   : > { %5924 = vmatprep.subr.bf16.mxu1 %v12421_v1 }
 0x39e   : > { %3177 = vmatmul.mubr.bf16.gmra.mrb[100].mxu0 %v1133_v39  ;;  %v11133_v39 = vld [vmem:[#allocation2 + $0x8] sm:$0xff] }
 0x39f   : > { %3184 = vmatprep.mubr.bf16.mxu0 %v10853_v43  ;;  %v1274_v43 = vld [vmem:[#allocation2 + $0x59] sm:$0xff]  ;;  %5925 = vmatpush1.bf16.msra.mxu1 %v9709_v28 }
 0x3a0   : > { %v1326_v0 = vpack.c.bf16 %v1275_v59, %v1274_v43  ;;  %5926 = vmatprep.subr.bf16.mxu1 %v12421_v1  ;;  %v9713_v43 = vld [vmem:[%s12416_s1 + $0x2c8] sm:$0xff]   ;;  %v1302_v59 = vld [vmem:[#allocation2 + $0x139] sm:$0xff] }
 0x3a3   : > { %5927 = vmatpush1.bf16.msra.mxu1 %v9710_v4 }
 0x3a4   : > { %5928 = vmatprep.subr.bf16.mxu1 %v12421_v1 }
 0x3a6   : > { %3185 = vmatmul.mubr.bf16.gmra.mrb[104].mxu0 %v1134_v2  ;;  %v9712_v2 = vld [vmem:[%s12416_s1 + $0x2c0] sm:$0xff]  }
 0x3a7   : > { %8488 = vmatprep.mubr.msk.bf16.mxu0 %vm9842_vm0, %v10671_v41  ;;  %5929 = vmatpush1.bf16.msra.mxu1 %v9711_v38 }
 0x3a8   : > { %6147 = vmatprep.subr.bf16.mxu1 %v12421_v1 }
 0x3aa   : > { %5931 = vmatmul.mubr.bf16.vlgmr.msra.gmra.mrb[0].mxu1 %v4160_v13 }
 0x3ab   : > { %6148 = vmatpush1.bf16.msra.mxu1 %v9712_v2 }
 0x3ac   : > { %6149 = vmatprep.subr.bf16.mxu1 %v12421_v1 }
 0x3ae   : > { %8489 = vmatmul.mubr.bf16.vlgmr.msra.gmra.mrb[0].mxu0 %v1324_v23  ;;  %v1338_v23 = vpack.c.bf16 %v1299_v3, %v1298_v8 }
 0x3af   : > { %8492 = vmatprep.mubr.msk.bf16.mxu0 %vm9842_vm0, %v10671_v41  ;;  %6150 = vmatpush1.bf16.msra.mxu1 %v9713_v43 }
 0x3b0   : > { %6151 = vmatprep.subr.bf16.mxu1 %v12421_v1 }
 0x3b3   : > { %6152 = vmatpush1.bf16.msra.mxu1 %v9714_v48 }
 0x3b4   : > { %6153 = vmatprep.subr.bf16.mxu1 %v12421_v1 }
 0x3b6   : > { %8493 = vmatmul.mubr.bf16.gmra.mrb[4].mxu0 %v1325_v27  ;;  %v1339_v27 = vpack.c.bf16 %v1301_v14, %v1300_v31  ;;  %v3732_v14 = vpop.permute.xlu0 %3731 }
 0x3b7   : > { %8496 = vmatprep.mubr.msk.bf16.mxu0 %vm9842_vm0, %v10671_v41  ;;  %6154 = vmatpush1.bf16.msra.mxu1 %v9715_v20 }
 0x3b8   : > { %6155 = vmatprep.subr.bf16.mxu1 %v12421_v1 }
 0x3ba   : > { %v3747_v35 = vpop.permute.xlu0 %3746 }
 0x3be   : > { %8497 = vmatmul.mubr.bf16.gmra.mrb[8].mxu0 %v1326_v0  ;;  %v1303_v0 = vld [vmem:[#allocation2 + $0x141] sm:$0xff] }
 0x3bf   : > { %8500 = vmatprep.mubr.msk.bf16.mxu0 %vm9842_vm0, %v10671_v41  ;;  %v1340_v25 = vpack.c.bf16 %v1303_v0, %v1302_v59 }
 0x3c6   : > { %8501 = vmatmul.mubr.bf16.gmra.mrb[12].mxu0 %v1327_v60  ;;  %v1305_v60 = vld [vmem:[#allocation2 + $0x151] sm:$0xff] }
 0x3c7   : > { %8504 = vmatprep.mubr.msk.bf16.mxu0 %vm9842_vm0, %v10671_v41  ;;  %v1341_v36 = vpack.c.bf16 %v1305_v60, %v1304_v53  ;;  %v3737_v60 = vpop.permute.xlu1 %3736 }
 0x3cb   : > { %v3742_v58 = vpop.permute.xlu1 %3741 }
 0x3ce   : > { %8505 = vmatmul.mubr.bf16.gmra.mrb[16].mxu0 %v1328_v18  ;;  %v1306_v18 = vld [vmem:[#allocation2 + $0x159] sm:$0xff] }
 0x3cf   : > { %8508 = vmatprep.mubr.msk.bf16.mxu0 %vm9842_vm0, %v10671_v41  ;;  %v1342_v9 = vpack.c.bf16 %v1307_v37, %v1306_v18 }
 0x3d6   : > { %8509 = vmatmul.mubr.bf16.gmra.mrb[20].mxu0 %v1329_v33  ;;  %v1343_v33 = vpack.c.bf16 %v1309_v17, %v1308_v54  ;;  %v4108_v54 = vld [vmem:[#allocation3 + $0x17] sm:$0xff] }
 0x3d7   : > { %8512 = vmatprep.mubr.msk.bf16.mxu0 %vm9842_vm0, %v10671_v41 }
 0x3de   : > { %8513 = vmatmul.mubr.bf16.gmra.mrb[24].mxu0 %v1330_v24  ;;  %v9716_v24 = vld [vmem:[%s12416_s1 + $0x2e0] sm:$0xff]  }
 0x3df   : > { %8516 = vmatprep.mubr.msk.bf16.mxu0 %vm9842_vm0, %v10671_v41  ;;  %6156 = vmatpush1.bf16.msra.mxu1 %v9716_v24 }
 0x3e0   : > { %6157 = vmatprep.subr.bf16.mxu1 %v12421_v1 }
 0x3e3   : > { %6158 = vmatpush1.bf16.msra.mxu1 %v9717_v40 }
 0x3e4   : > { %6159 = vmatprep.subr.bf16.mxu1 %v12421_v1 }
 0x3e6   : > { %8517 = vmatmul.mubr.bf16.gmra.mrb[28].mxu0 %v1331_v46  ;;  %v1315_v46 = vld [vmem:[#allocation2 + $0x1a1] sm:$0xff] }
 0x3e7   : > { %8520 = vmatprep.mubr.msk.bf16.mxu0 %vm9842_vm0, %v10671_v41  ;;  %v1346_v21 = vpack.c.bf16 %v1315_v46, %v1314_v45  ;;  %6160 = vmatpush1.bf16.msra.mxu1 %v9718_v63  ;;  %v9721_v46 = vld [vmem:[%s12416_s1 + $0x308] sm:$0xff]  }
 0x3e8   : > { %6161 = vmatprep.subr.bf16.mxu1 %v12421_v1 }
 0x3eb   : > { %6162 = vmatpush1.bf16.msra.mxu1 %v9719_v47 }
 0x3ec   : > { %6163 = vmatprep.subr.bf16.mxu1 %v12421_v1 }
 0x3ee   : > { %8521 = vmatmul.mubr.bf16.gmra.mrb[32].mxu0 %v1332_v44  ;;  %v1347_v44 = vpack.c.bf16 %v1317_v32, %v1316_v5 }
 0x3ef   : > { %8524 = vmatprep.mubr.msk.bf16.mxu0 %vm9842_vm0, %v10671_v41 }
 0x3f6   : > { %8525 = vmatmul.mubr.bf16.gmra.mrb[36].mxu0 %v1333_v57  ;;  %v1320_v57 = vld [vmem:[#allocation2 + $0x1c9] sm:$0xff] }
 0x3f7   : > { %8528 = vmatprep.mubr.msk.bf16.mxu0 %vm9842_vm0, %v10671_v41  ;;  %v1349_v15 = vpack.c.bf16 %v1321_v30, %v1320_v57 }
 0x3fe   : > { %8529 = vmatmul.mubr.bf16.gmra.mrb[40].mxu0 %v1334_v55  ;;  %v1323_v55 = vld [vmem:[#allocation2 + $0x1e1] sm:$0xff] }
 0x3ff   : > { %8532 = vmatprep.mubr.msk.bf16.mxu0 %vm9842_vm0, %v10671_v41  ;;  %v1350_v61 = vpack.c.bf16 %v1323_v55, %v1322_v56 }
 0x406   : > { %8533 = vmatmul.mubr.bf16.gmra.mrb[44].mxu0 %v1335_v49 }
 0x407   : > { %8536 = vmatprep.mubr.msk.bf16.mxu0 %vm9842_vm0, %v10671_v41  ;;  %v1296_v41 = vld [vmem:[#allocation2 + $0x109] sm:$0xff] }
 0x408   : > { %v1337_v34 = vpack.c.bf16 %v1297_v12, %v1296_v41  ;;  %v9720_v41 = vld [vmem:[%s12416_s1 + $0x300] sm:$0xff]  }
 0x409   : > { %6164 = vmatpush1.bf16.msra.mxu1 %v9720_v41  ;;  %v9722_v41 = vld [vmem:[%s12416_s1 + $0x310] sm:$0xff]  }
 0x40a   : > { %6165 = vmatprep.subr.bf16.mxu1 %v12421_v1 }
 0x40d   : > { %6166 = vmatpush1.bf16.msra.mxu1 %v9721_v46 }
 0x40e   : > { %8537 = vmatmul.mubr.bf16.gmra.mrb[48].mxu0 %v1336_v50  ;;  %6167 = vmatprep.subr.bf16.mxu1 %v12421_v1 }
 0x40f   : > { %8540 = vmatprep.mubr.msk.bf16.mxu0 %vm9842_vm0, %v11133_v39 }
 0x411   : > { %6168 = vmatpush1.bf16.msra.mxu1 %v9722_v41 }
 0x412   : > { %6169 = vmatprep.subr.bf16.mxu1 %v12421_v1 }
 0x416   : > { %8541 = vmatmul.mubr.bf16.gmra.mrb[52].mxu0 %v1337_v34 }
 0x417   : > { %8544 = vmatprep.mubr.msk.bf16.mxu0 %vm9842_vm0, %v11133_v39 }
 0x41e   : > { %8545 = vmatmul.mubr.bf16.gmra.mrb[56].mxu0 %v1338_v23 }
 0x41f   : > { %8548 = vmatprep.mubr.msk.bf16.mxu0 %vm9842_vm0, %v11133_v39 }
 0x426   : > { %8549 = vmatmul.mubr.bf16.gmra.mrb[60].mxu0 %v1339_v27 }
 0x427   : > { %8552 = vmatprep.mubr.msk.bf16.mxu0 %vm9842_vm0, %v11133_v39 }
 0x42e   : > { %8553 = vmatmul.mubr.bf16.gmra.mrb[64].mxu0 %v1340_v25 }
 0x42f   : > { %8556 = vmatprep.mubr.msk.bf16.mxu0 %vm9842_vm0, %v11133_v39 }
 0x436   : > { %8557 = vmatmul.mubr.bf16.gmra.mrb[68].mxu0 %v1341_v36 }
 0x437   : > { %8560 = vmatprep.mubr.msk.bf16.mxu0 %vm9842_vm0, %v11133_v39 }
 0x43e   : > { %8561 = vmatmul.mubr.bf16.gmra.mrb[72].mxu0 %v1342_v9 }
 0x43f   : > { %8564 = vmatprep.mubr.msk.bf16.mxu0 %vm9842_vm0, %v11133_v39 }
 0x446   : > { %8565 = vmatmul.mubr.bf16.gmra.mrb[76].mxu0 %v1343_v33 }
 0x447   : > { %8568 = vmatprep.mubr.msk.bf16.mxu0 %vm9842_vm0, %v11133_v39 }
 0x44e   : > { %8569 = vmatmul.mubr.bf16.gmra.mrb[80].mxu0 %v1344_v26 }
 0x44f   : > { %8572 = vmatprep.mubr.msk.bf16.mxu0 %vm9842_vm0, %v11133_v39 }
 0x456   : > { %8573 = vmatmul.mubr.bf16.gmra.mrb[84].mxu0 %v1345_v19 }
 0x457   : > { %8576 = vmatprep.mubr.msk.bf16.mxu0 %vm9842_vm0, %v11133_v39 }
 0x45e   : > { %8577 = vmatmul.mubr.bf16.gmra.mrb[88].mxu0 %v1346_v21 }
 0x45f   : > { %8580 = vmatprep.mubr.msk.bf16.mxu0 %vm9842_vm0, %v11133_v39 }
 0x466   : > { %8581 = vmatmul.mubr.bf16.gmra.mrb[92].mxu0 %v1347_v44 }
 0x467   : > { %8584 = vmatprep.mubr.msk.bf16.mxu0 %vm9842_vm0, %v11133_v39 }
 0x46e   : > { %8585 = vmatmul.mubr.bf16.gmra.mrb[96].mxu0 %v1348_v52 }
 0x46f   : > { %8588 = vmatprep.mubr.msk.bf16.mxu0 %vm9842_vm0, %v11133_v39 }
 0x476   : > { %8589 = vmatmul.mubr.bf16.gmra.mrb[100].mxu0 %v1349_v15  ;;  %v3752_v15 = vpop.permute.xlu1 %3751 }
 0x477   : > { %8592 = vmatprep.mubr.msk.bf16.mxu0 %vm9842_vm0, %v11133_v39 }
 0x47e   : > { %8593 = vmatmul.mubr.bf16.gmra.mrb[104].mxu0 %v1350_v61 }
 0x481   : > { %v3227_v28 = vpop.f32.mrb[0].mxu0 }
 0x482   : > { %v3448_v49 = vmul.f32 %v11198_v6, %v3227_v28  ;;  %v8490_v4 = vpop.f32.mrb[1].mxu0 }
 0x483   : > { %v3230_v11 = vpop.f32.mrb[2].mxu0 }
 0x484   : > { %v3508_v22 = vadd.f32 %v11203_v16, %v3448_v49  ;;  %v3449_v38 = vmul.f32 %v11198_v6, %v3230_v11  ;;  %v8491_v50 = vpop.f32.mrb[3].mxu0 }
 0x486   : > { %v3562_v10 = vmul.f32 0.01, %v3508_v22  ;;  %v3509_v13 = vadd.f32 %v11203_v16, %v3449_v38 }
 0x488   : > { %v3616_v12 = vmax.f32 %v3508_v22, %v3562_v10  ;;  %v3563_v34 = vmul.f32 0.01, %v3509_v13 }
 0x489   : > { %v3235_v2 = vpop.f32.mrb[4].mxu0 }
 0x48a   : > { %v3994_v8 = vmul.f32 %v3727_v7, %v3616_v12  ;;  %v3617_v3 = vmax.f32 %v3509_v13, %v3563_v34  ;;  %v3450_v23 = vmul.f32 %v11198_v6, %v3235_v2  ;;  %v8494_v31 = vpop.f32.mrb[5].mxu0  ;;  %v3757_v2 = vpop.permute.xlu0 %3756 }
 0x48b   : > { %v3238_v27 = vpop.f32.mrb[6].mxu0 }
 0x48c   : > { %4048 = vst [vmem:[#allocation3 + $0x20] sm:$0xff] %v3994_v8  ;;  %v3995_v43 = vmul.f32 %v3732_v14, %v3617_v3  ;;  %v3510_v59 = vadd.f32 %v11203_v16, %v3450_v23  ;;  %v3451_v0 = vmul.f32 %v11198_v6, %v3238_v27  ;;  %v8495_v25 = vpop.f32.mrb[7].mxu0  ;;  %v4269_v53 = vpack.c.bf16 %v3994_v8, %v11133_v39  ;;  %v3762_v27 = vpop.permute.xlu1 %3761 }
 0x48e   : > { %4049 = vst [vmem:[#allocation3 + $0x28] sm:$0xff] %v3995_v43  ;;  %v3564_v36 = vmul.f32 0.01, %v3510_v59  ;;  %v3511_v48 = vadd.f32 %v11203_v16, %v3451_v0  ;;  %5938 = vmatprep.mubr.bf16.mxu1 %v4269_v53 }
 0x490   : > { %v3618_v18 = vmax.f32 %v3510_v59, %v3564_v36  ;;  %v3565_v37 = vmul.f32 0.01, %v3511_v48 }
 0x491   : > { %v3243_v9 = vpop.f32.mrb[8].mxu0 }
 0x492   : > { %v3996_v17 = vmul.f32 %v3737_v60, %v3618_v18  ;;  %v3619_v33 = vmax.f32 %v3511_v48, %v3565_v37  ;;  %v3452_v20 = vmul.f32 %v11198_v6, %v3243_v9  ;;  %v8498_v42 = vpop.f32.mrb[9].mxu0 }
 0x493   : > { %v3246_v26 = vpop.f32.mrb[10].mxu0  ;;  %v4109_v24 = vld [vmem:[#allocation3 + $0x1f] sm:$0xff] }
 0x494   : > { %4050 = vst [vmem:[#allocation3 + $0x30] sm:$0xff] %v3996_v17  ;;  %v3997_v39 = vmul.f32 %v3742_v58, %v3619_v33  ;;  %v3512_v62 = vadd.f32 %v11203_v16, %v3452_v20  ;;  %v3453_v29 = vmul.f32 %v11198_v6, %v3246_v26  ;;  %v8499_v19 = vpop.f32.mrb[11].mxu0  ;;  %v4161_v45 = vpack.c.bf16 %v4109_v24, %v4108_v54 }
 0x495   : > { %v4270_v21 = vpack.c.bf16 %v3996_v17, %v3995_v43  ;;  %v4110_v56 = vld [vmem:[#allocation3 + $0x27] sm:$0xff] }
 0x496   : > { %4051 = vst [vmem:[#allocation3 + $0x38] sm:$0xff] %v3997_v39  ;;  %v3566_v40 = vmul.f32 0.01, %v3512_v62  ;;  %v3513_v5 = vadd.f32 %v11203_v16, %v3453_v29  ;;  %5939 = vmatmul.mubr.bf16.gmra.mrb[4].mxu1 %v4161_v45  ;;  %v11231_v38 = vld [vmem:[#allocation3 + $0x21] sm:$0xff] }
 0x497   : > { %5946 = vmatprep.mubr.bf16.mxu1 %v4270_v21  ;;  %12530 = vst [vmem:[#allocation6_spill] sm:$0xff] %v11231_v38  ;;  %v3772_v21 = vpop.permute.xlu1 %3771 }
 0x498   : > { %v3620_v32 = vmax.f32 %v3512_v62, %v3566_v40  ;;  %v3567_v44 = vmul.f32 0.01, %v3513_v5 }
 0x499   : > { %v3251_v51 = vpop.f32.mrb[12].mxu0 }
 0x49a   : > { %v3998_v52 = vmul.f32 %v3747_v35, %v3620_v32  ;;  %v3621_v63 = vmax.f32 %v3513_v5, %v3567_v44  ;;  %v3454_v57 = vmul.f32 %v11198_v6, %v3251_v51  ;;  %v8502_v30 = vpop.f32.mrb[13].mxu0 }
 0x49b   : > { %v3254_v47 = vpop.f32.mrb[14].mxu0  ;;  %v4111_v55 = vld [vmem:[#allocation3 + $0x2f] sm:$0xff] }
 0x49c   : > { %v11227_v61 = vld [vmem:[#allocation3 + $0x29] sm:$0xff]  ;;  %4052 = vst [vmem:[#allocation3 + $0x40] sm:$0xff] %v3998_v52  ;;  %v3999_v28 = vmul.f32 %v3752_v15, %v3621_v63  ;;  %v3514_v49 = vadd.f32 %v11203_v16, %v3454_v57  ;;  %v3455_v4 = vmul.f32 %v11198_v6, %v3254_v47  ;;  %v8503_v11 = vpop.f32.mrb[15].mxu0  ;;  %v4162_v22 = vpack.c.bf16 %v4111_v55, %v4110_v56 }
 0x49d   : > { %12529 = vst [vmem:[#allocation5_spill] sm:$0xff] %v11227_v61  ;;  %v4271_v50 = vpack.c.bf16 %v3998_v52, %v3997_v39  ;;  %v4112_v59 = vld [vmem:[#allocation3 + $0x37] sm:$0xff]  ;;  %v3767_v39 = vpop.permute.xlu0 %3766  ;;  %v9723_v11 = vld [vmem:[%s12416_s1 + $0x318] sm:$0xff]  }
 0x49e   : > { %4053 = vst [vmem:[#allocation3 + $0x48] sm:$0xff] %v3999_v28  ;;  %v3568_v10 = vmul.f32 0.01, %v3514_v49  ;;  %v3515_v13 = vadd.f32 %v11203_v16, %v3455_v4  ;;  %5947 = vmatmul.mubr.bf16.gmra.mrb[8].mxu1 %v4162_v22  ;;  %v11245_v37 = vld [vmem:[#allocation3 + $0x31] sm:$0xff] }
 0x49f   : > { %5954 = vmatprep.mubr.bf16.mxu1 %v4271_v50  ;;  %12532 = vst [vmem:[#allocation8_spill] sm:$0xff] %v11245_v37  ;;  %v11247_v9 = vld [vmem:[#allocation3 + $0x38] sm:$0xff]  ;;  %6170 = vmatpush1.bf16.msra.mxu1 %v9723_v11  ;;  %v9724_v11 = vld [vmem:[%s12416_s1 + $0x320] sm:$0xff]  }
 0x4a0   : > { %v3622_v12 = vmax.f32 %v3514_v49, %v3568_v10  ;;  %v3569_v34 = vmul.f32 0.01, %v3515_v13  ;;  %12533 = vst [vmem:[#allocation9_spill] sm:$0xff] %v11247_v9  ;;  %6171 = vmatprep.subr.bf16.mxu1 %v12421_v1 }
 0x4a1   : > { %v3259_v8 = vpop.f32.mrb[16].mxu0  ;;  %v3777_v10 = vpop.permute.xlu0 %3776 }
 0x4a2   : > { %v4000_v3 = vmul.f32 %v3757_v2, %v3622_v12  ;;  %v3623_v23 = vmax.f32 %v3515_v13, %v3569_v34  ;;  %v3456_v31 = vmul.f32 %v11198_v6, %v3259_v8  ;;  %v8506_v14 = vpop.f32.mrb[17].mxu0  ;;  %v3782_v8 = vpop.permute.xlu1 %3781 }
 0x4a3   : > { %v3262_v43 = vpop.f32.mrb[18].mxu0  ;;  %v4113_v0 = vld [vmem:[#allocation3 + $0x3f] sm:$0xff]  ;;  %6172 = vmatpush1.bf16.msra.mxu1 %v9724_v11 }
 0x4a4   : > { %v11241_v25 = vld [vmem:[#allocation3 + $0x39] sm:$0xff]  ;;  %4054 = vst [vmem:[#allocation3 + $0x50] sm:$0xff] %v4000_v3  ;;  %v4001_v53 = vmul.f32 %v3762_v27, %v3623_v23  ;;  %v3516_v60 = vadd.f32 %v11203_v16, %v3456_v31  ;;  %v3457_v36 = vmul.f32 %v11198_v6, %v3262_v43  ;;  %v8507_v48 = vpop.f32.mrb[19].mxu0  ;;  %v4163_v18 = vpack.c.bf16 %v4113_v0, %v4112_v59 }
 0x4a5   : > { %12531 = vst [vmem:[#allocation7_spill] sm:$0xff] %v11241_v25  ;;  %v11249_v54 = vld [vmem:[#allocation3 + $0x40] sm:$0xff]  ;;  %v4272_v17 = vpack.c.bf16 %v4000_v3, %v3999_v28  ;;  %v11263_v15 = vld [vmem:[#allocation3 + $0x48] sm:$0xff]  ;;  %6173 = vmatprep.subr.bf16.mxu1 %v12421_v1 }
 0x4a6   : > { %12534 = vst [vmem:[#allocation10_spill] sm:$0xff] %v11249_v54  ;;  %4055 = vst [vmem:[#allocation3 + $0x58] sm:$0xff] %v4001_v53  ;;  %v3570_v42 = vmul.f32 0.01, %v3516_v60  ;;  %v3517_v58 = vadd.f32 %v11203_v16, %v3457_v36  ;;  %5955 = vmatmul.mubr.bf16.gmra.mrb[12].mxu1 %v4163_v18  ;;  %v4114_v5 = vld [vmem:[#allocation3 + $0x47] sm:$0xff] }
 0x4a7   : > { %5962 = vmatprep.mubr.bf16.mxu1 %v4272_v17  ;;  %v11261_v30 = vld [vmem:[#allocation3 + $0x41] sm:$0xff]  ;;  %12537 = vst [vmem:[#allocation13_spill] sm:$0xff] %v11263_v15 }
 0x4a8   : > { %v3624_v26 = vmax.f32 %v3516_v60, %v3570_v42  ;;  %v3571_v24 = vmul.f32 0.01, %v3517_v58  ;;  %12536 = vst [vmem:[#allocation12_spill] sm:$0xff] %v11261_v30 }
 0x4a9   : > { %v3267_v62 = vpop.f32.mrb[20].mxu0 }
 0x4aa   : > { %v4002_v29 = vmul.f32 %v3767_v39, %v3624_v26  ;;  %v3625_v19 = vmax.f32 %v3517_v58, %v3571_v24  ;;  %v3458_v45 = vmul.f32 %v11198_v6, %v3267_v62  ;;  %v8510_v46 = vpop.f32.mrb[21].mxu0  ;;  %v3787_v62 = vpop.permute.xlu0 %3786 }
 0x4ab   : > { %v3270_v40 = vpop.f32.mrb[22].mxu0  ;;  %v4115_v32 = vld [vmem:[#allocation3 + $0x4f] sm:$0xff] }
 0x4ac   : > { %v11257_v44 = vld [vmem:[#allocation3 + $0x49] sm:$0xff]  ;;  %4056 = vst [vmem:[#allocation3 + $0x60] sm:$0xff] %v4002_v29  ;;  %v4003_v35 = vmul.f32 %v3772_v21, %v3625_v19  ;;  %v3518_v51 = vadd.f32 %v11203_v16, %v3458_v45  ;;  %v3459_v52 = vmul.f32 %v11198_v6, %v3270_v40  ;;  %v8511_v63 = vpop.f32.mrb[23].mxu0  ;;  %v4164_v57 = vpack.c.bf16 %v4115_v32, %v4114_v5  ;;  %v3792_v5 = vpop.permute.xlu1 %3791 }
 0x4ad   : > { %12535 = vst [vmem:[#allocation11_spill] sm:$0xff] %v11257_v44  ;;  %v11265_v47 = vld [vmem:[#allocation3 + $0x50] sm:$0xff]  ;;  %v4273_v56 = vpack.c.bf16 %v4002_v29, %v4001_v53  ;;  %v11283_v36 = vld [vmem:[#allocation3 + $0x58] sm:$0xff] }
 0x4ae   : > { %12538 = vst [vmem:[#allocation14_spill] sm:$0xff] %v11265_v47  ;;  %4057 = vst [vmem:[#allocation3 + $0x68] sm:$0xff] %v4003_v35  ;;  %v3572_v49 = vmul.f32 0.01, %v3518_v51  ;;  %v3519_v4 = vadd.f32 %v11203_v16, %v3459_v52  ;;  %5963 = vmatmul.mubr.bf16.gmra.mrb[16].mxu1 %v4164_v57  ;;  %v4116_v23 = vld [vmem:[#allocation3 + $0x57] sm:$0xff] }
 0x4af   : > { %5970 = vmatprep.mubr.bf16.mxu1 %v4273_v56  ;;  %v11281_v60 = vld [vmem:[#allocation3 + $0x51] sm:$0xff]  ;;  %12541 = vst [vmem:[#allocation17_spill] sm:$0xff] %v11283_v36 }
 0x4b0   : > { %v3626_v22 = vmax.f32 %v3518_v51, %v3572_v49  ;;  %v3573_v50 = vmul.f32 0.01, %v3519_v4  ;;  %12540 = vst [vmem:[#allocation16_spill] sm:$0xff] %v11281_v60 }
 0x4b1   : > { %v3275_v13 = vpop.f32.mrb[24].mxu0 }
 0x4b2   : > { %v4004_v41 = vmul.f32 %v3777_v10, %v3626_v22  ;;  %v3627_v12 = vmax.f32 %v3519_v4, %v3573_v50  ;;  %v3460_v34 = vmul.f32 %v11198_v6, %v3275_v13  ;;  %v8514_v2 = vpop.f32.mrb[25].mxu0 }
 0x4b3   : > { %v3278_v3 = vpop.f32.mrb[26].mxu0  ;;  %v4117_v31 = vld [vmem:[#allocation3 + $0x5f] sm:$0xff] }
 0x4b4   : > { %v11277_v14 = vld [vmem:[#allocation3 + $0x59] sm:$0xff]  ;;  %4058 = vst [vmem:[#allocation3 + $0x70] sm:$0xff] %v4004_v41  ;;  %v4005_v27 = vmul.f32 %v3782_v8, %v3627_v12  ;;  %v3520_v43 = vadd.f32 %v11203_v16, %v3460_v34  ;;  %v3461_v59 = vmul.f32 %v11198_v6, %v3278_v3  ;;  %v8515_v0 = vpop.f32.mrb[27].mxu0  ;;  %v4165_v53 = vpack.c.bf16 %v4117_v31, %v4116_v23  ;;  %v3797_v3 = vpop.permute.xlu0 %3796 }
 0x4b5   : > { %12539 = vst [vmem:[#allocation15_spill] sm:$0xff] %v11277_v14  ;;  %v11285_v48 = vld [vmem:[#allocation3 + $0x60] sm:$0xff]  ;;  %v4274_v18 = vpack.c.bf16 %v4004_v41, %v4003_v35  ;;  %v11302_v22 = vld [vmem:[#allocation3 + $0x68] sm:$0xff]  ;;  %v3802_v0 = vpop.permute.xlu1 %3801 }
 0x4b6   : > { %12542 = vst [vmem:[#allocation18_spill] sm:$0xff] %v11285_v48  ;;  %4059 = vst [vmem:[#allocation3 + $0x78] sm:$0xff] %v4005_v27  ;;  %v3574_v58 = vmul.f32 0.01, %v3520_v43  ;;  %v3521_v26 = vadd.f32 %v11203_v16, %v3461_v59  ;;  %5971 = vmatmul.mubr.bf16.gmra.mrb[20].mxu1 %v4165_v53  ;;  %v4118_v40 = vld [vmem:[#allocation3 + $0x67] sm:$0xff] }
 0x4b7   : > { %5978 = vmatprep.mubr.bf16.mxu1 %v4274_v18  ;;  %v11293_v51 = vld [vmem:[#allocation3 + $0x61] sm:$0xff]  ;;  %12545 = vst [vmem:[#allocation21_spill] sm:$0xff] %v11302_v22 }
 0x4b8   : > { %v3628_v24 = vmax.f32 %v3520_v43, %v3574_v58  ;;  %v3575_v39 = vmul.f32 0.01, %v3521_v26  ;;  %12543 = vst [vmem:[#allocation19_spill] sm:$0xff] %v11293_v51 }
 0x4b9   : > { %v3283_v29 = vpop.f32.mrb[28].mxu0 }
 0x4ba   : > { %v4006_v19 = vmul.f32 %v3787_v62, %v3628_v24  ;;  %v3629_v45 = vmax.f32 %v3521_v26, %v3575_v39  ;;  %v3462_v46 = vmul.f32 %v11198_v6, %v3283_v29  ;;  %v8518_v21 = vpop.f32.mrb[29].mxu0 }
 0x4bb   : > { %v3286_v32 = vpop.f32.mrb[30].mxu0  ;;  %v4119_v35 = vld [vmem:[#allocation3 + $0x6f] sm:$0xff] }
 0x4bc   : > { %v11295_v52 = vld [vmem:[#allocation3 + $0x69] sm:$0xff]  ;;  %4060 = vst [vmem:[#allocation3 + $0x80] sm:$0xff] %v4006_v19  ;;  %v4007_v63 = vmul.f32 %v3792_v5, %v3629_v45  ;;  %v3522_v57 = vadd.f32 %v11203_v16, %v3462_v46  ;;  %v3463_v56 = vmul.f32 %v11198_v6, %v3286_v32  ;;  %v8519_v49 = vpop.f32.mrb[31].mxu0  ;;  %v4166_v4 = vpack.c.bf16 %v4119_v35, %v4118_v40 }
 0x4bd   : > { %12544 = vst [vmem:[#allocation20_spill] sm:$0xff] %v11295_v52  ;;  %v11304_v50 = vld [vmem:[#allocation3 + $0x70] sm:$0xff]  ;;  %v4275_v10 = vpack.c.bf16 %v4006_v19, %v4005_v27  ;;  %v11319_v46 = vld [vmem:[#allocation3 + $0x78] sm:$0xff] }
 0x4be   : > { %12546 = vst [vmem:[#allocation22_spill] sm:$0xff] %v11304_v50  ;;  %4061 = vst [vmem:[#allocation3 + $0x88] sm:$0xff] %v4007_v63  ;;  %v3576_v12 = vmul.f32 0.01, %v3522_v57  ;;  %v3523_v34 = vadd.f32 %v11203_v16, %v3463_v56  ;;  %5979 = vmatmul.mubr.bf16.gmra.mrb[24].mxu1 %v4166_v4  ;;  %v4120_v18 = vld [vmem:[#allocation3 + $0x77] sm:$0xff] }
 0x4bf   : > { %5986 = vmatprep.mubr.bf16.mxu1 %v4275_v10  ;;  %v11317_v45 = vld [vmem:[#allocation3 + $0x71] sm:$0xff]  ;;  %12549 = vst [vmem:[#allocation25_spill] sm:$0xff] %v11319_v46 }
 0x4c0   : > { %v3630_v2 = vmax.f32 %v3522_v57, %v3576_v12  ;;  %v3577_v8 = vmul.f32 0.01, %v3523_v34  ;;  %12548 = vst [vmem:[#allocation24_spill] sm:$0xff] %v11317_v45  ;;  %v9725_v56 = vld [vmem:[%s12416_s1 + $0x328] sm:$0xff]  }
 0x4c1   : > { %v3291_v23 = vpop.f32.mrb[32].mxu0  ;;  %6174 = vmatpush1.bf16.msra.mxu1 %v9725_v56 }
 0x4c2   : > { %v4008_v31 = vmul.f32 %v3797_v3, %v3630_v2  ;;  %v3631_v27 = vmax.f32 %v3523_v34, %v3577_v8  ;;  %v3464_v43 = vmul.f32 %v11198_v6, %v3291_v23  ;;  %v8522_v59 = vpop.f32.mrb[33].mxu0  ;;  %6175 = vmatprep.subr.bf16.mxu1 %v12421_v1  ;;  %v3812_v8 = vpop.permute.xlu1 %3811 }
 0x4c3   : > { %v3294_v53 = vpop.f32.mrb[34].mxu0  ;;  %v4121_v58 = vld [vmem:[#allocation3 + $0x7f] sm:$0xff] }
 0x4c4   : > { %v11313_v26 = vld [vmem:[#allocation3 + $0x79] sm:$0xff]  ;;  %4062 = vst [vmem:[#allocation3 + $0x90] sm:$0xff] %v4008_v31  ;;  %v4009_v24 = vmul.f32 %v3802_v0, %v3631_v27  ;;  %v3524_v39 = vadd.f32 %v11203_v16, %v3464_v43  ;;  %v3465_v62 = vmul.f32 %v11198_v6, %v3294_v53  ;;  %v8523_v29 = vpop.f32.mrb[35].mxu0  ;;  %v4167_v19 = vpack.c.bf16 %v4121_v58, %v4120_v18 }
 0x4c5   : > { %12547 = vst [vmem:[#allocation23_spill] sm:$0xff] %v11313_v26  ;;  %v11321_v21 = vld [vmem:[#allocation3 + $0x80] sm:$0xff]  ;;  %v4276_v40 = vpack.c.bf16 %v4008_v31, %v4007_v63  ;;  %v3807_v63 = vpop.permute.xlu0 %3806 }
 0x4c6   : > { %12550 = vst [vmem:[#allocation26_spill] sm:$0xff] %v11321_v21  ;;  %4063 = vst [vmem:[#allocation3 + $0x98] sm:$0xff] %v4009_v24  ;;  %v3578_v35 = vmul.f32 0.01, %v3524_v39  ;;  %v3525_v57 = vadd.f32 %v11203_v16, %v3465_v62  ;;  %5987 = vmatmul.mubr.bf16.gmra.mrb[28].mxu1 %v4167_v19  ;;  %v4122_v23 = vld [vmem:[#allocation3 + $0x87] sm:$0xff] }
 0x4c7   : > { %5994 = vmatprep.mubr.bf16.mxu1 %v4276_v40  ;;  %v11337_v58 = vld [vmem:[#allocation3 + $0x81] sm:$0xff] }
 0x4c8   : > { %v3632_v49 = vmax.f32 %v3524_v39, %v3578_v35  ;;  %v3579_v4 = vmul.f32 0.01, %v3525_v57  ;;  %12552 = vst [vmem:[#allocation28_spill] sm:$0xff] %v11337_v58  ;;  %v11339_v39 = vld [vmem:[#allocation3 + $0x88] sm:$0xff] }
 0x4c9   : > { %v3299_v11 = vpop.f32.mrb[36].mxu0  ;;  %12553 = vst [vmem:[#allocation29_spill] sm:$0xff] %v11339_v39 }
 0x4ca   : > { %v4010_v10 = vmul.f32 %v3807_v63, %v3632_v49  ;;  %v3633_v12 = vmax.f32 %v3525_v57, %v3579_v4  ;;  %v3466_v34 = vmul.f32 %v11198_v6, %v3299_v11  ;;  %v8526_v2 = vpop.f32.mrb[37].mxu0  ;;  %v3817_v4 = vpop.permute.xlu0 %3816 }
 0x4cb   : > { %v3302_v3 = vpop.f32.mrb[38].mxu0  ;;  %v4123_v31 = vld [vmem:[#allocation3 + $0x8f] sm:$0xff] }
 0x4cc   : > { %v11333_v27 = vld [vmem:[#allocation3 + $0x89] sm:$0xff]  ;;  %4064 = vst [vmem:[#allocation3 + $0xa0] sm:$0xff] %v4010_v10  ;;  %v4011_v43 = vmul.f32 %v3812_v8, %v3633_v12  ;;  %v3526_v59 = vadd.f32 %v11203_v16, %v3466_v34  ;;  %v3467_v0 = vmul.f32 %v11198_v6, %v3302_v3  ;;  %v8527_v53 = vpop.f32.mrb[39].mxu0  ;;  %v4168_v18 = vpack.c.bf16 %v4123_v31, %v4122_v23  ;;  %v3822_v34 = vpop.permute.xlu1 %3821 }
 0x4cd   : > { %12551 = vst [vmem:[#allocation27_spill] sm:$0xff] %v11333_v27  ;;  %v11341_v62 = vld [vmem:[#allocation3 + $0x90] sm:$0xff]  ;;  %v4277_v29 = vpack.c.bf16 %v4010_v10, %v4009_v24 }
 0x4ce   : > { %12554 = vst [vmem:[#allocation30_spill] sm:$0xff] %v11341_v62  ;;  %4065 = vst [vmem:[#allocation3 + $0xa8] sm:$0xff] %v4011_v43  ;;  %v3580_v35 = vmul.f32 0.01, %v3526_v59  ;;  %v3527_v57 = vadd.f32 %v11203_v16, %v3467_v0  ;;  %5995 = vmatmul.mubr.bf16.gmra.mrb[32].mxu1 %v4168_v18  ;;  %v4124_v8 = vld [vmem:[#allocation3 + $0x97] sm:$0xff] }
 0x4cf   : > { %6002 = vmatprep.mubr.bf16.mxu1 %v4277_v29  ;;  %v11353_v29 = vld [vmem:[#allocation3 + $0x91] sm:$0xff] }
 0x4d0   : > { %v3634_v56 = vmax.f32 %v3526_v59, %v3580_v35  ;;  %v3581_v49 = vmul.f32 0.01, %v3527_v57  ;;  %12556 = vst [vmem:[#allocation32_spill] sm:$0xff] %v11353_v29  ;;  %v11355_v35 = vld [vmem:[#allocation3 + $0x98] sm:$0xff] }
 0x4d1   : > { %v3307_v63 = vpop.f32.mrb[40].mxu0  ;;  %12557 = vst [vmem:[#allocation33_spill] sm:$0xff] %v11355_v35 }
 0x4d2   : > { %v4012_v11 = vmul.f32 %v3817_v4, %v3634_v56  ;;  %v3635_v12 = vmax.f32 %v3527_v57, %v3581_v49  ;;  %v3468_v24 = vmul.f32 %v11198_v6, %v3307_v63  ;;  %v8530_v10 = vpop.f32.mrb[41].mxu0  ;;  %v3832_v4 = vpop.permute.xlu1 %3831 }
 0x4d3   : > { %v3310_v2 = vpop.f32.mrb[42].mxu0  ;;  %v4125_v3 = vld [vmem:[#allocation3 + $0x9f] sm:$0xff] }
 0x4d4   : > { %v11349_v23 = vld [vmem:[#allocation3 + $0x99] sm:$0xff]  ;;  %4066 = vst [vmem:[#allocation3 + $0xb0] sm:$0xff] %v4012_v11  ;;  %v4013_v31 = vmul.f32 %v3822_v34, %v3635_v12  ;;  %v3528_v0 = vadd.f32 %v11203_v16, %v3468_v24  ;;  %v3469_v59 = vmul.f32 %v11198_v6, %v3310_v2  ;;  %v8531_v53 = vpop.f32.mrb[43].mxu0  ;;  %v4169_v18 = vpack.c.bf16 %v4125_v3, %v4124_v8 }
 0x4d5   : > { %12555 = vst [vmem:[#allocation31_spill] sm:$0xff] %v11349_v23  ;;  %v11357_v57 = vld [vmem:[#allocation3 + $0xa0] sm:$0xff]  ;;  %v4278_v56 = vpack.c.bf16 %v4012_v11, %v4011_v43  ;;  %v3827_v43 = vpop.permute.xlu0 %3826 }
 0x4d6   : > { %12558 = vst [vmem:[#allocation34_spill] sm:$0xff] %v11357_v57  ;;  %4067 = vst [vmem:[#allocation3 + $0xb8] sm:$0xff] %v4013_v31  ;;  %v3582_v63 = vmul.f32 0.01, %v3528_v0  ;;  %v3529_v12 = vadd.f32 %v11203_v16, %v3469_v59  ;;  %6003 = vmatmul.mubr.bf16.gmra.mrb[36].mxu1 %v4169_v18  ;;  %v9726_v24 = vld [vmem:[%s12416_s1 + $0x330] sm:$0xff]  }
 0x4d7   : > { %6010 = vmatprep.mubr.bf16.mxu1 %v4278_v56  ;;  %6176 = vmatpush1.bf16.msra.mxu1 %v9726_v24  ;;  %v4126_v18 = vld [vmem:[#allocation3 + $0xa7] sm:$0xff] }
 0x4d8   : > { %v3636_v10 = vmax.f32 %v3528_v0, %v3582_v63  ;;  %v3583_v34 = vmul.f32 0.01, %v3529_v12  ;;  %6177 = vmatprep.subr.bf16.mxu1 %v12421_v1  ;;  %v11373_v42 = vld [vmem:[#allocation3 + $0xa1] sm:$0xff] }
 0x4d9   : > { %v3315_v11 = vpop.f32.mrb[44].mxu0  ;;  %12560 = vst [vmem:[#allocation36_spill] sm:$0xff] %v11373_v42 }
 0x4da   : > { %v4014_v2 = vmul.f32 %v3827_v43, %v3636_v10  ;;  %v3637_v8 = vmax.f32 %v3529_v12, %v3583_v34  ;;  %v3470_v3 = vmul.f32 %v11198_v6, %v3315_v11  ;;  %v8534_v53 = vpop.f32.mrb[45].mxu0  ;;  %v11375_v12 = vld [vmem:[#allocation3 + $0xa8] sm:$0xff] }
 0x4db   : > { %v3318_v59 = vpop.f32.mrb[46].mxu0  ;;  %v4127_v40 = vld [vmem:[#allocation3 + $0xaf] sm:$0xff]  ;;  %12561 = vst [vmem:[#allocation37_spill] sm:$0xff] %v11375_v12 }
 0x4dc   : > { %v11369_v32 = vld [vmem:[#allocation3 + $0xa9] sm:$0xff]  ;;  %4068 = vst [vmem:[#allocation3 + $0xc0] sm:$0xff] %v4014_v2  ;;  %v4015_v56 = vmul.f32 %v3832_v4, %v3637_v8  ;;  %v3530_v0 = vadd.f32 %v11203_v16, %v3470_v3  ;;  %v3471_v63 = vmul.f32 %v11198_v6, %v3318_v59  ;;  %v8535_v24 = vpop.f32.mrb[47].mxu0  ;;  %v4170_v41 = vpack.c.bf16 %v4127_v40, %v4126_v18 }
 0x4dd   : > { %12559 = vst [vmem:[#allocation35_spill] sm:$0xff] %v11369_v32  ;;  %v11377_v10 = vld [vmem:[#allocation3 + $0xb0] sm:$0xff]  ;;  %v4279_v34 = vpack.c.bf16 %v4014_v2, %v4013_v31  ;;  %v9727_v40 = vld [vmem:[%s12416_s1 + $0x338] sm:$0xff]   ;;  %v3837_v31 = vpop.permute.xlu0 %3836 }
 0x4de   : > { %12562 = vst [vmem:[#allocation38_spill] sm:$0xff] %v11377_v10  ;;  %4069 = vst [vmem:[#allocation3 + $0xc8] sm:$0xff] %v4015_v56  ;;  %v3584_v4 = vmul.f32 0.01, %v3530_v0  ;;  %v3531_v8 = vadd.f32 %v11203_v16, %v3471_v63  ;;  %6011 = vmatmul.mubr.bf16.gmra.mrb[40].mxu1 %v4170_v41  ;;  %v4128_v28 = vld [vmem:[#allocation3 + $0xb7] sm:$0xff]  ;;  %v3842_v63 = vpop.permute.xlu1 %3841 }
 0x4df   : > { %6018 = vmatprep.mubr.bf16.mxu1 %v4279_v34  ;;  %6178 = vmatpush1.bf16.msra.mxu1 %v9727_v40 }
 0x4e0   : > { %v3638_v3 = vmax.f32 %v3530_v0, %v3584_v4  ;;  %v3585_v53 = vmul.f32 0.01, %v3531_v8  ;;  %6396 = vmatprep.subr.bf16.mxu1 %v12421_v1 }
 0x4e1   : > { %v3323_v2 = vpop.f32.mrb[48].mxu0 }
 0x4e2   : > { %v4016_v59 = vmul.f32 %v3837_v31, %v3638_v3  ;;  %v3639_v18 = vmax.f32 %v3531_v8, %v3585_v53  ;;  %v3472_v24 = vmul.f32 %v11198_v6, %v3323_v2  ;;  %v8538_v11 = vpop.f32.mrb[49].mxu0  ;;  %v11398_v53 = vld [vmem:[#allocation3 + $0xb1] sm:$0xff]  ;;  %v3852_v17 = vpop.permute.xlu1 %3851 }
 0x4e3   : > { %v3326_v41 = vpop.f32.mrb[50].mxu0  ;;  %v11389_v20 = vld [vmem:[#allocation3 + $0xbf] sm:$0xff]  ;;  %12565 = vst [vmem:[#allocation41_spill] sm:$0xff] %v11398_v53 }
 0x4e4   : > { %v11391_v43 = vld [vmem:[#allocation3 + $0xb9] sm:$0xff]  ;;  %4070 = vst [vmem:[#allocation3 + $0xd0] sm:$0xff] %v4016_v59  ;;  %v4017_v0 = vmul.f32 %v3842_v63, %v3639_v18  ;;  %v3532_v4 = vadd.f32 %v11203_v16, %v3472_v24  ;;  %v3473_v40 = vmul.f32 %v11198_v6, %v3326_v41  ;;  %v8539_v3 = vpop.f32.mrb[51].mxu0  ;;  %v4171_v8 = vpack.c.bf16 %v11389_v20, %v4128_v28 }
 0x4e5   : > { %12563 = vst [vmem:[#allocation39_spill] sm:$0xff] %v11391_v43  ;;  %v11393_v34 = vld [vmem:[#allocation3 + $0xc0] sm:$0xff]  ;;  %v11400_v11 = vld [vmem:[#allocation3 + $0xb8] sm:$0xff]  ;;  %v4280_v31 = vpack.c.bf16 %v4016_v59, %v4015_v56  ;;  %v3847_v56 = vpop.permute.xlu0 %3846 }
 0x4e6   : > { %12564 = vst [vmem:[#allocation40_spill] sm:$0xff] %v11393_v34  ;;  %12566 = vst [vmem:[#allocation42_spill] sm:$0xff] %v11400_v11  ;;  %v11402_v2 = vld [vmem:[#allocation3 + $0xc7] sm:$0xff]  ;;  %v3586_v24 = vmul.f32 0.01, %v3532_v4  ;;  %v3533_v63 = vadd.f32 %v11203_v16, %v3473_v40  ;;  %6019 = vmatmul.mubr.bf16.gmra.mrb[44].mxu1 %v4171_v8  ;;  %v3862_v34 = vpop.permute.xlu1 %3861 }
 0x4e7   : > { %4071 = vst [vmem:[#allocation3 + $0xd8] sm:$0xff] %v4017_v0  ;;  %6026 = vmatprep.mubr.bf16.mxu1 %v4280_v31 }
 0x4e8   : > { %v3640_v41 = vmax.f32 %v3532_v4, %v3586_v24  ;;  %v3587_v3 = vmul.f32 0.01, %v3533_v63 }
 0x4e9   : > { %v3331_v59 = vpop.f32.mrb[52].mxu0 }
 0x4ea   : > { %v4018_v19 = vmul.f32 %v3847_v56, %v3640_v41  ;;  %v3641_v5 = vmax.f32 %v3533_v63, %v3587_v3  ;;  %v3474_v49 = vmul.f32 %v11198_v6, %v3331_v59  ;;  %v8542_v13 = vpop.f32.mrb[53].mxu0  ;;  %v11422_v41 = vld [vmem:[#allocation3 + $0xc1] sm:$0xff]  ;;  %v3872_v57 = vpop.permute.xlu1 %3871 }
 0x4eb   : > { %v3334_v18 = vpop.f32.mrb[54].mxu0  ;;  %v11412_v55 = vld [vmem:[#allocation3 + $0xcf] sm:$0xff]  ;;  %12569 = vst [vmem:[#allocation45_spill] sm:$0xff] %v11422_v41 }
 0x4ec   : > { %v11414_v33 = vld [vmem:[#allocation3 + $0xc9] sm:$0xff]  ;;  %4072 = vst [vmem:[#allocation3 + $0xe0] sm:$0xff] %v4018_v19  ;;  %v4019_v8 = vmul.f32 %v3852_v17, %v3641_v5  ;;  %v3534_v4 = vadd.f32 %v11203_v16, %v3474_v49  ;;  %v3475_v31 = vmul.f32 %v11198_v6, %v3334_v18  ;;  %v8543_v24 = vpop.f32.mrb[55].mxu0  ;;  %v4172_v63 = vpack.c.bf16 %v11412_v55, %v11402_v2 }
 0x4ed   : > { %12567 = vst [vmem:[#allocation43_spill] sm:$0xff] %v11414_v33  ;;  %v11416_v40 = vld [vmem:[#allocation3 + $0xd0] sm:$0xff]  ;;  %v11424_v13 = vld [vmem:[#allocation3 + $0xc8] sm:$0xff]  ;;  %v4281_v3 = vpack.c.bf16 %v4018_v19, %v4017_v0  ;;  %v3857_v19 = vpop.permute.xlu0 %3856 }
 0x4ee   : > { %12568 = vst [vmem:[#allocation44_spill] sm:$0xff] %v11416_v40  ;;  %12570 = vst [vmem:[#allocation46_spill] sm:$0xff] %v11424_v13  ;;  %v11426_v56 = vld [vmem:[#allocation3 + $0xd7] sm:$0xff]  ;;  %v3588_v5 = vmul.f32 0.01, %v3534_v4  ;;  %v3535_v49 = vadd.f32 %v11203_v16, %v3475_v31  ;;  %6027 = vmatmul.mubr.bf16.gmra.mrb[48].mxu1 %v4172_v63  ;;  %v3882_v21 = vpop.permute.xlu1 %3881 }
 0x4ef   : > { %4073 = vst [vmem:[#allocation3 + $0xe8] sm:$0xff] %v4019_v8  ;;  %6034 = vmatprep.mubr.bf16.mxu1 %v4281_v3 }
 0x4f0   : > { %v3642_v24 = vmax.f32 %v3534_v4, %v3588_v5  ;;  %v3589_v7 = vmul.f32 0.01, %v3535_v49 }
 0x4f1   : > { %v3339_v0 = vpop.f32.mrb[56].mxu0 }
 0x4f2   : > { %v4020_v28 = vmul.f32 %v3857_v19, %v3642_v24  ;;  %v3643_v1 = vmax.f32 %v3535_v49, %v3589_v7  ;;  %v3476_v59 = vmul.f32 %v11198_v6, %v3339_v0  ;;  %v8546_v11 = vpop.f32.mrb[57].mxu0  ;;  %v11446_v49 = vld [vmem:[#allocation3 + $0xd1] sm:$0xff]  ;;  %v3892_v48 = vpop.permute.xlu1 %3891 }
 0x4f3   : > { %v3342_v17 = vpop.f32.mrb[58].mxu0  ;;  %v11436_v13 = vld [vmem:[#allocation3 + $0xdf] sm:$0xff]  ;;  %12573 = vst [vmem:[#allocation49_spill] sm:$0xff] %v11446_v49 }
 0x4f4   : > { %v11438_v40 = vld [vmem:[#allocation3 + $0xd9] sm:$0xff]  ;;  %4074 = vst [vmem:[#allocation3 + $0xf0] sm:$0xff] %v4020_v28  ;;  %v4021_v63 = vmul.f32 %v3862_v34, %v3643_v1  ;;  %v3536_v4 = vadd.f32 %v11203_v16, %v3476_v59  ;;  %v3477_v3 = vmul.f32 %v11198_v6, %v3342_v17  ;;  %v8547_v5 = vpop.f32.mrb[59].mxu0  ;;  %v4173_v7 = vpack.c.bf16 %v11436_v13, %v11426_v56 }
 0x4f5   : > { %12571 = vst [vmem:[#allocation47_spill] sm:$0xff] %v11438_v40  ;;  %v11440_v31 = vld [vmem:[#allocation3 + $0xe0] sm:$0xff]  ;;  %v11448_v11 = vld [vmem:[#allocation3 + $0xd8] sm:$0xff]  ;;  %v4282_v24 = vpack.c.bf16 %v4020_v28, %v4019_v8  ;;  %v3867_v28 = vpop.permute.xlu0 %3866 }
 0x4f6   : > { %12572 = vst [vmem:[#allocation48_spill] sm:$0xff] %v11440_v31  ;;  %12574 = vst [vmem:[#allocation50_spill] sm:$0xff] %v11448_v11  ;;  %v11450_v19 = vld [vmem:[#allocation3 + $0xe7] sm:$0xff]  ;;  %v3590_v34 = vmul.f32 0.01, %v3536_v4  ;;  %v3537_v59 = vadd.f32 %v11203_v16, %v3477_v3  ;;  %6035 = vmatmul.mubr.bf16.gmra.mrb[52].mxu1 %v4173_v7  ;;  %v3902_v54 = vpop.permute.xlu1 %3901 }
 0x4f7   : > { %4075 = vst [vmem:[#allocation3 + $0xf8] sm:$0xff] %v4021_v63  ;;  %6042 = vmatprep.mubr.bf16.mxu1 %v4282_v24 }
 0x4f8   : > { %v3644_v5 = vmax.f32 %v3536_v4, %v3590_v34  ;;  %v3591_v18 = vmul.f32 0.01, %v3537_v59 }
 0x4f9   : > { %v3347_v8 = vpop.f32.mrb[60].mxu0 }
 0x4fa   : > { %v4022_v12 = vmul.f32 %v3867_v28, %v3644_v5  ;;  %v3645_v10 = vmax.f32 %v3537_v59, %v3591_v18  ;;  %v3478_v0 = vmul.f32 %v11198_v6, %v3347_v8  ;;  %v8550_v35 = vpop.f32.mrb[61].mxu0  ;;  %v11470_v59 = vld [vmem:[#allocation3 + $0xe1] sm:$0xff]  ;;  %v3912_v33 = vpop.permute.xlu1 %3911 }
 0x4fb   : > { %v3350_v1 = vpop.f32.mrb[62].mxu0  ;;  %v11460_v11 = vld [vmem:[#allocation3 + $0xef] sm:$0xff] }
 0x4fc   : > { %v11462_v31 = vld [vmem:[#allocation3 + $0xe9] sm:$0xff]  ;;  %4076 = vst [vmem:[#allocation3 + $0x100] sm:$0xff] %v4022_v12  ;;  %v4023_v7 = vmul.f32 %v3872_v57, %v3645_v10  ;;  %v3538_v4 = vadd.f32 %v11203_v16, %v3478_v0  ;;  %v3479_v24 = vmul.f32 %v11198_v6, %v3350_v1  ;;  %v8551_v34 = vpop.f32.mrb[63].mxu0  ;;  %v4174_v18 = vpack.c.bf16 %v11460_v11, %v11450_v19 }
 0x4fd   : > { %v11464_v3 = vld [vmem:[#allocation3 + $0xf0] sm:$0xff]  ;;  %v11472_v35 = vld [vmem:[#allocation3 + $0xe8] sm:$0xff]  ;;  %v4283_v5 = vpack.c.bf16 %v4022_v12, %v4021_v63  ;;  %v3877_v12 = vpop.permute.xlu0 %3876 }
 0x4fe   : > { %12575 = vst [vmem:[#allocation51_spill] sm:$0xff] %v11464_v3  ;;  %12576 = vst [vmem:[#allocation52_spill] sm:$0xff] %v11472_v35  ;;  %v11474_v28 = vld [vmem:[#allocation3 + $0xf7] sm:$0xff]  ;;  %v3592_v10 = vmul.f32 0.01, %v3538_v4  ;;  %v3539_v0 = vadd.f32 %v11203_v16, %v3479_v24  ;;  %6043 = vmatmul.mubr.bf16.gmra.mrb[56].mxu1 %v4174_v18  ;;  %v3922_v32 = vpop.permute.xlu1 %3921 }
 0x4ff   : > { %4077 = vst [vmem:[#allocation3 + $0x108] sm:$0xff] %v4023_v7  ;;  %6050 = vmatprep.mubr.bf16.mxu1 %v4283_v5 }
 0x500   : > { %v3646_v34 = vmax.f32 %v3538_v4, %v3592_v10  ;;  %v3593_v17 = vmul.f32 0.01, %v3539_v0 }
 0x501   : > { %v3355_v63 = vpop.f32.mrb[64].mxu0 }
 0x502   : > { %v4024_v39 = vmul.f32 %v3877_v12, %v3646_v34  ;;  %v3647_v62 = vmax.f32 %v3539_v0, %v3593_v17  ;;  %v3480_v8 = vmul.f32 %v11198_v6, %v3355_v63  ;;  %v8554_v46 = vpop.f32.mrb[65].mxu0  ;;  %v11494_v0 = vld [vmem:[#allocation3 + $0xf1] sm:$0xff]  ;;  %v3932_v27 = vpop.permute.xlu1 %3931 }
 0x503   : > { %v3358_v57 = vpop.f32.mrb[66].mxu0  ;;  %v11484_v35 = vld [vmem:[#allocation3 + $0xff] sm:$0xff] }
 0x504   : > { %v11486_v3 = vld [vmem:[#allocation3 + $0xf9] sm:$0xff]  ;;  %4078 = vst [vmem:[#allocation3 + $0x110] sm:$0xff] %v4024_v39  ;;  %v4025_v18 = vmul.f32 %v3882_v21, %v3647_v62  ;;  %v3540_v4 = vadd.f32 %v11203_v16, %v3480_v8  ;;  %v3481_v5 = vmul.f32 %v11198_v6, %v3358_v57  ;;  %v8555_v10 = vpop.f32.mrb[67].mxu0  ;;  %v4175_v17 = vpack.c.bf16 %v11484_v35, %v11474_v28 }
 0x505   : > { %v11488_v24 = vld [vmem:[#allocation3 + $0x100] sm:$0xff]  ;;  %v11496_v46 = vld [vmem:[#allocation3 + $0xf8] sm:$0xff]  ;;  %v4284_v34 = vpack.c.bf16 %v4024_v39, %v4023_v7  ;;  %v3887_v39 = vpop.permute.xlu0 %3886 }
 0x506   : > { %12577 = vst [vmem:[#allocation53_spill] sm:$0xff] %v11488_v24  ;;  %12578 = vst [vmem:[#allocation54_spill] sm:$0xff] %v11496_v46  ;;  %v11498_v12 = vld [vmem:[#allocation3 + $0x107] sm:$0xff]  ;;  %v3594_v62 = vmul.f32 0.01, %v3540_v4  ;;  %v3541_v8 = vadd.f32 %v11203_v16, %v3481_v5  ;;  %6051 = vmatmul.mubr.bf16.gmra.mrb[60].mxu1 %v4175_v17  ;;  %v3942_v52 = vpop.permute.xlu1 %3941 }
 0x507   : > { %4079 = vst [vmem:[#allocation3 + $0x118] sm:$0xff] %v4025_v18  ;;  %6058 = vmatprep.mubr.bf16.mxu1 %v4284_v34 }
 0x508   : > { %v3648_v10 = vmax.f32 %v3540_v4, %v3594_v62  ;;  %v3595_v1 = vmul.f32 0.01, %v3541_v8  ;;  %v11517_v4 = vld [vmem:[%s12418_s3] ss:$0 sm:$0xff]  ;;  %v11528_v62 = vld [vmem:[#allocation3 + $0x101] sm:$0xff] }
 0x509   : > { %v3363_v7 = vpop.f32.mrb[68].mxu0 }
 0x50a   : > { %v4026_v22 = vmul.f32 %v3887_v39, %v3648_v10  ;;  %v3649_v50 = vmax.f32 %v3541_v8, %v3595_v1  ;;  %v3482_v63 = vmul.f32 %v11198_v6, %v3363_v7  ;;  %v8558_v36 = vpop.f32.mrb[69].mxu0  ;;  %v11523_v6 = vld [vmem:[%s12417_s2] ss:$0 sm:$0xff]  ;;  %v3952_v44 = vpop.permute.xlu1 %3951 }
 0x50b   : > { %v3366_v21 = vpop.f32.mrb[70].mxu0  ;;  %v11508_v46 = vld [vmem:[#allocation3 + $0x10f] sm:$0xff] }
 0x50c   : > { %v11510_v24 = vld [vmem:[#allocation3 + $0x109] sm:$0xff]  ;;  %4080 = vst [vmem:[#allocation3 + $0x120] sm:$0xff] %v4026_v22  ;;  %v4027_v5 = vmul.f32 %v3892_v48, %v3649_v50  ;;  %v3542_v1 = vadd.f32 %v11517_v4, %v3482_v63  ;;  %v3483_v36 = vmul.f32 %v11523_v6, %v3366_v21  ;;  %v8559_v17 = vpop.f32.mrb[71].mxu0  ;;  %v4176_v34 = vpack.c.bf16 %v11508_v46, %v11498_v12 }
 0x50d   : > { %v11512_v16 = vld [vmem:[#allocation3 + $0x110] sm:$0xff]  ;;  %v11530_v48 = vld [vmem:[#allocation3 + $0x108] sm:$0xff]  ;;  %v4285_v50 = vpack.c.bf16 %v4026_v22, %v4025_v18  ;;  %v3897_v22 = vpop.permute.xlu0 %3896 }
 0x50e   : > { %12579 = vst [vmem:[#allocation55_spill] sm:$0xff] %v11512_v16  ;;  %12580 = vst [vmem:[#allocation56_spill] sm:$0xff] %v11530_v48  ;;  %v11532_v8 = vld [vmem:[#allocation3 + $0x117] sm:$0xff]  ;;  %v3596_v39 = vmul.f32 0.01, %v3542_v1  ;;  %v3543_v21 = vadd.f32 %v11517_v4, %v3483_v36  ;;  %6059 = vmatmul.mubr.bf16.gmra.mrb[64].mxu1 %v4176_v34  ;;  %v3962_v61 = vpop.permute.xlu1 %3961 }
 0x50f   : > { %4081 = vst [vmem:[#allocation3 + $0x128] sm:$0xff] %v4027_v5  ;;  %6066 = vmatprep.mubr.bf16.mxu1 %v4285_v50 }
 0x510   : > { %v3650_v17 = vmax.f32 %v3542_v1, %v3596_v39  ;;  %v3597_v57 = vmul.f32 0.01, %v3543_v21 }
 0x511   : > { %v3371_v18 = vpop.f32.mrb[72].mxu0 }
 0x512   : > { %v4028_v15 = vmul.f32 %v3897_v22, %v3650_v17  ;;  %v3651_v47 = vmax.f32 %v3543_v21, %v3597_v57  ;;  %v3484_v63 = vmul.f32 %v11523_v6, %v3371_v18  ;;  %v8562_v9 = vpop.f32.mrb[73].mxu0  ;;  %v11552_v21 = vld [vmem:[#allocation3 + $0x111] sm:$0xff] }
 0x513   : > { %v3374_v10 = vpop.f32.mrb[74].mxu0  ;;  %v11542_v48 = vld [vmem:[#allocation3 + $0x11f] sm:$0xff] }
 0x514   : > { %v11544_v16 = vld [vmem:[#allocation3 + $0x119] sm:$0xff]  ;;  %4082 = vst [vmem:[#allocation3 + $0x130] sm:$0xff] %v4028_v15  ;;  %v4029_v34 = vmul.f32 %v3902_v54, %v3651_v47  ;;  %v3544_v1 = vadd.f32 %v11517_v4, %v3484_v63  ;;  %v3485_v50 = vmul.f32 %v11523_v6, %v3374_v10  ;;  %v8563_v39 = vpop.f32.mrb[75].mxu0  ;;  %v4177_v57 = vpack.c.bf16 %v11542_v48, %v11532_v8 }
 0x515   : > { %v11546_v36 = vld [vmem:[#allocation3 + $0x120] sm:$0xff]  ;;  %v11554_v9 = vld [vmem:[#allocation3 + $0x118] sm:$0xff]  ;;  %v4286_v17 = vpack.c.bf16 %v4028_v15, %v4027_v5  ;;  %v3907_v15 = vpop.permute.xlu0 %3906 }
 0x516   : > { %12581 = vst [vmem:[#allocation57_spill] sm:$0xff] %v11546_v36  ;;  %12582 = vst [vmem:[#allocation58_spill] sm:$0xff] %v11554_v9  ;;  %v11556_v22 = vld [vmem:[#allocation3 + $0x127] sm:$0xff]  ;;  %v3598_v47 = vmul.f32 0.01, %v3544_v1  ;;  %v3545_v63 = vadd.f32 %v11517_v4, %v3485_v50  ;;  %6067 = vmatmul.mubr.bf16.gmra.mrb[68].mxu1 %v4177_v57 }
 0x517   : > { %4083 = vst [vmem:[#allocation3 + $0x138] sm:$0xff] %v4029_v34  ;;  %6074 = vmatprep.mubr.bf16.mxu1 %v4286_v17 }
 0x518   : > { %v3652_v39 = vmax.f32 %v3544_v1, %v3598_v47  ;;  %v3599_v7 = vmul.f32 0.01, %v3545_v63 }
 0x519   : > { %v3379_v5 = vpop.f32.mrb[76].mxu0 }
 0x51a   : > { %v4030_v49 = vmul.f32 %v3907_v15, %v3652_v39  ;;  %v3653_v40 = vmax.f32 %v3545_v63, %v3599_v7  ;;  %v3486_v18 = vmul.f32 %v11523_v6, %v3379_v5  ;;  %v8566_v41 = vpop.f32.mrb[77].mxu0  ;;  %v11576_v63 = vld [vmem:[#allocation3 + $0x121] sm:$0xff] }
 0x51b   : > { %v3382_v54 = vpop.f32.mrb[78].mxu0  ;;  %v11566_v9 = vld [vmem:[#allocation3 + $0x12f] sm:$0xff] }
 0x51c   : > { %v11568_v36 = vld [vmem:[#allocation3 + $0x129] sm:$0xff]  ;;  %4084 = vst [vmem:[#allocation3 + $0x140] sm:$0xff] %v4030_v49  ;;  %v4031_v57 = vmul.f32 %v3912_v33, %v3653_v40  ;;  %v3546_v1 = vadd.f32 %v11517_v4, %v3486_v18  ;;  %v3487_v17 = vmul.f32 %v11523_v6, %v3382_v54  ;;  %v8567_v47 = vpop.f32.mrb[79].mxu0  ;;  %v4178_v7 = vpack.c.bf16 %v11566_v9, %v11556_v22 }
 0x51d   : > { %v11570_v50 = vld [vmem:[#allocation3 + $0x130] sm:$0xff]  ;;  %v11578_v41 = vld [vmem:[#allocation3 + $0x128] sm:$0xff]  ;;  %v4287_v39 = vpack.c.bf16 %v4030_v49, %v4029_v34  ;;  %v3917_v49 = vpop.permute.xlu0 %3916 }
 0x51e   : > { %12583 = vst [vmem:[#allocation59_spill] sm:$0xff] %v11570_v50  ;;  %12584 = vst [vmem:[#allocation60_spill] sm:$0xff] %v11578_v41  ;;  %v11580_v15 = vld [vmem:[#allocation3 + $0x137] sm:$0xff]  ;;  %v3600_v40 = vmul.f32 0.01, %v3546_v1  ;;  %v3547_v18 = vadd.f32 %v11517_v4, %v3487_v17  ;;  %6075 = vmatmul.mubr.bf16.gmra.mrb[72].mxu1 %v4178_v7 }
 0x51f   : > { %4085 = vst [vmem:[#allocation3 + $0x148] sm:$0xff] %v4031_v57  ;;  %6082 = vmatprep.mubr.bf16.mxu1 %v4287_v39 }
 0x520   : > { %v3654_v47 = vmax.f32 %v3546_v1, %v3600_v40  ;;  %v3601_v10 = vmul.f32 0.01, %v3547_v18 }
 0x521   : > { %v3387_v34 = vpop.f32.mrb[80].mxu0 }
 0x522   : > { %v4032_v53 = vmul.f32 %v3917_v49, %v3654_v47  ;;  %v3655_v43 = vmax.f32 %v3547_v18, %v3601_v10  ;;  %v3488_v5 = vmul.f32 %v11523_v6, %v3387_v34  ;;  %v8570_v42 = vpop.f32.mrb[81].mxu0  ;;  %v11600_v18 = vld [vmem:[#allocation3 + $0x131] sm:$0xff] }
 0x523   : > { %v3390_v33 = vpop.f32.mrb[82].mxu0  ;;  %v11590_v41 = vld [vmem:[#allocation3 + $0x13f] sm:$0xff] }
 0x524   : > { %v11592_v50 = vld [vmem:[#allocation3 + $0x139] sm:$0xff]  ;;  %4086 = vst [vmem:[#allocation3 + $0x150] sm:$0xff] %v4032_v53  ;;  %v4033_v7 = vmul.f32 %v3922_v32, %v3655_v43  ;;  %v3548_v1 = vadd.f32 %v11517_v4, %v3488_v5  ;;  %v3489_v39 = vmul.f32 %v11523_v6, %v3390_v33  ;;  %v8571_v40 = vpop.f32.mrb[83].mxu0  ;;  %v4179_v10 = vpack.c.bf16 %v11590_v41, %v11580_v15 }
 0x525   : > { %v11594_v17 = vld [vmem:[#allocation3 + $0x140] sm:$0xff]  ;;  %v11602_v42 = vld [vmem:[#allocation3 + $0x138] sm:$0xff]  ;;  %v4288_v47 = vpack.c.bf16 %v4032_v53, %v4031_v57  ;;  %v3927_v53 = vpop.permute.xlu0 %3926 }
 0x526   : > { %12585 = vst [vmem:[#allocation61_spill] sm:$0xff] %v11594_v17  ;;  %12586 = vst [vmem:[#allocation62_spill] sm:$0xff] %v11602_v42  ;;  %v11604_v49 = vld [vmem:[#allocation3 + $0x147] sm:$0xff]  ;;  %v3602_v43 = vmul.f32 0.01, %v3548_v1  ;;  %v3549_v5 = vadd.f32 %v11517_v4, %v3489_v39  ;;  %6083 = vmatmul.mubr.bf16.gmra.mrb[76].mxu1 %v4179_v10 }
 0x527   : > { %4087 = vst [vmem:[#allocation3 + $0x158] sm:$0xff] %v4033_v7  ;;  %6090 = vmatprep.mubr.bf16.mxu1 %v4288_v47 }
 0x528   : > { %v3656_v40 = vmax.f32 %v3548_v1, %v3602_v43  ;;  %v3603_v54 = vmul.f32 0.01, %v3549_v5 }
 0x529   : > { %v3395_v57 = vpop.f32.mrb[84].mxu0 }
 0x52a   : > { %v4034_v29 = vmul.f32 %v3927_v53, %v3656_v40  ;;  %v3657_v23 = vmax.f32 %v3549_v5, %v3603_v54  ;;  %v3490_v34 = vmul.f32 %v11523_v6, %v3395_v57  ;;  %v8574_v58 = vpop.f32.mrb[85].mxu0  ;;  %v11624_v5 = vld [vmem:[#allocation3 + $0x141] sm:$0xff] }
 0x52b   : > { %v3398_v32 = vpop.f32.mrb[86].mxu0  ;;  %v11614_v17 = vld [vmem:[#allocation3 + $0x14f] sm:$0xff] }
 0x52c   : > { %v11616_v42 = vld [vmem:[#allocation3 + $0x149] sm:$0xff]  ;;  %4088 = vst [vmem:[#allocation3 + $0x160] sm:$0xff] %v4034_v29  ;;  %v4035_v10 = vmul.f32 %v3932_v27, %v3657_v23  ;;  %v3550_v1 = vadd.f32 %v11517_v4, %v3490_v34  ;;  %v3491_v47 = vmul.f32 %v11523_v6, %v3398_v32  ;;  %v8575_v43 = vpop.f32.mrb[87].mxu0  ;;  %v4180_v54 = vpack.c.bf16 %v11614_v17, %v11604_v49 }
 0x52d   : > { %v11618_v39 = vld [vmem:[#allocation3 + $0x150] sm:$0xff]  ;;  %v11626_v58 = vld [vmem:[#allocation3 + $0x148] sm:$0xff]  ;;  %v4289_v40 = vpack.c.bf16 %v4034_v29, %v4033_v7  ;;  %v3937_v29 = vpop.permute.xlu0 %3936 }
 0x52e   : > { %12587 = vst [vmem:[#allocation63_spill] sm:$0xff] %v11618_v39  ;;  %12588 = vst [vmem:[#allocation64_spill] sm:$0xff] %v11626_v58  ;;  %v11628_v53 = vld [vmem:[#allocation3 + $0x157] sm:$0xff]  ;;  %v3604_v23 = vmul.f32 0.01, %v3550_v1  ;;  %v3551_v34 = vadd.f32 %v11517_v4, %v3491_v47  ;;  %6091 = vmatmul.mubr.bf16.gmra.mrb[80].mxu1 %v4180_v54 }
 0x52f   : > { %4089 = vst [vmem:[#allocation3 + $0x168] sm:$0xff] %v4035_v10  ;;  %6098 = vmatprep.mubr.bf16.mxu1 %v4289_v40 }
 0x530   : > { %v3658_v43 = vmax.f32 %v3550_v1, %v3604_v23  ;;  %v3605_v33 = vmul.f32 0.01, %v3551_v34 }
 0x531   : > { %v3403_v7 = vpop.f32.mrb[88].mxu0 }
 0x532   : > { %v4036_v45 = vmul.f32 %v3937_v29, %v3658_v43  ;;  %v3659_v26 = vmax.f32 %v3551_v34, %v3605_v33  ;;  %v3492_v57 = vmul.f32 %v11523_v6, %v3403_v7  ;;  %v8578_v51 = vpop.f32.mrb[89].mxu0  ;;  %v11648_v34 = vld [vmem:[#allocation3 + $0x151] sm:$0xff] }
 0x533   : > { %v3406_v27 = vpop.f32.mrb[90].mxu0  ;;  %v11638_v39 = vld [vmem:[#allocation3 + $0x15f] sm:$0xff] }
 0x534   : > { %v11640_v58 = vld [vmem:[#allocation3 + $0x159] sm:$0xff]  ;;  %4090 = vst [vmem:[#allocation3 + $0x170] sm:$0xff] %v4036_v45  ;;  %v4037_v54 = vmul.f32 %v3942_v52, %v3659_v26  ;;  %v3552_v1 = vadd.f32 %v11517_v4, %v3492_v57  ;;  %v3493_v40 = vmul.f32 %v11523_v6, %v3406_v27  ;;  %v8579_v23 = vpop.f32.mrb[91].mxu0  ;;  %v4181_v33 = vpack.c.bf16 %v11638_v39, %v11628_v53 }
 0x535   : > { %v11642_v47 = vld [vmem:[#allocation3 + $0x160] sm:$0xff]  ;;  %v11650_v51 = vld [vmem:[#allocation3 + $0x158] sm:$0xff]  ;;  %v4290_v43 = vpack.c.bf16 %v4036_v45, %v4035_v10  ;;  %v3947_v45 = vpop.permute.xlu0 %3946 }
 0x536   : > { %12589 = vst [vmem:[#allocation65_spill] sm:$0xff] %v11642_v47  ;;  %12590 = vst [vmem:[#allocation66_spill] sm:$0xff] %v11650_v51  ;;  %v11652_v29 = vld [vmem:[#allocation3 + $0x167] sm:$0xff]  ;;  %v3606_v26 = vmul.f32 0.01, %v3552_v1  ;;  %v3553_v57 = vadd.f32 %v11517_v4, %v3493_v40  ;;  %6099 = vmatmul.mubr.bf16.gmra.mrb[84].mxu1 %v4181_v33 }
 0x537   : > { %4091 = vst [vmem:[#allocation3 + $0x178] sm:$0xff] %v4037_v54  ;;  %6106 = vmatprep.mubr.bf16.mxu1 %v4290_v43 }
 0x538   : > { %v3660_v23 = vmax.f32 %v3552_v1, %v3606_v26  ;;  %v3607_v32 = vmul.f32 0.01, %v3553_v57 }
 0x539   : > { %v3411_v10 = vpop.f32.mrb[92].mxu0 }
 0x53a   : > { %v4038_v60 = vmul.f32 %v3947_v45, %v3660_v23  ;;  %v3661_v14 = vmax.f32 %v3553_v57, %v3607_v32  ;;  %v3494_v7 = vmul.f32 %v11523_v6, %v3411_v10  ;;  %v8582_v30 = vpop.f32.mrb[93].mxu0  ;;  %v11672_v57 = vld [vmem:[#allocation3 + $0x161] sm:$0xff] }
 0x53b   : > { %v3414_v52 = vpop.f32.mrb[94].mxu0  ;;  %v11662_v47 = vld [vmem:[#allocation3 + $0x16f] sm:$0xff]  ;;  %12593 = vst [vmem:[#allocation69_spill] sm:$0xff] %v11672_v57 }
 0x53c   : > { %v11664_v51 = vld [vmem:[#allocation3 + $0x169] sm:$0xff]  ;;  %4092 = vst [vmem:[#allocation3 + $0x180] sm:$0xff] %v4038_v60  ;;  %v4039_v33 = vmul.f32 %v3952_v44, %v3661_v14  ;;  %v3554_v1 = vadd.f32 %v11517_v4, %v3494_v7  ;;  %v3495_v43 = vmul.f32 %v11523_v6, %v3414_v52  ;;  %v8583_v26 = vpop.f32.mrb[95].mxu0  ;;  %v4182_v32 = vpack.c.bf16 %v11662_v47, %v11652_v29 }
 0x53d   : > { %12591 = vst [vmem:[#allocation67_spill] sm:$0xff] %v11664_v51  ;;  %v11666_v40 = vld [vmem:[#allocation3 + $0x170] sm:$0xff]  ;;  %v11674_v30 = vld [vmem:[#allocation3 + $0x168] sm:$0xff]  ;;  %v4291_v23 = vpack.c.bf16 %v4038_v60, %v4037_v54  ;;  %v3957_v60 = vpop.permute.xlu0 %3956 }
 0x53e   : > { %12592 = vst [vmem:[#allocation68_spill] sm:$0xff] %v11666_v40  ;;  %12594 = vst [vmem:[#allocation70_spill] sm:$0xff] %v11674_v30  ;;  %v11676_v45 = vld [vmem:[#allocation3 + $0x177] sm:$0xff]  ;;  %v3608_v14 = vmul.f32 0.01, %v3554_v1  ;;  %v3555_v7 = vadd.f32 %v11517_v4, %v3495_v43  ;;  %6107 = vmatmul.mubr.bf16.gmra.mrb[88].mxu1 %v4182_v32 }
 0x53f   : > { %4093 = vst [vmem:[#allocation3 + $0x188] sm:$0xff] %v4039_v33  ;;  %6114 = vmatprep.mubr.bf16.mxu1 %v4291_v23 }
 0x540   : > { %v3662_v26 = vmax.f32 %v3554_v1, %v3608_v14  ;;  %v3609_v27 = vmul.f32 0.01, %v3555_v7 }
 0x541   : > { %v3419_v54 = vpop.f32.mrb[96].mxu0 }
 0x542   : > { %v4040_v37 = vmul.f32 %v3957_v60, %v3662_v26  ;;  %v3663_v25 = vmax.f32 %v3555_v7, %v3609_v27  ;;  %v3496_v10 = vmul.f32 %v11523_v6, %v3419_v54  ;;  %v8586_v38 = vpop.f32.mrb[97].mxu0  ;;  %v11696_v7 = vld [vmem:[#allocation3 + $0x171] sm:$0xff] }
 0x543   : > { %v3422_v44 = vpop.f32.mrb[98].mxu0  ;;  %v11686_v40 = vld [vmem:[#allocation3 + $0x17f] sm:$0xff]  ;;  %12598 = vst [vmem:[#allocation74_spill] sm:$0xff] %v11696_v7  ;;  %v3972_v7 = vpop.permute.xlu1 %3971 }
 0x544   : > { %12595 = vst [vmem:[#allocation71_spill] sm:$0xff] %v11686_v40  ;;  %v11688_v30 = vld [vmem:[#allocation3 + $0x179] sm:$0xff]  ;;  %4094 = vst [vmem:[#allocation3 + $0x190] sm:$0xff] %v4040_v37  ;;  %v4041_v32 = vmul.f32 %v3962_v61, %v3663_v25  ;;  %v3556_v1 = vadd.f32 %v11517_v4, %v3496_v10  ;;  %v3497_v23 = vmul.f32 %v11523_v6, %v3422_v44  ;;  %v8587_v14 = vpop.f32.mrb[99].mxu0 }
 0x545   : > { %12596 = vst [vmem:[#allocation72_spill] sm:$0xff] %v11688_v30  ;;  %v11690_v43 = vld [vmem:[#allocation3 + $0x180] sm:$0xff]  ;;  %v4183_v27 = vpack.c.bf16 %v11686_v40, %v11676_v45  ;;  %v11698_v38 = vld [vmem:[#allocation3 + $0x178] sm:$0xff]  ;;  %v4292_v26 = vpack.c.bf16 %v4040_v37, %v4039_v33  ;;  %v3967_v37 = vpop.permute.xlu0 %3966 }
 0x546   : > { %12597 = vst [vmem:[#allocation73_spill] sm:$0xff] %v11690_v43  ;;  %12599 = vst [vmem:[#allocation75_spill] sm:$0xff] %v11698_v38  ;;  %v11700_v60 = vld [vmem:[#allocation3 + $0x187] sm:$0xff]  ;;  %v3610_v25 = vmul.f32 0.01, %v3556_v1  ;;  %v3557_v10 = vadd.f32 %v11517_v4, %v3497_v23 }
 0x547   : > { %12600 = vst [vmem:[#allocation76_spill] sm:$0xff] %v11700_v60  ;;  %4095 = vst [vmem:[#allocation3 + $0x198] sm:$0xff] %v4041_v32  ;;  %6115 = vmatmul.mubr.bf16.gmra.mrb[92].mxu1 %v4183_v27 }
 0x548   : > { %6122 = vmatprep.mubr.bf16.mxu1 %v4292_v26  ;;  %v3664_v14 = vmax.f32 %v3556_v1, %v3610_v25  ;;  %v3611_v52 = vmul.f32 0.01, %v3557_v10 }
 0x549   : > { %v3427_v33 = vpop.f32.mrb[100].mxu0 }
 0x54a   : > { %v4042_v51 = vmul.f32 %v3967_v37, %v3664_v14  ;;  %v3665_v57 = vmax.f32 %v3557_v10, %v3611_v52  ;;  %v3498_v54 = vmul.f32 %v11523_v6, %v3427_v33  ;;  %v8590_v30 = vpop.f32.mrb[101].mxu0  ;;  %v11720_v10 = vld [vmem:[#allocation3 + $0x181] sm:$0xff] }
 0x54b   : > { %v3430_v61 = vpop.f32.mrb[102].mxu0  ;;  %v11710_v43 = vld [vmem:[#allocation3 + $0x18f] sm:$0xff]  ;;  %12604 = vst [vmem:[#allocation80_spill] sm:$0xff] %v11720_v10  ;;  %v3982_v10 = vpop.permute.xlu1 %3981 }
 0x54c   : > { %12601 = vst [vmem:[#allocation77_spill] sm:$0xff] %v11710_v43  ;;  %v11712_v38 = vld [vmem:[#allocation3 + $0x189] sm:$0xff]  ;;  %4096 = vst [vmem:[#allocation3 + $0x1a0] sm:$0xff] %v4042_v51  ;;  %v4043_v27 = vmul.f32 %v3972_v7, %v3665_v57  ;;  %v3558_v1 = vadd.f32 %v11517_v4, %v3498_v54  ;;  %v3499_v26 = vmul.f32 %v11523_v6, %v3430_v61  ;;  %v8591_v25 = vpop.f32.mrb[103].mxu0 }
 0x54d   : > { %12602 = vst [vmem:[#allocation78_spill] sm:$0xff] %v11712_v38  ;;  %v11714_v23 = vld [vmem:[#allocation3 + $0x190] sm:$0xff]  ;;  %v4184_v52 = vpack.c.bf16 %v11710_v43, %v11700_v60  ;;  %v11722_v30 = vld [vmem:[#allocation3 + $0x188] sm:$0xff]  ;;  %v4293_v14 = vpack.c.bf16 %v4042_v51, %v4041_v32  ;;  %v3977_v51 = vpop.permute.xlu0 %3976 }
 0x54e   : > { %12603 = vst [vmem:[#allocation79_spill] sm:$0xff] %v11714_v23  ;;  %12605 = vst [vmem:[#allocation81_spill] sm:$0xff] %v11722_v30  ;;  %v11724_v37 = vld [vmem:[#allocation3 + $0x197] sm:$0xff]  ;;  %v3612_v7 = vmul.f32 0.01, %v3558_v1  ;;  %v3559_v54 = vadd.f32 %v11517_v4, %v3499_v26  ;;  %v4431_v43 = vld [vmem:[#allocation3 + $0x27] sm:$0xff] }
 0x54f   : > { %12606 = vst [vmem:[#allocation82_spill] sm:$0xff] %v11724_v37  ;;  %4097 = vst [vmem:[#allocation3 + $0x1a8] sm:$0xff] %v4043_v27  ;;  %6123 = vmatmul.mubr.bf16.gmra.mrb[96].mxu1 %v4184_v52 }
 0x550   : > { %6130 = vmatprep.mubr.bf16.mxu1 %v4293_v14  ;;  %v3666_v25 = vmax.f32 %v3558_v1, %v3612_v7  ;;  %v3613_v44 = vmul.f32 0.01, %v3559_v54 }
 0x551   : > { %v3435_v32 = vpop.f32.mrb[104].mxu0 }
 0x552   : > { %v4044_v40 = vmul.f32 %v3977_v51, %v3666_v25  ;;  %v3667_v60 = vmax.f32 %v3559_v54, %v3613_v44  ;;  %v3500_v33 = vmul.f32 %v11523_v6, %v3435_v32  ;;  %v8594_v38 = vpop.f32.mrb[105].mxu0  ;;  %v11744_v54 = vld [vmem:[#allocation3 + $0x191] sm:$0xff] }
 0x553   : > { %v3438_v57 = vpop.f32.mrb[106].mxu0  ;;  %v11734_v23 = vld [vmem:[#allocation3 + $0x19f] sm:$0xff] }
 0x554   : > { %v11736_v30 = vld [vmem:[#allocation3 + $0x199] sm:$0xff]  ;;  %4098 = vst [vmem:[#allocation3 + $0x1b0] sm:$0xff] %v4044_v40  ;;  %v4045_v52 = vmul.f32 %v3982_v10, %v3667_v60  ;;  %v3560_v1 = vadd.f32 %v11517_v4, %v3500_v33  ;;  %v3501_v14 = vmul.f32 %v11523_v6, %v3438_v57  ;;  %v8595_v7 = vpop.f32.mrb[107].mxu0  ;;  %v4185_v44 = vpack.c.bf16 %v11734_v23, %v11724_v37  ;;  %v3992_v60 = vpop.permute.xlu1 %3991 }
 0x555   : > { %v11738_v26 = vld [vmem:[#allocation3 + $0x1a0] sm:$0xff]  ;;  %v11746_v38 = vld [vmem:[#allocation3 + $0x198] sm:$0xff]  ;;  %v4294_v25 = vpack.c.bf16 %v4044_v40, %v4043_v27  ;;  %v3987_v40 = vpop.permute.xlu0 %3986 }
 0x556   : > { %12607 = vst [vmem:[#allocation83_spill] sm:$0xff] %v11738_v26  ;;  %v11748_v51 = vld [vmem:[#allocation3 + $0x1a7] sm:$0xff]  ;;  %4099 = vst [vmem:[#allocation3 + $0x1b8] sm:$0xff] %v4045_v52  ;;  %v3614_v10 = vmul.f32 0.01, %v3560_v1  ;;  %v3561_v6 = vadd.f32 %v11517_v4, %v3501_v14  ;;  %v4433_v33 = vld [vmem:[#allocation3 + $0x37] sm:$0xff] }
 0x557   : > { %6131 = vmatmul.mubr.bf16.gmra.mrb[100].mxu1 %v4185_v44  ;;  %v11757_v37 = vld [vmem:[#allocation3 + $0x1a1] sm:$0xff] }
 0x558   : > { %6138 = vmatprep.mubr.bf16.mxu1 %v4294_v25  ;;  %v3668_v57 = vmax.f32 %v3560_v1, %v3614_v10  ;;  %v3615_v7 = vmul.f32 0.01, %v3561_v6  ;;  %v11759_v32 = vld [vmem:[#allocation3 + $0x1a8] sm:$0xff]  ;;  %v4430_v44 = vld [vmem:[#allocation3 + $0x1f] sm:$0xff] }
 0x559   : > { %v4432_v25 = vld [vmem:[#allocation3 + $0x2f] sm:$0xff]  ;;  %v4434_v10 = vld [vmem:[#allocation3 + $0x3f] sm:$0xff] }
 0x55a   : > { %v4046_v27 = vmul.f32 %v3987_v40, %v3668_v57  ;;  %v3669_v61 = vmax.f32 %v3561_v6, %v3615_v7  ;;  %v4484_v6 = vpack.c.bf16 %v4431_v43, %v4430_v44  ;;  %v4322_v57 = vld [vmem:[#allocation3 + $0x9] sm:$0xff]  ;;  %v4323_v7 = vld [vmem:[#allocation3 + $0x11] sm:$0xff]  ;;  %v4485_v43 = vpack.c.bf16 %v4433_v33, %v4432_v25  ;;  %v9730_v33 = vld [vmem:[%s12416_s1 + $0x350] sm:$0xff]  }
 0x55b   : > { %v11761_v52 = vld [vmem:[#allocation3 + $0x1af] sm:$0xff]  ;;  %v4376_v40 = vpack.c.bf16 %v4323_v7, %v4322_v57  ;;  %v12612_v57 = vmov 0   ;;  %v4435_v7 = vld [vmem:[#allocation3 + $0x47] sm:$0xff] }
 0x55c   : > { %v11763_v26 = vld [vmem:[#allocation3 + $0x1a9] sm:$0xff]  ;;  %4100 = vst [vmem:[#allocation3 + $0x1c0] sm:$0xff] %v4046_v27  ;;  %v4047_v14 = vmul.f32 %v3992_v60, %v3669_v61  ;;  %v4186_v1 = vpack.c.bf16 %v11761_v52, %v11748_v51  ;;  %v9772_v25 = vld [vmem:[#allocation3 + $0x21] sm:$0xff] }
 0x55d   : > { %v11765_v4 = vld [vmem:[#allocation3 + $0x1b0] sm:$0xff]  ;;  %v11776_v60 = vld [vmem:[#allocation3 + $0x1b8] sm:$0xff] }
 0x55e   : > { %12608 = vst [vmem:[#allocation84_spill] sm:$0xff] %v11765_v4  ;;  %4101 = vst [vmem:[#allocation3 + $0x1c8] sm:$0xff] %v4047_v14  ;;  %v9728_v61 = vld [vmem:[%s12416_s1 + $0x340] sm:$0xff]   ;;  %v4324_v4 = vld [vmem:[#allocation3 + $0x19] sm:$0xff] }
 0x55f   : > { %6139 = vmatmul.mubr.bf16.gmra.mrb[104].mxu1 %v4186_v1  ;;  %12609 = vst [vmem:[#allocation85_spill] sm:$0xff] %v11776_v60  ;;  %v9732_v44 = vld [vmem:[%s12416_s1 + $0x360] sm:$0xff]   ;;  %v9790_v60 = vld [vmem:[#allocation3 + $0xa1] sm:$0xff] }
 0x560   : > { %6179 = vmatprep.mubr.bf16.mxu1 %v4484_v6  ;;  %v9729_v6 = vld [vmem:[%s12416_s1 + $0x348] sm:$0xff]  }
 0x563   : > { %v11778_v27 = vld [vmem:[#allocation3 + $0x1c0] sm:$0xff] }
 0x564   : > { %12610 = vst [vmem:[#allocation86_spill] sm:$0xff] %v11778_v27  ;;  %v11782_v14 = vld [vmem:[#allocation3 + $0x1b9] sm:$0xff] }
 0x565   : > { %v11784_v1 = vld [vmem:[#allocation3 + $0x1c1] sm:$0xff] }
 0x566   : > { %12611 = vst [vmem:[#allocation87_spill] sm:$0xff] %v11784_v1  ;;  %v4436_v1 = vld [vmem:[#allocation3 + $0x4f] sm:$0xff] }
 0x567   : > { %6180 = vmatmul.mubr.bf16.vlgmr.msra.gmra.mrb[0].mxu1 %v4376_v40  ;;  %v4377_v40 = vpack.c.bf16 %v9772_v25, %v4324_v4  ;;  %v9773_v4 = vld [vmem:[#allocation3 + $0x29] sm:$0xff]  ;;  %v9774_v25 = vld [vmem:[#allocation3 + $0x31] sm:$0xff] }
 0x568   : > { %6187 = vmatprep.mubr.bf16.mxu1 %v4485_v43  ;;  %6397 = vmatpush1.bf16.msra.mxu1 %v9728_v61  ;;  %v4486_v43 = vpack.c.bf16 %v4435_v7, %v4434_v10  ;;  %v9731_v61 = vld [vmem:[%s12416_s1 + $0x358] sm:$0xff]   ;;  %v4378_v27 = vpack.c.bf16 %v9774_v25, %v9773_v4  ;;  %v9733_v7 = vld [vmem:[%s12416_s1 + $0x368] sm:$0xff]  }
 0x569   : > { %6398 = vmatprep.subr.bf16.mxu1 %v12612_v57  ;;  %v4438_v25 = vld [vmem:[#allocation3 + $0x5f] sm:$0xff] }
 0x56c   : > { %6399 = vmatpush1.bf16.msra.mxu1 %v9729_v6  ;;  %v4437_v6 = vld [vmem:[#allocation3 + $0x57] sm:$0xff] }
 0x56d   : > { %6400 = vmatprep.subr.bf16.mxu1 %v12612_v57  ;;  %v4487_v10 = vpack.c.bf16 %v4437_v6, %v4436_v1  ;;  %v9735_v1 = vld [vmem:[%s12416_s1 + $0x378] sm:$0xff]   ;;  %v9736_v6 = vld [vmem:[%s12416_s1 + $0x380] sm:$0xff]  }
 0x56f   : > { %6188 = vmatmul.mubr.bf16.gmra.mrb[4].mxu1 %v4377_v40  ;;  %v9734_v40 = vld [vmem:[%s12416_s1 + $0x370] sm:$0xff]  }
 0x570   : > { %6195 = vmatprep.mubr.bf16.mxu1 %v4486_v43  ;;  %6401 = vmatpush1.bf16.msra.mxu1 %v9730_v33  ;;  %v4439_v33 = vld [vmem:[#allocation3 + $0x67] sm:$0xff]  ;;  %v9775_v43 = vld [vmem:[#allocation3 + $0x39] sm:$0xff] }
 0x571   : > { %6402 = vmatprep.subr.bf16.mxu1 %v12612_v57 }
 0x574   : > { %6403 = vmatpush1.bf16.msra.mxu1 %v9731_v61  ;;  %v9776_v61 = vld [vmem:[#allocation3 + $0x41] sm:$0xff] }
 0x575   : > { %6404 = vmatprep.subr.bf16.mxu1 %v12612_v57  ;;  %v4379_v4 = vpack.c.bf16 %v9776_v61, %v9775_v43  ;;  %v4440_v61 = vld [vmem:[#allocation3 + $0x6f] sm:$0xff] }
 0x577   : > { %6196 = vmatmul.mubr.bf16.gmra.mrb[8].mxu1 %v4378_v27  ;;  %v4488_v27 = vpack.c.bf16 %v4439_v33, %v4438_v25  ;;  %v9738_v25 = vld [vmem:[%s12416_s1 + $0x390] sm:$0xff]  }
 0x578   : > { %6203 = vmatprep.mubr.bf16.mxu1 %v4487_v10  ;;  %6405 = vmatpush1.bf16.msra.mxu1 %v9732_v44  ;;  %v4441_v44 = vld [vmem:[#allocation3 + $0x77] sm:$0xff]  ;;  %v9777_v10 = vld [vmem:[#allocation3 + $0x49] sm:$0xff] }
 0x579   : > { %6406 = vmatprep.subr.bf16.mxu1 %v12612_v57  ;;  %v4489_v33 = vpack.c.bf16 %v4441_v44, %v4440_v61  ;;  %v9740_v61 = vld [vmem:[%s12416_s1 + $0x3a0] sm:$0xff]  }
 0x57c   : > { %6407 = vmatpush1.bf16.msra.mxu1 %v9733_v7  ;;  %v9778_v7 = vld [vmem:[#allocation3 + $0x51] sm:$0xff] }
 0x57d   : > { %6408 = vmatprep.subr.bf16.mxu1 %v12612_v57  ;;  %v4380_v43 = vpack.c.bf16 %v9778_v7, %v9777_v10  ;;  %v4442_v7 = vld [vmem:[#allocation3 + $0x7f] sm:$0xff] }
 0x57f   : > { %6204 = vmatmul.mubr.bf16.gmra.mrb[12].mxu1 %v4379_v4  ;;  %v4443_v4 = vld [vmem:[#allocation3 + $0x87] sm:$0xff] }
 0x580   : > { %6211 = vmatprep.mubr.bf16.mxu1 %v4488_v27  ;;  %6409 = vmatpush1.bf16.msra.mxu1 %v9734_v40  ;;  %v9737_v40 = vld [vmem:[%s12416_s1 + $0x388] sm:$0xff]   ;;  %v4490_v44 = vpack.c.bf16 %v4443_v4, %v4442_v7  ;;  %v9784_v7 = vld [vmem:[#allocation3 + $0x81] sm:$0xff] }
 0x581   : > { %6410 = vmatprep.subr.bf16.mxu1 %v12612_v57  ;;  %v9779_v27 = vld [vmem:[#allocation3 + $0x59] sm:$0xff] }
 0x584   : > { %6411 = vmatpush1.bf16.msra.mxu1 %v9735_v1  ;;  %v9780_v1 = vld [vmem:[#allocation3 + $0x61] sm:$0xff] }
 0x585   : > { %6412 = vmatprep.subr.bf16.mxu1 %v12612_v57  ;;  %v4381_v10 = vpack.c.bf16 %v9780_v1, %v9779_v27  ;;  %v4444_v1 = vld [vmem:[#allocation3 + $0x8f] sm:$0xff] }
 0x587   : > { %6212 = vmatmul.mubr.bf16.gmra.mrb[16].mxu1 %v4380_v43  ;;  %v4445_v43 = vld [vmem:[#allocation3 + $0x97] sm:$0xff] }
 0x588   : > { %6219 = vmatprep.mubr.bf16.mxu1 %v4489_v33  ;;  %6413 = vmatpush1.bf16.msra.mxu1 %v9736_v6  ;;  %v9739_v6 = vld [vmem:[%s12416_s1 + $0x398] sm:$0xff]   ;;  %v4491_v4 = vpack.c.bf16 %v4445_v43, %v4444_v1  ;;  %v9742_v43 = vld [vmem:[%s12416_s1 + $0x3b0] sm:$0xff]  }
 0x589   : > { %6414 = vmatprep.subr.bf16.mxu1 %v12612_v57  ;;  %v9781_v33 = vld [vmem:[#allocation3 + $0x69] sm:$0xff] }
 0x58c   : > { %6415 = vmatpush1.bf16.msra.mxu1 %v9737_v40  ;;  %v9782_v40 = vld [vmem:[#allocation3 + $0x71] sm:$0xff] }
 0x58d   : > { %6416 = vmatprep.subr.bf16.mxu1 %v12612_v57  ;;  %v4382_v27 = vpack.c.bf16 %v9782_v40, %v9781_v33  ;;  %v9785_v33 = vld [vmem:[#allocation3 + $0xa7] sm:$0xff] }
 0x58f   : > { %6220 = vmatmul.mubr.bf16.gmra.mrb[20].mxu1 %v4381_v10  ;;  %v9783_v10 = vld [vmem:[#allocation3 + $0x79] sm:$0xff] }
 0x590   : > { %6227 = vmatprep.mubr.bf16.mxu1 %v4490_v44  ;;  %6417 = vmatpush1.bf16.msra.mxu1 %v9738_v25  ;;  %v9741_v25 = vld [vmem:[%s12416_s1 + $0x3a8] sm:$0xff]   ;;  %v4383_v44 = vpack.c.bf16 %v9784_v7, %v9783_v10 }
 0x591   : > { %6418 = vmatprep.subr.bf16.mxu1 %v12612_v57  ;;  %v9789_v7 = vld [vmem:[#allocation3 + $0x99] sm:$0xff] }
 0x594   : > { %6419 = vmatpush1.bf16.msra.mxu1 %v9739_v6  ;;  %v4446_v6 = vld [vmem:[#allocation3 + $0x9f] sm:$0xff] }
 0x595   : > { %6420 = vmatprep.subr.bf16.mxu1 %v12612_v57  ;;  %v4492_v40 = vpack.c.bf16 %v9785_v33, %v4446_v6  ;;  %v4385_v6 = vpack.c.bf16 %v9790_v60, %v9789_v7  ;;  %v9743_v33 = vld [vmem:[%s12416_s1 + $0x3b8] sm:$0xff]   ;;  %v9793_v60 = vld [vmem:[#allocation3 + $0xb9] sm:$0xff]  ;;  %v12616_v7 = vpack.c.bf16 %v11474_v28, %v11460_v11  ;;  %v4391_v11 = vpack.c.bf16 %v11528_v62, %v11486_v3 }
 0x596   : > { %v12619_v28 = vpack.c.bf16 %v11556_v22, %v11542_v48  ;;  %v4394_v48 = vpack.c.bf16 %v11600_v18, %v11568_v36  ;;  %v12622_v22 = vpack.c.bf16 %v11628_v53, %v11614_v17  ;;  %v12626_v53 = vld [vmem:[#allocation76_spill] sm:$0xff] }
 0x597   : > { %6228 = vmatmul.mubr.bf16.gmra.mrb[24].mxu1 %v4382_v27  ;;  %v9787_v27 = vld [vmem:[#allocation3 + $0x91] sm:$0xff] }
 0x598   : > { %6235 = vmatprep.mubr.bf16.mxu1 %v4491_v4  ;;  %6421 = vmatpush1.bf16.msra.mxu1 %v9740_v61  ;;  %v9786_v61 = vld [vmem:[#allocation3 + $0x89] sm:$0xff] }
 0x599   : > { %6422 = vmatprep.subr.bf16.mxu1 %v12612_v57  ;;  %v4384_v1 = vpack.c.bf16 %v9787_v27, %v9786_v61  ;;  %v4448_v4 = vld [vmem:[#allocation3 + $0xaf] sm:$0xff]  ;;  %v12614_v27 = vpack.c.bf16 %v11426_v56, %v11412_v55  ;;  %v12617_v56 = vpack.c.bf16 %v11498_v12, %v11484_v35  ;;  %v4392_v35 = vpack.c.bf16 %v11552_v21, %v11510_v24 }
 0x59a   : > { %v12620_v12 = vpack.c.bf16 %v11580_v15, %v11566_v9  ;;  %v4395_v9 = vpack.c.bf16 %v11624_v5, %v11592_v50  ;;  %v12623_v15 = vpack.c.bf16 %v11652_v29, %v11638_v39  ;;  %v12631_v29 = vld [vmem:[#allocation82_spill] sm:$0xff] }
 0x59c   : > { %6423 = vmatpush1.bf16.msra.mxu1 %v9741_v25  ;;  %v9788_v25 = vld [vmem:[#allocation3 + $0xb7] sm:$0xff] }
 0x59d   : > { %6424 = vmatprep.subr.bf16.mxu1 %v12612_v57  ;;  %v4493_v10 = vpack.c.bf16 %v9788_v25, %v4448_v4  ;;  %v9796_v25 = vld [vmem:[#allocation3 + $0xd1] sm:$0xff] }
 0x59f   : > { %6236 = vmatmul.mubr.bf16.gmra.mrb[28].mxu1 %v4383_v44  ;;  %v12613_v44 = vpack.c.bf16 %v11402_v2, %v11389_v20  ;;  %v12615_v20 = vpack.c.bf16 %v11450_v19, %v11436_v13  ;;  %v9795_v2 = vld [vmem:[#allocation3 + $0xc9] sm:$0xff]  ;;  %v4390_v13 = vpack.c.bf16 %v11494_v0, %v11462_v31  ;;  %v12618_v19 = vpack.c.bf16 %v11532_v8, %v11508_v46 }
 0x5a0   : > { %6243 = vmatprep.mubr.bf16.mxu1 %v4492_v40  ;;  %6425 = vmatpush1.bf16.msra.mxu1 %v9742_v43  ;;  %v9791_v40 = vld [vmem:[#allocation3 + $0xa9] sm:$0xff]  ;;  %v9792_v43 = vld [vmem:[#allocation3 + $0xb1] sm:$0xff]  ;;  %v4393_v46 = vpack.c.bf16 %v11576_v63, %v11544_v16  ;;  %v12621_v8 = vpack.c.bf16 %v11604_v49, %v11590_v41  ;;  %v4396_v41 = vpack.c.bf16 %v11648_v34, %v11616_v42 }
 0x5a1   : > { %6426 = vmatprep.subr.bf16.mxu1 %v12612_v57  ;;  %v4386_v61 = vpack.c.bf16 %v9792_v43, %v9791_v40  ;;  %v12624_v49 = vpack.c.bf16 %v11676_v45, %v11662_v47  ;;  %v12629_v43 = vld [vmem:[#allocation67_spill] sm:$0xff]  ;;  %v12636_v45 = vpack.c.bf16 %v11748_v51, %v11734_v23  ;;  %v12638_v51 = vld [vmem:[#allocation5_spill] sm:$0xff] }
 0x5a4   : > { %6427 = vmatpush1.bf16.msra.mxu1 %v9743_v33  ;;  %v12627_v33 = vld [vmem:[#allocation71_spill] sm:$0xff] }
 0x5a5   : > { %6645 = vmatprep.subr.bf16.mxu1 %v12612_v57  ;;  %v12628_v40 = vpack.c.bf16 %v12626_v53, %v12627_v33  ;;  %v12645_v53 = vld [vmem:[#allocation12_spill] sm:$0xff] }
 0x5a7   : > { %6244 = vmatmul.mubr.bf16.gmra.mrb[32].mxu1 %v4384_v1  ;;  %v9794_v1 = vld [vmem:[#allocation3 + $0xc1] sm:$0xff] }
 0x5a8   : > { %6251 = vmatprep.mubr.bf16.mxu1 %v4493_v10  ;;  %v4387_v4 = vpack.c.bf16 %v9794_v1, %v9793_v60  ;;  %v4388_v10 = vpack.c.bf16 %v9796_v25, %v9795_v2  ;;  %v12634_v1 = vld [vmem:[#allocation72_spill] sm:$0xff]  ;;  %v12637_v2 = vld [vmem:[#allocation78_spill] sm:$0xff] }
 0x5a9   : > { %v4400_v25 = vpack.c.bf16 %v11744_v54, %v12637_v2 }
 0x5af   : > { %6252 = vmatmul.mubr.bf16.gmra.mrb[36].mxu1 %v4385_v6  ;;  %v9797_v6 = vld [vmem:[#allocation3 + $0xd9] sm:$0xff] }
 0x5b0   : > { %6259 = vmatprep.mubr.bf16.mxu1 %v12613_v44  ;;  %v4389_v55 = vpack.c.bf16 %v11470_v59, %v9797_v6  ;;  %v12625_v44 = vld [vmem:[#allocation69_spill] sm:$0xff]  ;;  %v4401_v6 = vpack.c.bf16 %v11757_v37, %v11736_v30 }
 0x5b1   : > { %v4397_v17 = vpack.c.bf16 %v12625_v44, %v11640_v58 }
 0x5b7   : > { %6260 = vmatmul.mubr.bf16.gmra.mrb[40].mxu1 %v4386_v61  ;;  %v12630_v61 = vld [vmem:[#allocation74_spill] sm:$0xff] }
 0x5b8   : > { %6267 = vmatprep.mubr.bf16.mxu1 %v12614_v27  ;;  %v4398_v39 = vpack.c.bf16 %v12630_v61, %v12629_v43  ;;  %v12632_v27 = vld [vmem:[#allocation77_spill] sm:$0xff] }
 0x5b9   : > { %v12633_v60 = vpack.c.bf16 %v12631_v29, %v12632_v27  ;;  %v9799_v29 = vld [vmem:[#allocation3 + $0x40] sm:$0xff]  ;;  %v9800_v27 = vld [vmem:[#allocation3 + $0x48] sm:$0xff] }
 0x5bf   : > { %6268 = vmatmul.mubr.bf16.gmra.mrb[44].mxu1 %v4387_v4  ;;  %v12635_v4 = vld [vmem:[#allocation80_spill] sm:$0xff] }
 0x5c0   : > { %6275 = vmatprep.mubr.bf16.mxu1 %v12615_v20  ;;  %v4399_v47 = vpack.c.bf16 %v12635_v4, %v12634_v1  ;;  %v4481_v20 = vld [vmem:[#allocation3 + $0x1b7] sm:$0xff] }
 0x5c7   : > { %6276 = vmatmul.mubr.bf16.gmra.mrb[48].mxu1 %v4388_v10  ;;  %v4509_v10 = vpack.c.bf16 %v4481_v20, %v11761_v52  ;;  %v4539_v52 = vld [vmem:[#allocation3 + $0x28] sm:$0xff] }
 0x5c8   : > { %6283 = vmatprep.mubr.bf16.mxu1 %v12616_v7  ;;  %v4483_v7 = vld [vmem:[#allocation3 + $0x1c7] sm:$0xff] }
 0x5cf   : > { %6284 = vmatmul.mubr.bf16.gmra.mrb[52].mxu1 %v4389_v55  ;;  %v4482_v55 = vld [vmem:[#allocation3 + $0x1bf] sm:$0xff] }
 0x5d0   : > { %6291 = vmatprep.mubr.bf16.mxu1 %v12617_v56  ;;  %v4510_v56 = vpack.c.bf16 %v4483_v7, %v4482_v55  ;;  %v9801_v7 = vld [vmem:[#allocation3 + $0x50] sm:$0xff] }
 0x5d7   : > { %6292 = vmatmul.mubr.bf16.gmra.mrb[56].mxu1 %v4390_v13  ;;  %v11920_v13 = vld [vmem:[#allocation3 + $0x1b1] sm:$0xff] }
 0x5d8   : > { %6299 = vmatprep.mubr.bf16.mxu1 %v12618_v19  ;;  %v4402_v23 = vpack.c.bf16 %v11920_v13, %v11763_v26  ;;  %v12639_v19 = vld [vmem:[#allocation6_spill] sm:$0xff] }
 0x5df   : > { %6300 = vmatmul.mubr.bf16.gmra.mrb[60].mxu1 %v4391_v11  ;;  %v12640_v11 = vpack.c.bf16 %v12638_v51, %v12639_v19  ;;  %v9751_v19 = vld [vmem:[%s12416_s1 + $0x3f8] sm:$0xff]  }
 0x5e0   : > { %6307 = vmatprep.mubr.bf16.mxu1 %v12619_v28  ;;  %v4538_v28 = vld [vmem:[#allocation3 + $0x20] sm:$0xff] }
 0x5e7   : > { %6308 = vmatmul.mubr.bf16.gmra.mrb[64].mxu1 %v4392_v35  ;;  %v9744_v35 = vld [vmem:[%s12416_s1 + $0x3c0] sm:$0xff]  }
 0x5e8   : > { %6315 = vmatprep.mubr.bf16.mxu1 %v12620_v12  ;;  %v4592_v12 = vpack.c.bf16 %v4539_v52, %v4538_v28  ;;  %v9803_v52 = vld [vmem:[#allocation3 + $0x60] sm:$0xff]  ;;  %v9804_v28 = vld [vmem:[#allocation3 + $0x68] sm:$0xff] }
 0x5ef   : > { %6316 = vmatmul.mubr.bf16.gmra.mrb[68].mxu1 %v4393_v46  ;;  %v12641_v46 = vld [vmem:[#allocation7_spill] sm:$0xff] }
 0x5f0   : > { %6323 = vmatprep.mubr.bf16.mxu1 %v12621_v8  ;;  %v12642_v8 = vld [vmem:[#allocation8_spill] sm:$0xff] }
 0x5f7   : > { %6324 = vmatmul.mubr.bf16.gmra.mrb[72].mxu1 %v4394_v48  ;;  %v12643_v48 = vpack.c.bf16 %v12641_v46, %v12642_v8  ;;  %v12654_v46 = vld [vmem:[#allocation24_spill] sm:$0xff] }
 0x5f8   : > { %6331 = vmatprep.mubr.bf16.mxu1 %v12622_v22  ;;  %v9745_v22 = vld [vmem:[%s12416_s1 + $0x3c8] sm:$0xff]  }
 0x5ff   : > { %6332 = vmatmul.mubr.bf16.gmra.mrb[76].mxu1 %v4395_v9  ;;  %v4540_v9 = vld [vmem:[#allocation3 + $0x30] sm:$0xff] }
 0x600   : > { %6339 = vmatprep.mubr.bf16.mxu1 %v12623_v15  ;;  %v9746_v15 = vld [vmem:[%s12416_s1 + $0x3d0] sm:$0xff]  }
 0x607   : > { %6340 = vmatmul.mubr.bf16.gmra.mrb[80].mxu1 %v4396_v41  ;;  %v9798_v41 = vld [vmem:[#allocation3 + $0x38] sm:$0xff] }
 0x608   : > { %6347 = vmatprep.mubr.bf16.mxu1 %v12624_v49  ;;  %v4593_v49 = vpack.c.bf16 %v9798_v41, %v4540_v9  ;;  %v9805_v9 = vld [vmem:[#allocation3 + $0x70] sm:$0xff] }
 0x60f   : > { %6348 = vmatmul.mubr.bf16.gmra.mrb[84].mxu1 %v4397_v17  ;;  %v12644_v17 = vld [vmem:[#allocation11_spill] sm:$0xff] }
 0x610   : > { %6355 = vmatprep.mubr.bf16.mxu1 %v12628_v40  ;;  %v12646_v33 = vpack.c.bf16 %v12644_v17, %v12645_v53  ;;  %v9747_v40 = vld [vmem:[%s12416_s1 + $0x3d8] sm:$0xff]  }
 0x611   : > { %v12657_v17 = vld [vmem:[#allocation28_spill] sm:$0xff] }
 0x617   : > { %6356 = vmatmul.mubr.bf16.gmra.mrb[88].mxu1 %v4398_v39  ;;  %v9748_v39 = vld [vmem:[%s12416_s1 + $0x3e0] sm:$0xff]  }
 0x618   : > { %6363 = vmatprep.mubr.bf16.mxu1 %v12633_v60  ;;  %v4594_v60 = vpack.c.bf16 %v9800_v27, %v9799_v29  ;;  %v9808_v29 = vld [vmem:[#allocation3 + $0x88] sm:$0xff] }
 0x61f   : > { %6364 = vmatmul.mubr.bf16.gmra.mrb[92].mxu1 %v4399_v47  ;;  %v12647_v47 = vld [vmem:[#allocation15_spill] sm:$0xff] }
 0x620   : > { %6371 = vmatprep.mubr.bf16.mxu1 %v12636_v45  ;;  %v12648_v45 = vld [vmem:[#allocation16_spill] sm:$0xff] }
 0x621   : > { %v12649_v20 = vpack.c.bf16 %v12647_v47, %v12648_v45  ;;  %v12660_v47 = vld [vmem:[#allocation32_spill] sm:$0xff] }
 0x627   : > { %6372 = vmatmul.mubr.bf16.gmra.mrb[96].mxu1 %v4400_v25  ;;  %v9749_v25 = vld [vmem:[%s12416_s1 + $0x3e8] sm:$0xff]  }
 0x628   : > { %6379 = vmatprep.mubr.bf16.mxu1 %v4509_v10  ;;  %v9750_v10 = vld [vmem:[%s12416_s1 + $0x3f0] sm:$0xff]  }
 0x62f   : > { %6380 = vmatmul.mubr.bf16.gmra.mrb[100].mxu1 %v4401_v6  ;;  %v9802_v6 = vld [vmem:[#allocation3 + $0x58] sm:$0xff] }
 0x630   : > { %6387 = vmatprep.mubr.bf16.mxu1 %v4510_v56  ;;  %v4595_v55 = vpack.c.bf16 %v9802_v6, %v9801_v7  ;;  %v12650_v56 = vld [vmem:[#allocation20_spill] sm:$0xff]  ;;  %v12662_v6 = vld [vmem:[#allocation35_spill] sm:$0xff] }
 0x637   : > { %6388 = vmatmul.mubr.bf16.gmra.mrb[104].mxu1 %v4402_v23  ;;  %v12651_v23 = vld [vmem:[#allocation19_spill] sm:$0xff] }
 0x638   : > { %6428 = vmatprep.mubr.bf16.mxu1 %v12640_v11  ;;  %v12652_v51 = vpack.c.bf16 %v12650_v56, %v12651_v23  ;;  %v9752_v11 = vld [vmem:[%s12416_s1 + $0x400] sm:$0xff]   ;;  %v9758_v23 = vld [vmem:[%s12416_s1 + $0x430] sm:$0xff]  }
 0x63f   : > { %6429 = vmatmul.mubr.bf16.vlgmr.msra.gmra.mrb[0].mxu1 %v4592_v12  ;;  %v12653_v12 = vld [vmem:[#allocation23_spill] sm:$0xff] }
 0x640   : > { %6436 = vmatprep.mubr.bf16.mxu1 %v12643_v48  ;;  %6646 = vmatpush1.bf16.msra.mxu1 %v9744_v35  ;;  %v4596_v35 = vpack.c.bf16 %v9804_v28, %v9803_v52  ;;  %v12655_v8 = vpack.c.bf16 %v12653_v12, %v12654_v46  ;;  %v9753_v48 = vld [vmem:[%s12416_s1 + $0x408] sm:$0xff]   ;;  %v12665_v52 = vld [vmem:[#allocation39_spill] sm:$0xff]  ;;  %v12666_v28 = vld [vmem:[#allocation41_spill] sm:$0xff] }
 0x641   : > { %6647 = vmatprep.subr.bf16.mxu1 %v12612_v57  ;;  %v9813_v12 = vld [vmem:[#allocation3 + $0xb0] sm:$0xff]  ;;  %v9814_v46 = vld [vmem:[#allocation3 + $0xb8] sm:$0xff] }
 0x644   : > { %6648 = vmatpush1.bf16.msra.mxu1 %v9745_v22  ;;  %v9754_v22 = vld [vmem:[%s12416_s1 + $0x410] sm:$0xff]  }
 0x645   : > { %6649 = vmatprep.subr.bf16.mxu1 %v12612_v57 }
 0x647   : > { %6437 = vmatmul.mubr.bf16.gmra.mrb[4].mxu1 %v4593_v49  ;;  %v12656_v49 = vld [vmem:[#allocation27_spill] sm:$0xff] }
 0x648   : > { %6444 = vmatprep.mubr.bf16.mxu1 %v12646_v33  ;;  %6650 = vmatpush1.bf16.msra.mxu1 %v9746_v15  ;;  %v9806_v15 = vld [vmem:[#allocation3 + $0x78] sm:$0xff]  ;;  %v12658_v53 = vpack.c.bf16 %v12656_v49, %v12657_v17  ;;  %v9755_v33 = vld [vmem:[%s12416_s1 + $0x418] sm:$0xff]  }
 0x649   : > { %6651 = vmatprep.subr.bf16.mxu1 %v12612_v57  ;;  %v4597_v41 = vpack.c.bf16 %v9806_v15, %v9805_v9  ;;  %v12020_v15 = vld [vmem:[#allocation2 + $0x8] sm:$0xff]  ;;  %v9817_v49 = vld [vmem:[#allocation3 + $0xc8] sm:$0xff] }
 0x64c   : > { %6652 = vmatpush1.bf16.msra.mxu1 %v9747_v40  ;;  %v9756_v40 = vld [vmem:[%s12416_s1 + $0x420] sm:$0xff]  }
 0x64d   : > { %6653 = vmatprep.subr.bf16.mxu1 %v12612_v57 }
 0x64f   : > { %6445 = vmatmul.mubr.bf16.gmra.mrb[8].mxu1 %v4594_v60  ;;  %v12659_v60 = vld [vmem:[#allocation31_spill] sm:$0xff] }
 0x650   : > { %6452 = vmatprep.mubr.bf16.mxu1 %v12649_v20  ;;  %6654 = vmatpush1.bf16.msra.mxu1 %v9748_v39  ;;  %v9807_v39 = vld [vmem:[#allocation3 + $0x80] sm:$0xff]  ;;  %v12661_v45 = vpack.c.bf16 %v12659_v60, %v12660_v47  ;;  %v9757_v20 = vld [vmem:[%s12416_s1 + $0x428] sm:$0xff]   ;;  %v12674_v60 = vpack.c.bf16 %v11462_v31, %v11470_v59  ;;  %v12677_v59 = vpack.c.bf16 %v11544_v16, %v11552_v21 }
 0x651   : > { %6655 = vmatprep.subr.bf16.mxu1 %v12612_v57  ;;  %v4598_v27 = vpack.c.bf16 %v9808_v29, %v9807_v39  ;;  %v9818_v39 = vld [vmem:[#allocation3 + $0xd0] sm:$0xff]  ;;  %v9819_v29 = vld [vmem:[#allocation3 + $0xd8] sm:$0xff]  ;;  %v9820_v47 = vld [vmem:[#allocation3 + $0xe0] sm:$0xff]  ;;  %v12681_v21 = vpack.c.bf16 %v11616_v42, %v11624_v5  ;;  %v12690_v5 = vpack.c.bf16 %v12634_v1, %v12630_v61  ;;  %v12698_v1 = vpack.c.bf16 %v11763_v26, %v11757_v37 }
 0x652   : > { %v12088_v37 = vld [vmem:[#allocation3 + $0x1c8] sm:$0xff]  ;;  %v12703_v26 = vld [vmem:[#allocation86_spill] sm:$0xff] }
 0x654   : > { %6656 = vmatpush1.bf16.msra.mxu1 %v9749_v25  ;;  %v9809_v25 = vld [vmem:[#allocation3 + $0x90] sm:$0xff] }
 0x655   : > { %6657 = vmatprep.subr.bf16.mxu1 %v12612_v57 }
 0x657   : > { %6453 = vmatmul.mubr.bf16.gmra.mrb[12].mxu1 %v4595_v55  ;;  %v12663_v55 = vld [vmem:[#allocation36_spill] sm:$0xff] }
 0x658   : > { %6460 = vmatprep.mubr.bf16.mxu1 %v12652_v51  ;;  %6658 = vmatpush1.bf16.msra.mxu1 %v9750_v10  ;;  %v9810_v10 = vld [vmem:[#allocation3 + $0x98] sm:$0xff]  ;;  %v12664_v56 = vpack.c.bf16 %v12662_v6, %v12663_v55  ;;  %v9811_v51 = vld [vmem:[#allocation3 + $0xa0] sm:$0xff]  ;;  %v12676_v55 = vpack.c.bf16 %v11510_v24, %v11528_v62  ;;  %v12679_v62 = vpack.c.bf16 %v11592_v50, %v11600_v18 }
 0x659   : > { %6659 = vmatprep.subr.bf16.mxu1 %v12612_v57  ;;  %v4599_v7 = vpack.c.bf16 %v9810_v10, %v9809_v25  ;;  %v12675_v25 = vpack.c.bf16 %v11486_v3, %v11494_v0  ;;  %v9822_v10 = vld [vmem:[#allocation3 + $0xf0] sm:$0xff]  ;;  %v12678_v0 = vpack.c.bf16 %v11568_v36, %v11576_v63  ;;  %v12684_v63 = vpack.c.bf16 %v11640_v58, %v11648_v34 }
 0x65a   : > { %v12687_v18 = vpack.c.bf16 %v12629_v43, %v12625_v44  ;;  %v12693_v34 = vpack.c.bf16 %v12637_v2, %v12635_v4  ;;  %v12696_v43 = vpack.c.bf16 %v11736_v30, %v11744_v54  ;;  %v4725_v2 = vpack.c.bf16 %v11782_v14, %v11920_v13  ;;  %v12700_v30 = vld [vmem:[#allocation84_spill] sm:$0xff]  ;;  %v12701_v54 = vld [vmem:[#allocation85_spill] sm:$0xff] }
 0x65b   : > { %v12705_v13 = vld [vmem:[#allocation9_spill] sm:$0xff] }
 0x65c   : > { %6660 = vmatpush1.bf16.msra.mxu1 %v9751_v19  ;;  %v9812_v19 = vld [vmem:[#allocation3 + $0xa8] sm:$0xff] }
 0x65d   : > { %6661 = vmatprep.subr.bf16.mxu1 %v12612_v57 }
 0x65f   : > { %6461 = vmatmul.mubr.bf16.gmra.mrb[16].mxu1 %v4596_v35  ;;  %v12667_v35 = vpack.c.bf16 %v12665_v52, %v12666_v28  ;;  %v9829_v52 = vld [vmem:[#allocation3 + $0x128] sm:$0xff]  ;;  %v9830_v28 = vld [vmem:[#allocation3 + $0x130] sm:$0xff] }
 0x660   : > { %6468 = vmatprep.mubr.bf16.mxu1 %v12655_v8  ;;  %6662 = vmatpush1.bf16.msra.mxu1 %v9752_v11  ;;  %v4600_v11 = vpack.c.bf16 %v9812_v19, %v9811_v51  ;;  %v4601_v8 = vpack.c.bf16 %v9814_v46, %v9813_v12  ;;  %v9826_v51 = vld [vmem:[#allocation3 + $0x110] sm:$0xff]  ;;  %v9827_v19 = vld [vmem:[#allocation3 + $0x118] sm:$0xff]  ;;  %v12683_v46 = vld [vmem:[#allocation64_spill] sm:$0xff] }
 0x661   : > { %6663 = vmatprep.subr.bf16.mxu1 %v12612_v57  ;;  %v4607_v3 = vpack.c.bf16 %v9827_v19, %v9826_v51  ;;  %v12682_v12 = vld [vmem:[#allocation61_spill] sm:$0xff]  ;;  %v9762_v51 = vld [vmem:[%s12416_s1 + $0x450] sm:$0xff]  }
 0x662   : > { %v4610_v36 = vpack.c.bf16 %v12683_v46, %v12682_v12 }
 0x664   : > { %6664 = vmatpush1.bf16.msra.mxu1 %v9753_v48  ;;  %v12668_v48 = vld [vmem:[#allocation43_spill] sm:$0xff] }
 0x665   : > { %6665 = vmatprep.subr.bf16.mxu1 %v12612_v57 }
 0x667   : > { %6469 = vmatmul.mubr.bf16.gmra.mrb[20].mxu1 %v4597_v41  ;;  %v9816_v41 = vld [vmem:[#allocation3 + $0xc0] sm:$0xff] }
 0x668   : > { %6476 = vmatprep.mubr.bf16.mxu1 %v12658_v53  ;;  %6666 = vmatpush1.bf16.msra.mxu1 %v9754_v22  ;;  %v12669_v22 = vld [vmem:[#allocation45_spill] sm:$0xff]  ;;  %v4602_v17 = vpack.c.bf16 %v9817_v49, %v9816_v41  ;;  %v12671_v53 = vld [vmem:[#allocation47_spill] sm:$0xff] }
 0x669   : > { %6667 = vmatprep.subr.bf16.mxu1 %v12612_v57  ;;  %v12670_v9 = vpack.c.bf16 %v12668_v48, %v12669_v22  ;;  %v12686_v48 = vld [vmem:[#allocation66_spill] sm:$0xff]  ;;  %v12688_v22 = vld [vmem:[#allocation65_spill] sm:$0xff]  ;;  %v12692_v41 = vld [vmem:[#allocation75_spill] sm:$0xff] }
 0x66a   : > { %v12694_v49 = vld [vmem:[#allocation73_spill] sm:$0xff] }
 0x66c   : > { %6668 = vmatpush1.bf16.msra.mxu1 %v9755_v33  ;;  %v12672_v33 = vld [vmem:[#allocation49_spill] sm:$0xff] }
 0x66d   : > { %6669 = vmatprep.subr.bf16.mxu1 %v12612_v57 }
 0x66f   : > { %6477 = vmatmul.mubr.bf16.gmra.mrb[24].mxu1 %v4598_v27  ;;  %v4603_v27 = vpack.c.bf16 %v9819_v29, %v9818_v39  ;;  %v4617_v39 = vpack.c.bf16 %v12701_v54, %v12700_v30  ;;  %v12702_v29 = vld [vmem:[#allocation87_spill] sm:$0xff] }
 0x670   : > { %6484 = vmatprep.mubr.bf16.mxu1 %v12661_v45  ;;  %6670 = vmatpush1.bf16.msra.mxu1 %v9756_v40  ;;  %v12673_v40 = vpack.c.bf16 %v12671_v53, %v12672_v33  ;;  %v9821_v45 = vld [vmem:[#allocation3 + $0xe8] sm:$0xff]  ;;  %v12697_v53 = vld [vmem:[#allocation79_spill] sm:$0xff] }
 0x671   : > { %6671 = vmatprep.subr.bf16.mxu1 %v12612_v57  ;;  %v4615_v61 = vpack.c.bf16 %v11746_v38, %v12697_v53  ;;  %v12699_v33 = vld [vmem:[#allocation83_spill] sm:$0xff] }
 0x672   : > { %v4616_v4 = vpack.c.bf16 %v11759_v32, %v12699_v33 }
 0x674   : > { %6672 = vmatpush1.bf16.msra.mxu1 %v9757_v20  ;;  %v4604_v20 = vpack.c.bf16 %v9821_v45, %v9820_v47  ;;  %v12704_v47 = vld [vmem:[#allocation10_spill] sm:$0xff] }
 0x675   : > { %6673 = vmatprep.subr.bf16.mxu1 %v12612_v57  ;;  %v12706_v45 = vpack.c.bf16 %v12704_v47, %v12705_v13  ;;  %v4764_v47 = vld [vmem:[#allocation3 + $0x87] sm:$0xff] }
 0x677   : > { %6485 = vmatmul.mubr.bf16.gmra.mrb[28].mxu1 %v4599_v7  ;;  %v9823_v7 = vld [vmem:[#allocation3 + $0xf8] sm:$0xff] }
 0x678   : > { %6492 = vmatprep.mubr.bf16.mxu1 %v12664_v56  ;;  %6674 = vmatpush1.bf16.msra.mxu1 %v9758_v23  ;;  %v4605_v6 = vpack.c.bf16 %v9823_v7, %v9822_v10  ;;  %v9824_v56 = vld [vmem:[#allocation3 + $0x100] sm:$0xff]  ;;  %v9825_v23 = vld [vmem:[#allocation3 + $0x108] sm:$0xff]  ;;  %v9760_v10 = vld [vmem:[%s12416_s1 + $0x440] sm:$0xff]  }
 0x679   : > { %6675 = vmatprep.subr.bf16.mxu1 %v12612_v57  ;;  %v9759_v57 = vld [vmem:[%s12416_s1 + $0x438] sm:$0xff]   ;;  %v4606_v31 = vpack.c.bf16 %v9825_v23, %v9824_v56  ;;  %v9761_v23 = vld [vmem:[%s12416_s1 + $0x448] sm:$0xff]  }
 0x67c   : > { %6676 = vmatpush1.bf16.msra.mxu1 %v9759_v57  ;;  %v12691_v57 = vld [vmem:[#allocation68_spill] sm:$0xff] }
 0x67d   : > { %8596 = vmatprep.subr.bf16.mxu1 %v12020_v15  ;;  %v4613_v58 = vpack.c.bf16 %v12692_v41, %v12691_v57 }
 0x67f   : > { %6493 = vmatmul.mubr.bf16.gmra.mrb[32].mxu1 %v4600_v11  ;;  %v9828_v11 = vld [vmem:[#allocation3 + $0x120] sm:$0xff] }
 0x680   : > { %6500 = vmatprep.mubr.bf16.mxu1 %v12667_v35  ;;  %v4608_v24 = vpack.c.bf16 %v9829_v52, %v9828_v11  ;;  %v12680_v35 = vld [vmem:[#allocation62_spill] sm:$0xff]  ;;  %v9763_v52 = vld [vmem:[%s12416_s1 + $0x458] sm:$0xff]  }
 0x681   : > { %v4609_v16 = vpack.c.bf16 %v12680_v35, %v9830_v28  ;;  %v9764_v28 = vld [vmem:[%s12416_s1 + $0x460] sm:$0xff]  }
 0x687   : > { %6501 = vmatmul.mubr.bf16.gmra.mrb[36].mxu1 %v4601_v8  ;;  %v12685_v8 = vld [vmem:[#allocation63_spill] sm:$0xff] }
 0x688   : > { %6508 = vmatprep.mubr.bf16.mxu1 %v12670_v9  ;;  %v4611_v50 = vpack.c.bf16 %v12686_v48, %v12685_v8  ;;  %v12689_v9 = vld [vmem:[#allocation70_spill] sm:$0xff] }
 0x689   : > { %v4612_v42 = vpack.c.bf16 %v12689_v9, %v12688_v22 }
 0x68f   : > { %6509 = vmatmul.mubr.bf16.gmra.mrb[40].mxu1 %v4602_v17  ;;  %v12695_v17 = vld [vmem:[#allocation81_spill] sm:$0xff] }
 0x690   : > { %6516 = vmatprep.mubr.bf16.mxu1 %v12673_v40  ;;  %v4614_v44 = vpack.c.bf16 %v12695_v17, %v12694_v49  ;;  %v12082_v40 = vld [vmem:[#allocation3 + $0x1c9] sm:$0xff] }
 0x697   : > { %6517 = vmatmul.mubr.bf16.gmra.mrb[44].mxu1 %v4603_v27  ;;  %v4726_v27 = vpack.c.bf16 %v12082_v40, %v12702_v29 }
 0x698   : > { %6524 = vmatprep.mubr.bf16.mxu1 %v12674_v60  ;;  %v4618_v60 = vpack.c.bf16 %v12088_v37, %v12703_v26 }
 0x69f   : > { %6525 = vmatmul.mubr.bf16.gmra.mrb[48].mxu1 %v4604_v20  ;;  %v4755_v20 = vld [vmem:[#allocation3 + $0x3f] sm:$0xff] }
 0x6a0   : > { %6532 = vmatprep.mubr.bf16.mxu1 %v12675_v25  ;;  %v4754_v25 = vld [vmem:[#allocation3 + $0x37] sm:$0xff] }
 0x6a1   : > { %v4808_v7 = vpack.c.bf16 %v4755_v20, %v4754_v25  ;;  %v12723_v20 = vld [vmem:[#allocation33_spill] sm:$0xff] }
 0x6a7   : > { %6533 = vmatmul.mubr.bf16.gmra.mrb[52].mxu1 %v4605_v6  ;;  %v12707_v6 = vld [vmem:[#allocation14_spill] sm:$0xff] }
 0x6a8   : > { %6540 = vmatprep.mubr.bf16.mxu1 %v12676_v55  ;;  %v12708_v55 = vld [vmem:[#allocation13_spill] sm:$0xff] }
 0x6a9   : > { %v12709_v56 = vpack.c.bf16 %v12707_v6, %v12708_v55  ;;  %v12725_v55 = vld [vmem:[#allocation38_spill] sm:$0xff] }
 0x6af   : > { %6541 = vmatmul.mubr.bf16.gmra.mrb[56].mxu1 %v4606_v31  ;;  %v4757_v31 = vld [vmem:[#allocation3 + $0x4f] sm:$0xff] }
 0x6b0   : > { %6548 = vmatprep.mubr.bf16.mxu1 %v12677_v59  ;;  %v4756_v59 = vld [vmem:[#allocation3 + $0x47] sm:$0xff] }
 0x6b1   : > { %v4809_v19 = vpack.c.bf16 %v4757_v31, %v4756_v59  ;;  %v4769_v31 = vld [vmem:[#allocation3 + $0xaf] sm:$0xff]  ;;  %v4768_v59 = vld [vmem:[#allocation3 + $0xa7] sm:$0xff] }
 0x6b7   : > { %6549 = vmatmul.mubr.bf16.gmra.mrb[60].mxu1 %v4607_v3  ;;  %v12710_v3 = vld [vmem:[#allocation18_spill] sm:$0xff] }
 0x6b8   : > { %6556 = vmatprep.mubr.bf16.mxu1 %v12678_v0  ;;  %v12711_v0 = vld [vmem:[#allocation17_spill] sm:$0xff] }
 0x6b9   : > { %v12712_v11 = vpack.c.bf16 %v12710_v3, %v12711_v0  ;;  %v12729_v3 = vld [vmem:[#allocation42_spill] sm:$0xff] }
 0x6bf   : > { %6557 = vmatmul.mubr.bf16.gmra.mrb[64].mxu1 %v4608_v24  ;;  %v4759_v24 = vld [vmem:[#allocation3 + $0x5f] sm:$0xff] }
 0x6c0   : > { %6564 = vmatprep.mubr.bf16.mxu1 %v12679_v62  ;;  %v4758_v62 = vld [vmem:[#allocation3 + $0x57] sm:$0xff] }
 0x6c7   : > { %6565 = vmatmul.mubr.bf16.gmra.mrb[68].mxu1 %v4609_v16  ;;  %v4810_v16 = vpack.c.bf16 %v4759_v24, %v4758_v62  ;;  %v4770_v24 = vld [vmem:[#allocation3 + $0xb7] sm:$0xff] }
 0x6c8   : > { %6572 = vmatprep.mubr.bf16.mxu1 %v12681_v21  ;;  %v12713_v21 = vld [vmem:[#allocation22_spill] sm:$0xff] }
 0x6cf   : > { %6573 = vmatmul.mubr.bf16.gmra.mrb[72].mxu1 %v4610_v36  ;;  %v12714_v36 = vld [vmem:[#allocation21_spill] sm:$0xff] }
 0x6d0   : > { %6580 = vmatprep.mubr.bf16.mxu1 %v12684_v63  ;;  %v12715_v63 = vpack.c.bf16 %v12713_v21, %v12714_v36  ;;  %v4773_v36 = vld [vmem:[#allocation3 + $0xcf] sm:$0xff] }
 0x6d7   : > { %6581 = vmatmul.mubr.bf16.gmra.mrb[76].mxu1 %v4611_v50  ;;  %v9765_v50 = vld [vmem:[%s12416_s1 + $0x468] sm:$0xff]  }
 0x6d8   : > { %6588 = vmatprep.mubr.bf16.mxu1 %v12687_v18  ;;  %v4761_v18 = vld [vmem:[#allocation3 + $0x6f] sm:$0xff] }
 0x6df   : > { %6589 = vmatmul.mubr.bf16.gmra.mrb[80].mxu1 %v4612_v42  ;;  %v4760_v42 = vld [vmem:[#allocation3 + $0x67] sm:$0xff] }
 0x6e0   : > { %6596 = vmatprep.mubr.bf16.mxu1 %v12690_v5  ;;  %v4811_v5 = vpack.c.bf16 %v4761_v18, %v4760_v42  ;;  %v12734_v18 = vld [vmem:[#allocation48_spill] sm:$0xff]  ;;  %v12735_v42 = vld [vmem:[#allocation50_spill] sm:$0xff] }
 0x6e7   : > { %6597 = vmatmul.mubr.bf16.gmra.mrb[84].mxu1 %v4613_v58  ;;  %v12716_v58 = vld [vmem:[#allocation26_spill] sm:$0xff] }
 0x6e8   : > { %6604 = vmatprep.mubr.bf16.mxu1 %v12693_v34  ;;  %v12717_v34 = vld [vmem:[#allocation25_spill] sm:$0xff] }
 0x6ef   : > { %6605 = vmatmul.mubr.bf16.gmra.mrb[88].mxu1 %v4614_v44  ;;  %v12718_v44 = vpack.c.bf16 %v12716_v58, %v12717_v34  ;;  %v4775_v58 = vld [vmem:[#allocation3 + $0xdf] sm:$0xff]  ;;  %v4774_v34 = vld [vmem:[#allocation3 + $0xd7] sm:$0xff] }
 0x6f0   : > { %6612 = vmatprep.mubr.bf16.mxu1 %v12696_v43  ;;  %v4763_v43 = vld [vmem:[#allocation3 + $0x7f] sm:$0xff] }
 0x6f7   : > { %6613 = vmatmul.mubr.bf16.gmra.mrb[92].mxu1 %v4615_v61  ;;  %v4762_v61 = vld [vmem:[#allocation3 + $0x77] sm:$0xff] }
 0x6f8   : > { %6620 = vmatprep.mubr.bf16.mxu1 %v12698_v1  ;;  %v4812_v1 = vpack.c.bf16 %v4763_v43, %v4762_v61  ;;  %v12737_v43 = vld [vmem:[#allocation51_spill] sm:$0xff]  ;;  %v12738_v61 = vld [vmem:[#allocation52_spill] sm:$0xff] }
 0x6ff   : > { %6621 = vmatmul.mubr.bf16.gmra.mrb[96].mxu1 %v4616_v4  ;;  %v12719_v4 = vld [vmem:[#allocation30_spill] sm:$0xff] }
 0x700   : > { %6628 = vmatprep.mubr.bf16.mxu1 %v4725_v2  ;;  %v12720_v2 = vld [vmem:[#allocation29_spill] sm:$0xff] }
 0x707   : > { %6629 = vmatmul.mubr.bf16.gmra.mrb[100].mxu1 %v4617_v39  ;;  %v12721_v39 = vpack.c.bf16 %v12719_v4, %v12720_v2  ;;  %v4777_v4 = vld [vmem:[#allocation3 + $0xef] sm:$0xff]  ;;  %v4776_v2 = vld [vmem:[#allocation3 + $0xe7] sm:$0xff] }
 0x708   : > { %6636 = vmatprep.mubr.bf16.mxu1 %v4726_v27  ;;  %v9766_v27 = vld [vmem:[%s12416_s1 + $0x470] sm:$0xff]  }
 0x70f   : > { %6637 = vmatmul.mubr.bf16.gmra.mrb[104].mxu1 %v4618_v60  ;;  %v4765_v60 = vld [vmem:[#allocation3 + $0x8f] sm:$0xff] }
 0x710   : > { %6677 = vmatprep.mubr.bf16.mxu1 %v12706_v45  ;;  %v4813_v13 = vpack.c.bf16 %v4765_v60, %v4764_v47  ;;  %v12722_v45 = vld [vmem:[#allocation34_spill] sm:$0xff] }
 0x711   : > { %v12724_v25 = vpack.c.bf16 %v12722_v45, %v12723_v20  ;;  %v12741_v60 = vld [vmem:[#allocation54_spill] sm:$0xff] }
 0x712   : > { %v4778_v45 = vld [vmem:[#allocation3 + $0xf7] sm:$0xff] }
 0x717   : > { %6678 = vmatmul.mubr.bf16.vlgmr.msra.gmra.mrb[0].mxu1 %v4808_v7  ;;  %v4766_v7 = vld [vmem:[#allocation3 + $0x97] sm:$0xff] }
 0x718   : > { %6685 = vmatprep.mubr.bf16.mxu1 %v12709_v56  ;;  %8597 = vmatpush3.bf16.msra.mxu1 %v9760_v10  ;;  %v4767_v10 = vld [vmem:[#allocation3 + $0x9f] sm:$0xff]  ;;  %v12726_v56 = vld [vmem:[#allocation37_spill] sm:$0xff] }
 0x719   : > { %8598 = vmatprep.subr.bf16.mxu1 %v12020_v15  ;;  %v4814_v6 = vpack.c.bf16 %v4767_v10, %v4766_v7  ;;  %v12744_v10 = vld [vmem:[#allocation56_spill] sm:$0xff] }
 0x71c   : > { %8599 = vmatpush3.bf16.msra.mxu1 %v9761_v23  ;;  %v12727_v23 = vpack.c.bf16 %v12725_v55, %v12726_v56  ;;  %v4780_v55 = vld [vmem:[#allocation3 + $0x107] sm:$0xff] }
 0x71d   : > { %8600 = vmatprep.subr.bf16.mxu1 %v12020_v15 }
 0x71f   : > { %6686 = vmatmul.mubr.bf16.gmra.mrb[4].mxu1 %v4809_v19  ;;  %v12728_v19 = vld [vmem:[#allocation40_spill] sm:$0xff] }
 0x720   : > { %6693 = vmatprep.mubr.bf16.mxu1 %v12712_v11  ;;  %8601 = vmatpush3.bf16.msra.mxu1 %v9762_v51  ;;  %v4815_v51 = vpack.c.bf16 %v4769_v31, %v4768_v59  ;;  %v12730_v0 = vpack.c.bf16 %v12728_v19, %v12729_v3  ;;  %v9767_v11 = vld [vmem:[%s12416_s1 + $0x478] sm:$0xff]   ;;  %v12747_v31 = vld [vmem:[#allocation58_spill] sm:$0xff] }
 0x721   : > { %8602 = vmatprep.subr.bf16.mxu1 %v12020_v15  ;;  %v4782_v19 = vld [vmem:[#allocation3 + $0x117] sm:$0xff] }
 0x724   : > { %8603 = vmatpush3.bf16.msra.mxu1 %v9763_v52  ;;  %v4771_v52 = vld [vmem:[#allocation3 + $0xbf] sm:$0xff] }
 0x725   : > { %8604 = vmatprep.subr.bf16.mxu1 %v12020_v15  ;;  %v4816_v62 = vpack.c.bf16 %v4771_v52, %v4770_v24  ;;  %v4785_v24 = vld [vmem:[#allocation3 + $0x12f] sm:$0xff] }
 0x727   : > { %6694 = vmatmul.mubr.bf16.gmra.mrb[8].mxu1 %v4810_v16  ;;  %v12732_v16 = vld [vmem:[#allocation46_spill] sm:$0xff] }
 0x728   : > { %6701 = vmatprep.mubr.bf16.mxu1 %v12715_v63  ;;  %8605 = vmatpush3.bf16.msra.mxu1 %v9764_v28  ;;  %v12731_v28 = vld [vmem:[#allocation44_spill] sm:$0xff] }
 0x729   : > { %8606 = vmatprep.subr.bf16.mxu1 %v12020_v15  ;;  %v12733_v21 = vpack.c.bf16 %v12731_v28, %v12732_v16  ;;  %v4772_v63 = vld [vmem:[#allocation3 + $0xc7] sm:$0xff]  ;;  %v12752_v16 = vpack.c.bf16 %v12682_v12, %v12680_v35  ;;  %v12755_v12 = vpack.c.bf16 %v12691_v57, %v12689_v9  ;;  %v12758_v57 = vpack.c.bf16 %v12699_v33, %v11746_v38 }
 0x72a   : > { %v4941_v33 = vpack.c.bf16 %v12020_v15, %v12088_v37 }
 0x72c   : > { %8607 = vmatpush3.bf16.msra.mxu1 %v9765_v50  ;;  %v4817_v50 = vpack.c.bf16 %v4773_v36, %v4772_v63  ;;  %v4786_v36 = vld [vmem:[#allocation3 + $0x137] sm:$0xff] }
 0x72d   : > { %8608 = vmatprep.subr.bf16.mxu1 %v12020_v15 }
 0x72f   : > { %6702 = vmatmul.mubr.bf16.gmra.mrb[12].mxu1 %v4811_v5  ;;  %v12736_v5 = vpack.c.bf16 %v12734_v18, %v12735_v42  ;;  %v4789_v18 = vld [vmem:[#allocation3 + $0x14f] sm:$0xff]  ;;  %v4788_v42 = vld [vmem:[#allocation3 + $0x147] sm:$0xff] }
 0x730   : > { %6709 = vmatprep.mubr.bf16.mxu1 %v12718_v44  ;;  %8609 = vmatpush3.bf16.msra.mxu1 %v9766_v27  ;;  %v4818_v44 = vpack.c.bf16 %v4775_v58, %v4774_v34  ;;  %v12740_v27 = vld [vmem:[#allocation53_spill] sm:$0xff]  ;;  %v12754_v58 = vpack.c.bf16 %v12688_v22, %v12686_v48  ;;  %v4791_v34 = vld [vmem:[#allocation3 + $0x15f] sm:$0xff]  ;;  %v12757_v22 = vpack.c.bf16 %v12697_v53, %v12695_v17 }
 0x731   : > { %8610 = vmatprep.subr.bf16.mxu1 %v12020_v15  ;;  %v12742_v47 = vpack.c.bf16 %v12740_v27, %v12741_v60  ;;  %v4799_v27 = vld [vmem:[#allocation3 + $0x19f] sm:$0xff]  ;;  %v4798_v60 = vld [vmem:[#allocation3 + $0x197] sm:$0xff]  ;;  %v12760_v53 = vpack.c.bf16 %v12703_v26, %v12701_v54 }
 0x732   : > { %v4971_v26 = vld [vmem:[#allocation3 + $0x41] sm:$0xff] }
 0x734   : > { %8611 = vmatpush3.bf16.msra.mxu1 %v9767_v11  ;;  %v12750_v11 = vld [vmem:[#allocation60_spill] sm:$0xff] }
 0x737   : > { %6710 = vmatmul.mubr.bf16.gmra.mrb[16].mxu1 %v4812_v1  ;;  %v12739_v1 = vpack.c.bf16 %v12737_v43, %v12738_v61  ;;  %v4793_v43 = vld [vmem:[#allocation3 + $0x16f] sm:$0xff]  ;;  %v4792_v61 = vld [vmem:[#allocation3 + $0x167] sm:$0xff] }
 0x738   : > { %6717 = vmatprep.mubr.bf16.mxu1 %v12721_v39  ;;  %v4819_v39 = vpack.c.bf16 %v4777_v4, %v4776_v2  ;;  %v4794_v4 = vld [vmem:[#allocation3 + $0x177] sm:$0xff]  ;;  %v4797_v2 = vld [vmem:[#allocation3 + $0x18f] sm:$0xff] }
 0x73f   : > { %6718 = vmatmul.mubr.bf16.gmra.mrb[20].mxu1 %v4813_v13  ;;  %v4779_v13 = vld [vmem:[#allocation3 + $0xff] sm:$0xff] }
 0x740   : > { %6725 = vmatprep.mubr.bf16.mxu1 %v12724_v25  ;;  %v4820_v20 = vpack.c.bf16 %v4779_v13, %v4778_v45  ;;  %v12743_v25 = vld [vmem:[#allocation55_spill] sm:$0xff] }
 0x741   : > { %v12745_v7 = vpack.c.bf16 %v12743_v25, %v12744_v10  ;;  %v4800_v13 = vld [vmem:[#allocation3 + $0x1a7] sm:$0xff]  ;;  %v4803_v45 = vld [vmem:[#allocation3 + $0x1bf] sm:$0xff]  ;;  %v4805_v10 = vld [vmem:[#allocation3 + $0x1cf] sm:$0xff] }
 0x742   : > { %v4804_v25 = vld [vmem:[#allocation3 + $0x1c7] sm:$0xff] }
 0x747   : > { %6726 = vmatmul.mubr.bf16.gmra.mrb[24].mxu1 %v4814_v6  ;;  %v4781_v6 = vld [vmem:[#allocation3 + $0x10f] sm:$0xff] }
 0x748   : > { %6733 = vmatprep.mubr.bf16.mxu1 %v12727_v23  ;;  %v4821_v56 = vpack.c.bf16 %v4781_v6, %v4780_v55  ;;  %v12746_v23 = vld [vmem:[#allocation57_spill] sm:$0xff]  ;;  %v4807_v6 = vld [vmem:[#allocation3 + $0x1df] sm:$0xff] }
 0x749   : > { %v12748_v59 = vpack.c.bf16 %v12746_v23, %v12747_v31  ;;  %v4970_v55 = vld [vmem:[#allocation3 + $0x39] sm:$0xff]  ;;  %v4972_v23 = vld [vmem:[#allocation3 + $0x49] sm:$0xff] }
 0x74a   : > { %v5024_v37 = vpack.c.bf16 %v4971_v26, %v4970_v55  ;;  %v5011_v26 = vld [vmem:[#allocation3 + $0x181] sm:$0xff]  ;;  %v5010_v55 = vld [vmem:[#allocation3 + $0x179] sm:$0xff] }
 0x74f   : > { %6734 = vmatmul.mubr.bf16.gmra.mrb[28].mxu1 %v4815_v51  ;;  %v4783_v51 = vld [vmem:[#allocation3 + $0x11f] sm:$0xff] }
 0x750   : > { %6741 = vmatprep.mubr.bf16.mxu1 %v12730_v0  ;;  %v4822_v3 = vpack.c.bf16 %v4783_v51, %v4782_v19  ;;  %v12749_v0 = vld [vmem:[#allocation59_spill] sm:$0xff] }
 0x751   : > { %v12751_v52 = vpack.c.bf16 %v12749_v0, %v12750_v11  ;;  %v4974_v51 = vld [vmem:[#allocation3 + $0x59] sm:$0xff]  ;;  %v4976_v0 = vld [vmem:[#allocation3 + $0x69] sm:$0xff] }
 0x757   : > { %6742 = vmatmul.mubr.bf16.gmra.mrb[32].mxu1 %v4816_v62  ;;  %v4784_v62 = vld [vmem:[#allocation3 + $0x127] sm:$0xff] }
 0x758   : > { %6749 = vmatprep.mubr.bf16.mxu1 %v12733_v21  ;;  %v4823_v28 = vpack.c.bf16 %v4785_v24, %v4784_v62  ;;  %v4787_v21 = vld [vmem:[#allocation3 + $0x13f] sm:$0xff] }
 0x759   : > { %v4824_v63 = vpack.c.bf16 %v4787_v21, %v4786_v36  ;;  %v4978_v24 = vld [vmem:[#allocation3 + $0x79] sm:$0xff]  ;;  %v4983_v36 = vld [vmem:[#allocation3 + $0xa1] sm:$0xff] }
 0x75f   : > { %6750 = vmatmul.mubr.bf16.gmra.mrb[36].mxu1 %v4817_v50  ;;  %v12753_v50 = vpack.c.bf16 %v12685_v8, %v12683_v46  ;;  %v4827_v46 = vpack.c.bf16 %v4793_v43, %v4792_v61  ;;  %v12756_v8 = vpack.c.bf16 %v12694_v49, %v12692_v41  ;;  %v4830_v41 = vpack.c.bf16 %v4799_v27, %v4798_v60  ;;  %v4991_v61 = vld [vmem:[#allocation3 + $0xe1] sm:$0xff] }
 0x760   : > { %6757 = vmatprep.mubr.bf16.mxu1 %v12736_v5  ;;  %v4825_v5 = vpack.c.bf16 %v4789_v18, %v4788_v42  ;;  %v12759_v49 = vpack.c.bf16 %v12700_v30, %v11759_v32  ;;  %v4942_v32 = vpack.c.bf16 %v12020_v15, %v12020_v15  ;;  %v4833_v30 = vpack.c.bf16 %v4805_v10, %v4804_v25  ;;  %v4985_v18 = vld [vmem:[#allocation3 + $0xb1] sm:$0xff]  ;;  %v4984_v42 = vld [vmem:[#allocation3 + $0xa9] sm:$0xff]  ;;  %v4999_v60 = vld [vmem:[#allocation3 + $0x121] sm:$0xff] }
 0x761   : > { %v5007_v10 = vld [vmem:[#allocation3 + $0x161] sm:$0xff] }
 0x767   : > { %6758 = vmatmul.mubr.bf16.gmra.mrb[40].mxu1 %v4818_v44  ;;  %v4790_v44 = vld [vmem:[#allocation3 + $0x157] sm:$0xff] }
 0x768   : > { %6765 = vmatprep.mubr.bf16.mxu1 %v12739_v1  ;;  %v4826_v35 = vpack.c.bf16 %v4791_v34, %v4790_v44  ;;  %v4795_v1 = vld [vmem:[#allocation3 + $0x17f] sm:$0xff] }
 0x769   : > { %v4828_v48 = vpack.c.bf16 %v4795_v1, %v4794_v4  ;;  %v4986_v34 = vld [vmem:[#allocation3 + $0xb9] sm:$0xff]  ;;  %v4993_v1 = vld [vmem:[#allocation3 + $0xf1] sm:$0xff]  ;;  %v4992_v4 = vld [vmem:[#allocation3 + $0xe9] sm:$0xff] }
 0x76f   : > { %6766 = vmatmul.mubr.bf16.gmra.mrb[44].mxu1 %v4819_v39  ;;  %v4796_v39 = vld [vmem:[#allocation3 + $0x187] sm:$0xff] }
 0x770   : > { %6773 = vmatprep.mubr.bf16.mxu1 %v12742_v47  ;;  %v4829_v9 = vpack.c.bf16 %v4797_v2, %v4796_v39  ;;  %v4801_v47 = vld [vmem:[#allocation3 + $0x1af] sm:$0xff]  ;;  %v4994_v2 = vld [vmem:[#allocation3 + $0xf9] sm:$0xff] }
 0x771   : > { %v4831_v17 = vpack.c.bf16 %v4801_v47, %v4800_v13  ;;  %v5001_v47 = vld [vmem:[#allocation3 + $0x131] sm:$0xff]  ;;  %v5000_v13 = vld [vmem:[#allocation3 + $0x129] sm:$0xff] }
 0x777   : > { %6774 = vmatmul.mubr.bf16.gmra.mrb[48].mxu1 %v4820_v20  ;;  %v4802_v20 = vld [vmem:[#allocation3 + $0x1b7] sm:$0xff] }
 0x778   : > { %6781 = vmatprep.mubr.bf16.mxu1 %v12745_v7  ;;  %v4832_v38 = vpack.c.bf16 %v4803_v45, %v4802_v20  ;;  %v4806_v7 = vld [vmem:[#allocation3 + $0x1d7] sm:$0xff] }
 0x779   : > { %v4834_v54 = vpack.c.bf16 %v4807_v6, %v4806_v7  ;;  %v5002_v45 = vld [vmem:[#allocation3 + $0x139] sm:$0xff]  ;;  %v5009_v7 = vld [vmem:[#allocation3 + $0x171] sm:$0xff]  ;;  %v5008_v6 = vld [vmem:[#allocation3 + $0x169] sm:$0xff] }
 0x77f   : > { %6782 = vmatmul.mubr.bf16.gmra.mrb[52].mxu1 %v4821_v56  ;;  %v4973_v56 = vld [vmem:[#allocation3 + $0x51] sm:$0xff] }
 0x780   : > { %6789 = vmatprep.mubr.bf16.mxu1 %v12748_v59  ;;  %v5025_v31 = vpack.c.bf16 %v4973_v56, %v4972_v23  ;;  %v4975_v59 = vld [vmem:[#allocation3 + $0x61] sm:$0xff]  ;;  %v5013_v56 = vld [vmem:[#allocation3 + $0x191] sm:$0xff]  ;;  %v5012_v23 = vld [vmem:[#allocation3 + $0x189] sm:$0xff] }
 0x781   : > { %v5026_v19 = vpack.c.bf16 %v4975_v59, %v4974_v51  ;;  %v5015_v59 = vld [vmem:[#allocation3 + $0x1a1] sm:$0xff]  ;;  %v5014_v51 = vld [vmem:[#allocation3 + $0x199] sm:$0xff] }
 0x787   : > { %6790 = vmatmul.mubr.bf16.gmra.mrb[56].mxu1 %v4822_v3  ;;  %v4977_v3 = vld [vmem:[#allocation3 + $0x71] sm:$0xff] }
 0x788   : > { %6797 = vmatprep.mubr.bf16.mxu1 %v12751_v52  ;;  %v5027_v11 = vpack.c.bf16 %v4977_v3, %v4976_v0  ;;  %v4979_v52 = vld [vmem:[#allocation3 + $0x81] sm:$0xff]  ;;  %v5017_v3 = vld [vmem:[#allocation3 + $0x1b1] sm:$0xff]  ;;  %v5016_v0 = vld [vmem:[#allocation3 + $0x1a9] sm:$0xff] }
 0x789   : > { %v5028_v62 = vpack.c.bf16 %v4979_v52, %v4978_v24  ;;  %v12761_v52 = vpack.c.bf16 %v12702_v29, %v11782_v14  ;;  %v5021_v24 = vld [vmem:[#allocation3 + $0x1d1] sm:$0xff] }
 0x78a   : > { %v12268_v14 = vld [vmem:[%s12418_s3 + $0x1] ss:$0 sm:$0xff] }
 0x78f   : > { %6798 = vmatmul.mubr.bf16.gmra.mrb[60].mxu1 %v4823_v28  ;;  %v4981_v28 = vld [vmem:[#allocation3 + $0x91] sm:$0xff] }
 0x790   : > { %6805 = vmatprep.mubr.bf16.mxu1 %v12752_v16  ;;  %v4980_v16 = vld [vmem:[#allocation3 + $0x89] sm:$0xff] }
 0x791   : > { %v5029_v21 = vpack.c.bf16 %v4981_v28, %v4980_v16  ;;  %v5022_v28 = vld [vmem:[#allocation3 + $0x1d9] sm:$0xff]  ;;  %v5023_v16 = vld [vmem:[#allocation3 + $0x1e1] sm:$0xff] }
 0x797   : > { %6806 = vmatmul.mubr.bf16.gmra.mrb[64].mxu1 %v4824_v63  ;;  %v4982_v63 = vld [vmem:[#allocation3 + $0x99] sm:$0xff] }
 0x798   : > { %6813 = vmatprep.mubr.bf16.mxu1 %v12753_v50  ;;  %v5030_v50 = vpack.c.bf16 %v4983_v36, %v4982_v63  ;;  %v12263_v36 = vld [vmem:[%s12417_s2 + $0x1] ss:$0 sm:$0xff] }
 0x79f   : > { %6814 = vmatmul.mubr.bf16.gmra.mrb[68].mxu1 %v4825_v5  ;;  %v5031_v5 = vpack.c.bf16 %v4985_v18, %v4984_v42 }
 0x7a0   : > { %6821 = vmatprep.mubr.bf16.mxu1 %v12754_v58  ;;  %v4987_v58 = vld [vmem:[#allocation3 + $0xc1] sm:$0xff] }
 0x7a1   : > { %v5032_v44 = vpack.c.bf16 %v4987_v58, %v4986_v34 }
 0x7a7   : > { %6822 = vmatmul.mubr.bf16.gmra.mrb[72].mxu1 %v4826_v35  ;;  %v4989_v35 = vld [vmem:[#allocation3 + $0xd1] sm:$0xff] }
 0x7a8   : > { %6829 = vmatprep.mubr.bf16.mxu1 %v12755_v12  ;;  %v4988_v12 = vld [vmem:[#allocation3 + $0xc9] sm:$0xff] }
 0x7a9   : > { %v5033_v43 = vpack.c.bf16 %v4989_v35, %v4988_v12 }
 0x7af   : > { %6830 = vmatmul.mubr.bf16.gmra.mrb[76].mxu1 %v4827_v46  ;;  %v4990_v46 = vld [vmem:[#allocation3 + $0xd9] sm:$0xff] }
 0x7b0   : > { %6837 = vmatprep.mubr.bf16.mxu1 %v12756_v8  ;;  %v5034_v8 = vpack.c.bf16 %v4991_v61, %v4990_v46 }
 0x7b7   : > { %6838 = vmatmul.mubr.bf16.gmra.mrb[80].mxu1 %v4828_v48  ;;  %v5035_v48 = vpack.c.bf16 %v4993_v1, %v4992_v4 }
 0x7b8   : > { %6845 = vmatprep.mubr.bf16.mxu1 %v12757_v22  ;;  %v4995_v22 = vld [vmem:[#allocation3 + $0x101] sm:$0xff] }
 0x7b9   : > { %v5036_v39 = vpack.c.bf16 %v4995_v22, %v4994_v2 }
 0x7bf   : > { %6846 = vmatmul.mubr.bf16.gmra.mrb[84].mxu1 %v4829_v9  ;;  %v4997_v9 = vld [vmem:[#allocation3 + $0x111] sm:$0xff] }
 0x7c0   : > { %6853 = vmatprep.mubr.bf16.mxu1 %v12758_v57  ;;  %v4996_v57 = vld [vmem:[#allocation3 + $0x109] sm:$0xff] }
 0x7c1   : > { %v5037_v27 = vpack.c.bf16 %v4997_v9, %v4996_v57 }
 0x7c7   : > { %6854 = vmatmul.mubr.bf16.gmra.mrb[88].mxu1 %v4830_v41  ;;  %v4998_v41 = vld [vmem:[#allocation3 + $0x119] sm:$0xff] }
 0x7c8   : > { %6861 = vmatprep.mubr.bf16.mxu1 %v12759_v49  ;;  %v5038_v49 = vpack.c.bf16 %v4999_v60, %v4998_v41 }
 0x7cf   : > { %6862 = vmatmul.mubr.bf16.gmra.mrb[92].mxu1 %v4831_v17  ;;  %v5039_v17 = vpack.c.bf16 %v5001_v47, %v5000_v13 }
 0x7d0   : > { %6869 = vmatprep.mubr.bf16.mxu1 %v12760_v53  ;;  %v5003_v53 = vld [vmem:[#allocation3 + $0x141] sm:$0xff] }
 0x7d1   : > { %v5040_v20 = vpack.c.bf16 %v5003_v53, %v5002_v45 }
 0x7d7   : > { %6870 = vmatmul.mubr.bf16.gmra.mrb[96].mxu1 %v4832_v38  ;;  %v5005_v38 = vld [vmem:[#allocation3 + $0x151] sm:$0xff] }
 0x7d8   : > { %6877 = vmatprep.mubr.bf16.mxu1 %v4941_v33  ;;  %v5004_v33 = vld [vmem:[#allocation3 + $0x149] sm:$0xff] }
 0x7d9   : > { %v5041_v25 = vpack.c.bf16 %v5005_v38, %v5004_v33 }
 0x7df   : > { %6878 = vmatmul.mubr.bf16.gmra.mrb[100].mxu1 %v4833_v30 }
 0x7e0   : > { %6885 = vmatprep.mubr.bf16.mxu1 %v4942_v32  ;;  %v5006_v32 = vld [vmem:[#allocation3 + $0x159] sm:$0xff] }
 0x7e1   : > { %v5042_v30 = vpack.c.bf16 %v5007_v10, %v5006_v32 }
 0x7e7   : > { %6886 = vmatmul.mubr.bf16.gmra.mrb[104].mxu1 %v4834_v54  ;;  %v5043_v54 = vpack.c.bf16 %v5009_v7, %v5008_v6 }
 0x7e8   : > { %8612 = vmatprep.mubr.msk.bf16.mxu1 %vm9842_vm0, %v12020_v15 }
 0x7ef   : > { %8613 = vmatmul.mubr.bf16.vlgmr.msra.gmra.mrb[0].mxu1 %v5024_v37  ;;  %v5044_v37 = vpack.c.bf16 %v5011_v26, %v5010_v55 }
 0x7f0   : > { %8616 = vmatprep.mubr.msk.bf16.mxu1 %vm9842_vm0, %v12020_v15 }
 0x7f7   : > { %8617 = vmatmul.mubr.bf16.gmra.mrb[4].mxu1 %v5025_v31  ;;  %v5045_v31 = vpack.c.bf16 %v5013_v56, %v5012_v23 }
 0x7f8   : > { %8620 = vmatprep.mubr.msk.bf16.mxu1 %vm9842_vm0, %v12020_v15 }
 0x7ff   : > { %8621 = vmatmul.mubr.bf16.gmra.mrb[8].mxu1 %v5026_v19  ;;  %v5046_v19 = vpack.c.bf16 %v5015_v59, %v5014_v51 }
 0x800   : > { %8624 = vmatprep.mubr.msk.bf16.mxu1 %vm9842_vm0, %v12020_v15 }
 0x807   : > { %8625 = vmatmul.mubr.bf16.gmra.mrb[12].mxu1 %v5027_v11  ;;  %v5047_v11 = vpack.c.bf16 %v5017_v3, %v5016_v0 }
 0x808   : > { %8628 = vmatprep.mubr.msk.bf16.mxu1 %vm9842_vm0, %v12020_v15 }
 0x80f   : > { %8629 = vmatmul.mubr.bf16.gmra.mrb[16].mxu1 %v5028_v62  ;;  %v5049_v62 = vpack.c.bf16 %v5021_v24, %v12082_v40 }
 0x810   : > { %8632 = vmatprep.mubr.msk.bf16.mxu1 %vm9842_vm0, %v12020_v15 }
 0x817   : > { %8633 = vmatmul.mubr.bf16.gmra.mrb[20].mxu1 %v5029_v21  ;;  %v5050_v21 = vpack.c.bf16 %v5023_v16, %v5022_v28 }
 0x818   : > { %8636 = vmatprep.mubr.msk.bf16.mxu1 %vm9842_vm0, %v12020_v15 }
 0x81f   : > { %8637 = vmatmul.mubr.bf16.gmra.mrb[24].mxu1 %v5030_v50 }
 0x820   : > { %8640 = vmatprep.mubr.msk.bf16.mxu1 %vm9842_vm0, %v12020_v15 }
 0x827   : > { %8641 = vmatmul.mubr.bf16.gmra.mrb[28].mxu1 %v5031_v5 }
 0x828   : > { %8644 = vmatprep.mubr.msk.bf16.mxu1 %vm9842_vm0, %v12020_v15 }
 0x82f   : > { %8645 = vmatmul.mubr.bf16.gmra.mrb[32].mxu1 %v5032_v44 }
 0x830   : > { %8648 = vmatprep.mubr.msk.bf16.mxu1 %vm9842_vm0, %v12020_v15 }
 0x837   : > { %8649 = vmatmul.mubr.bf16.gmra.mrb[36].mxu1 %v5033_v43 }
 0x838   : > { %8652 = vmatprep.mubr.msk.bf16.mxu1 %vm9842_vm0, %v12020_v15 }
 0x83f   : > { %8653 = vmatmul.mubr.bf16.gmra.mrb[40].mxu1 %v5034_v8 }
 0x840   : > { %8656 = vmatprep.mubr.msk.bf16.mxu1 %vm9842_vm0, %v12020_v15 }
 0x847   : > { %8657 = vmatmul.mubr.bf16.gmra.mrb[44].mxu1 %v5035_v48 }
 0x848   : > { %8660 = vmatprep.mubr.msk.bf16.mxu1 %vm9842_vm0, %v12020_v15 }
 0x84f   : > { %8661 = vmatmul.mubr.bf16.gmra.mrb[48].mxu1 %v5036_v39 }
 0x850   : > { %8664 = vmatprep.mubr.msk.bf16.mxu1 %vm9842_vm0, %v12020_v15 }
 0x857   : > { %8665 = vmatmul.mubr.bf16.gmra.mrb[52].mxu1 %v5037_v27 }
 0x858   : > { %8668 = vmatprep.mubr.msk.bf16.mxu1 %vm9842_vm0, %v12020_v15 }
 0x85f   : > { %8669 = vmatmul.mubr.bf16.gmra.mrb[56].mxu1 %v5038_v49 }
 0x860   : > { %8672 = vmatprep.mubr.msk.bf16.mxu1 %vm9842_vm0, %v12020_v15 }
 0x867   : > { %8673 = vmatmul.mubr.bf16.gmra.mrb[60].mxu1 %v5039_v17 }
 0x868   : > { %8676 = vmatprep.mubr.msk.bf16.mxu1 %vm9842_vm0, %v12020_v15 }
 0x86f   : > { %8677 = vmatmul.mubr.bf16.gmra.mrb[64].mxu1 %v5040_v20 }
 0x870   : > { %8680 = vmatprep.mubr.msk.bf16.mxu1 %vm9842_vm0, %v12020_v15 }
 0x877   : > { %8681 = vmatmul.mubr.bf16.gmra.mrb[68].mxu1 %v5041_v25 }
 0x878   : > { %8684 = vmatprep.mubr.msk.bf16.mxu1 %vm9842_vm0, %v12020_v15 }
 0x87f   : > { %8685 = vmatmul.mubr.bf16.gmra.mrb[72].mxu1 %v5042_v30 }
 0x880   : > { %8688 = vmatprep.mubr.msk.bf16.mxu1 %vm9842_vm0, %v12020_v15 }
 0x887   : > { %8689 = vmatmul.mubr.bf16.gmra.mrb[76].mxu1 %v5043_v54 }
 0x888   : > { %8692 = vmatprep.mubr.msk.bf16.mxu1 %vm9842_vm0, %v12020_v15 }
 0x88f   : > { %8693 = vmatmul.mubr.bf16.gmra.mrb[80].mxu1 %v5044_v37 }
 0x890   : > { %8696 = vmatprep.mubr.msk.bf16.mxu1 %vm9842_vm0, %v12020_v15 }
 0x897   : > { %8697 = vmatmul.mubr.bf16.gmra.mrb[84].mxu1 %v5045_v31 }
 0x898   : > { %8700 = vmatprep.mubr.msk.bf16.mxu1 %vm9842_vm0, %v12020_v15 }
 0x89f   : > { %8701 = vmatmul.mubr.bf16.gmra.mrb[88].mxu1 %v5046_v19 }
 0x8a0   : > { %8704 = vmatprep.mubr.msk.bf16.mxu1 %vm9842_vm0, %v12020_v15 }
 0x8a7   : > { %8705 = vmatmul.mubr.bf16.gmra.mrb[92].mxu1 %v5047_v11 }
 0x8a8   : > { %8708 = vmatprep.mubr.msk.bf16.mxu1 %vm9842_vm0, %v12020_v15 }
 0x8af   : > { %8709 = vmatmul.mubr.bf16.gmra.mrb[96].mxu1 %v12761_v52 }
 0x8b0   : > { %8712 = vmatprep.mubr.msk.bf16.mxu1 %vm9842_vm0, %v12020_v15 }
 0x8b7   : > { %8713 = vmatmul.mubr.bf16.gmra.mrb[100].mxu1 %v5049_v62 }
 0x8b8   : > { %8716 = vmatprep.mubr.msk.bf16.mxu1 %vm9842_vm0, %v12020_v15 }
 0x8bf   : > { %8717 = vmatmul.mubr.bf16.gmra.mrb[104].mxu1 %v5050_v21 }
 0x8c2   : > { %v6928_v40 = vpop.f32.mrb[0].mxu1 }
 0x8c3   : > { %v7149_v29 = vmul.f32 %v12263_v36, %v6928_v40  ;;  %v8614_v63 = vpop.f32.mrb[1].mxu1 }
 0x8c4   : > { %v6931_v15 = vpop.f32.mrb[2].mxu1 }
 0x8c5   : > { %v7209_v50 = vadd.f32 %v12268_v14, %v7149_v29  ;;  %v7150_v18 = vmul.f32 %v12263_v36, %v6931_v15  ;;  %v8615_v42 = vpop.f32.mrb[3].mxu1 }
 0x8c7   : > { %v7263_v5 = vmul.f32 0.01, %v7209_v50  ;;  %v7210_v58 = vadd.f32 %v12268_v14, %v7150_v18 }
 0x8c9   : > { %v7264_v34 = vmul.f32 0.01, %v7210_v58  ;;  %v7317_v35 = vmax.f32 %v7209_v50, %v7263_v5 }
 0x8ca   : > { %v6936_v44 = vpop.f32.mrb[4].mxu1 }
 0x8cb   : > { %v7318_v12 = vmax.f32 %v7210_v58, %v7264_v34  ;;  %v7151_v43 = vmul.f32 %v12263_v36, %v6936_v44  ;;  %v8618_v61 = vpop.f32.mrb[5].mxu1 }
 0x8cc   : > { %v6939_v46 = vpop.f32.mrb[6].mxu1 }
 0x8cd   : > { %v8218_v8 = vpack.c.bf16 %v7318_v12, %v7317_v35  ;;  %v7211_v1 = vadd.f32 %v12268_v14, %v7151_v43  ;;  %v7152_v4 = vmul.f32 %v12263_v36, %v6939_v46  ;;  %v8619_v48 = vpop.f32.mrb[7].mxu1 }
 0x8cf   : > { %8219 = vst [vmem:[%s12280_s20] sm:$0xff] %v8218_v8   ;;  %v7265_v22 = vmul.f32 0.01, %v7211_v1  ;;  %v7212_v2 = vadd.f32 %v12268_v14, %v7152_v4 }
 0x8d1   : > { %v7266_v39 = vmul.f32 0.01, %v7212_v2  ;;  %v7319_v57 = vmax.f32 %v7211_v1, %v7265_v22 }
 0x8d2   : > { %v6944_v9 = vpop.f32.mrb[8].mxu1 }
 0x8d3   : > { %v7320_v27 = vmax.f32 %v7212_v2, %v7266_v39  ;;  %v7153_v60 = vmul.f32 %v12263_v36, %v6944_v9  ;;  %v8622_v41 = vpop.f32.mrb[9].mxu1 }
 0x8d4   : > { %v6947_v49 = vpop.f32.mrb[10].mxu1 }
 0x8d5   : > { %v8223_v47 = vpack.c.bf16 %v7320_v27, %v7319_v57  ;;  %v7213_v13 = vadd.f32 %v12268_v14, %v7153_v60  ;;  %v7154_v17 = vmul.f32 %v12263_v36, %v6947_v49  ;;  %v8623_v53 = vpop.f32.mrb[11].mxu1 }
 0x8d7   : > { %8376 = vst [vmem:[%s12280_s20 + $0x8] sm:$0xff] %v8223_v47   ;;  %v7267_v45 = vmul.f32 0.01, %v7213_v13  ;;  %v7214_v20 = vadd.f32 %v12268_v14, %v7154_v17 }
 0x8d9   : > { %v7268_v38 = vmul.f32 0.01, %v7214_v20  ;;  %v7321_v25 = vmax.f32 %v7213_v13, %v7267_v45 }
 0x8da   : > { %v6952_v33 = vpop.f32.mrb[12].mxu1 }
 0x8db   : > { %v7322_v10 = vmax.f32 %v7214_v20, %v7268_v38  ;;  %v7155_v32 = vmul.f32 %v12263_v36, %v6952_v33  ;;  %v8626_v30 = vpop.f32.mrb[13].mxu1 }
 0x8dc   : > { %v6955_v7 = vpop.f32.mrb[14].mxu1 }
 0x8dd   : > { %v8228_v6 = vpack.c.bf16 %v7322_v10, %v7321_v25  ;;  %v7215_v54 = vadd.f32 %v12268_v14, %v7155_v32  ;;  %v7156_v26 = vmul.f32 %v12263_v36, %v6955_v7  ;;  %v8627_v55 = vpop.f32.mrb[15].mxu1 }
 0x8df   : > { %8377 = vst [vmem:[%s12280_s20 + $0x10] sm:$0xff] %v8228_v6   ;;  %v7269_v37 = vmul.f32 0.01, %v7215_v54  ;;  %v7216_v56 = vadd.f32 %v12268_v14, %v7156_v26 }
 0x8e1   : > { %v7270_v23 = vmul.f32 0.01, %v7216_v56  ;;  %v7323_v59 = vmax.f32 %v7215_v54, %v7269_v37 }
 0x8e2   : > { %v6960_v31 = vpop.f32.mrb[16].mxu1 }
 0x8e3   : > { %v7324_v51 = vmax.f32 %v7216_v56, %v7270_v23  ;;  %v7157_v19 = vmul.f32 %v12263_v36, %v6960_v31  ;;  %v8630_v3 = vpop.f32.mrb[17].mxu1 }
 0x8e4   : > { %v6963_v0 = vpop.f32.mrb[18].mxu1 }
 0x8e5   : > { %v8233_v11 = vpack.c.bf16 %v7324_v51, %v7323_v59  ;;  %v7217_v52 = vadd.f32 %v12268_v14, %v7157_v19  ;;  %v7158_v24 = vmul.f32 %v12263_v36, %v6963_v0  ;;  %v8631_v62 = vpop.f32.mrb[19].mxu1 }
 0x8e7   : > { %8378 = vst [vmem:[%s12280_s20 + $0x18] sm:$0xff] %v8233_v11   ;;  %v7271_v28 = vmul.f32 0.01, %v7217_v52  ;;  %v7218_v16 = vadd.f32 %v12268_v14, %v7158_v24 }
 0x8e9   : > { %v7272_v21 = vmul.f32 0.01, %v7218_v16  ;;  %v7325_v29 = vmax.f32 %v7217_v52, %v7271_v28 }
 0x8ea   : > { %v6968_v40 = vpop.f32.mrb[20].mxu1 }
 0x8eb   : > { %v7326_v63 = vmax.f32 %v7218_v16, %v7272_v21  ;;  %v7159_v15 = vmul.f32 %v12263_v36, %v6968_v40  ;;  %v8634_v50 = vpop.f32.mrb[21].mxu1 }
 0x8ec   : > { %v6971_v18 = vpop.f32.mrb[22].mxu1 }
 0x8ed   : > { %v8238_v42 = vpack.c.bf16 %v7326_v63, %v7325_v29  ;;  %v7219_v5 = vadd.f32 %v12268_v14, %v7159_v15  ;;  %v7160_v58 = vmul.f32 %v12263_v36, %v6971_v18  ;;  %v8635_v34 = vpop.f32.mrb[23].mxu1 }
 0x8ef   : > { %8379 = vst [vmem:[%s12280_s20 + $0x20] sm:$0xff] %v8238_v42   ;;  %v7273_v44 = vmul.f32 0.01, %v7219_v5  ;;  %v7220_v35 = vadd.f32 %v12268_v14, %v7160_v58 }
 0x8f1   : > { %v7274_v12 = vmul.f32 0.01, %v7220_v35  ;;  %v7327_v61 = vmax.f32 %v7219_v5, %v7273_v44 }
 0x8f2   : > { %v6976_v43 = vpop.f32.mrb[24].mxu1 }
 0x8f3   : > { %v7328_v46 = vmax.f32 %v7220_v35, %v7274_v12  ;;  %v7161_v8 = vmul.f32 %v12263_v36, %v6976_v43  ;;  %v8638_v1 = vpop.f32.mrb[25].mxu1 }
 0x8f4   : > { %v6979_v4 = vpop.f32.mrb[26].mxu1 }
 0x8f5   : > { %v8243_v48 = vpack.c.bf16 %v7328_v46, %v7327_v61  ;;  %v7221_v22 = vadd.f32 %v12268_v14, %v7161_v8  ;;  %v7162_v2 = vmul.f32 %v12263_v36, %v6979_v4  ;;  %v8639_v39 = vpop.f32.mrb[27].mxu1 }
 0x8f7   : > { %8380 = vst [vmem:[%s12280_s20 + $0x28] sm:$0xff] %v8243_v48   ;;  %v7275_v9 = vmul.f32 0.01, %v7221_v22  ;;  %v7222_v57 = vadd.f32 %v12268_v14, %v7162_v2 }
 0x8f9   : > { %v7276_v27 = vmul.f32 0.01, %v7222_v57  ;;  %v7329_v41 = vmax.f32 %v7221_v22, %v7275_v9 }
 0x8fa   : > { %v6984_v60 = vpop.f32.mrb[28].mxu1 }
 0x8fb   : > { %v7330_v49 = vmax.f32 %v7222_v57, %v7276_v27  ;;  %v7163_v47 = vmul.f32 %v12263_v36, %v6984_v60  ;;  %v8642_v13 = vpop.f32.mrb[29].mxu1 }
 0x8fc   : > { %v6987_v17 = vpop.f32.mrb[30].mxu1 }
 0x8fd   : > { %v8248_v53 = vpack.c.bf16 %v7330_v49, %v7329_v41  ;;  %v7223_v45 = vadd.f32 %v12268_v14, %v7163_v47  ;;  %v7164_v20 = vmul.f32 %v12263_v36, %v6987_v17  ;;  %v8643_v38 = vpop.f32.mrb[31].mxu1 }
 0x8ff   : > { %8381 = vst [vmem:[%s12280_s20 + $0x30] sm:$0xff] %v8248_v53   ;;  %v7277_v33 = vmul.f32 0.01, %v7223_v45  ;;  %v7224_v25 = vadd.f32 %v12268_v14, %v7164_v20 }
 0x901   : > { %v7278_v10 = vmul.f32 0.01, %v7224_v25  ;;  %v7331_v30 = vmax.f32 %v7223_v45, %v7277_v33 }
 0x902   : > { %v6992_v32 = vpop.f32.mrb[32].mxu1 }
 0x903   : > { %v7332_v7 = vmax.f32 %v7224_v25, %v7278_v10  ;;  %v7165_v6 = vmul.f32 %v12263_v36, %v6992_v32  ;;  %v8646_v54 = vpop.f32.mrb[33].mxu1 }
 0x904   : > { %v6995_v26 = vpop.f32.mrb[34].mxu1 }
 0x905   : > { %v8253_v55 = vpack.c.bf16 %v7332_v7, %v7331_v30  ;;  %v7225_v37 = vadd.f32 %v12268_v14, %v7165_v6  ;;  %v7166_v56 = vmul.f32 %v12263_v36, %v6995_v26  ;;  %v8647_v23 = vpop.f32.mrb[35].mxu1 }
 0x907   : > { %8382 = vst [vmem:[%s12280_s20 + $0x38] sm:$0xff] %v8253_v55   ;;  %v7279_v31 = vmul.f32 0.01, %v7225_v37  ;;  %v7226_v59 = vadd.f32 %v12268_v14, %v7166_v56 }
 0x909   : > { %v7280_v51 = vmul.f32 0.01, %v7226_v59  ;;  %v7333_v3 = vmax.f32 %v7225_v37, %v7279_v31 }
 0x90a   : > { %v7000_v19 = vpop.f32.mrb[36].mxu1 }
 0x90b   : > { %v7334_v0 = vmax.f32 %v7226_v59, %v7280_v51  ;;  %v7167_v11 = vmul.f32 %v12263_v36, %v7000_v19  ;;  %v8650_v52 = vpop.f32.mrb[37].mxu1 }
 0x90c   : > { %v7003_v24 = vpop.f32.mrb[38].mxu1 }
 0x90d   : > { %v8258_v62 = vpack.c.bf16 %v7334_v0, %v7333_v3  ;;  %v7227_v28 = vadd.f32 %v12268_v14, %v7167_v11  ;;  %v7168_v16 = vmul.f32 %v12263_v36, %v7003_v24  ;;  %v8651_v21 = vpop.f32.mrb[39].mxu1 }
 0x90f   : > { %8383 = vst [vmem:[%s12280_s20 + $0x40] sm:$0xff] %v8258_v62   ;;  %v7281_v40 = vmul.f32 0.01, %v7227_v28  ;;  %v7228_v29 = vadd.f32 %v12268_v14, %v7168_v16 }
 0x911   : > { %v7282_v63 = vmul.f32 0.01, %v7228_v29  ;;  %v7335_v50 = vmax.f32 %v7227_v28, %v7281_v40 }
 0x912   : > { %v7008_v15 = vpop.f32.mrb[40].mxu1 }
 0x913   : > { %v7336_v18 = vmax.f32 %v7228_v29, %v7282_v63  ;;  %v7169_v42 = vmul.f32 %v12263_v36, %v7008_v15  ;;  %v8654_v5 = vpop.f32.mrb[41].mxu1 }
 0x914   : > { %v7011_v58 = vpop.f32.mrb[42].mxu1 }
 0x915   : > { %v8263_v34 = vpack.c.bf16 %v7336_v18, %v7335_v50  ;;  %v7229_v44 = vadd.f32 %v12268_v14, %v7169_v42  ;;  %v7170_v35 = vmul.f32 %v12263_v36, %v7011_v58  ;;  %v8655_v12 = vpop.f32.mrb[43].mxu1 }
 0x917   : > { %8384 = vst [vmem:[%s12280_s20 + $0x48] sm:$0xff] %v8263_v34   ;;  %v7283_v43 = vmul.f32 0.01, %v7229_v44  ;;  %v7230_v61 = vadd.f32 %v12268_v14, %v7170_v35 }
 0x919   : > { %v7284_v46 = vmul.f32 0.01, %v7230_v61  ;;  %v7337_v1 = vmax.f32 %v7229_v44, %v7283_v43 }
 0x91a   : > { %v7016_v8 = vpop.f32.mrb[44].mxu1 }
 0x91b   : > { %v7338_v4 = vmax.f32 %v7230_v61, %v7284_v46  ;;  %v7171_v48 = vmul.f32 %v12263_v36, %v7016_v8  ;;  %v8658_v22 = vpop.f32.mrb[45].mxu1 }
 0x91c   : > { %v7019_v2 = vpop.f32.mrb[46].mxu1 }
 0x91d   : > { %v8268_v39 = vpack.c.bf16 %v7338_v4, %v7337_v1  ;;  %v7231_v9 = vadd.f32 %v12268_v14, %v7171_v48  ;;  %v7172_v57 = vmul.f32 %v12263_v36, %v7019_v2  ;;  %v8659_v27 = vpop.f32.mrb[47].mxu1 }
 0x91f   : > { %8385 = vst [vmem:[%s12280_s20 + $0x50] sm:$0xff] %v8268_v39   ;;  %v7285_v60 = vmul.f32 0.01, %v7231_v9  ;;  %v7232_v41 = vadd.f32 %v12268_v14, %v7172_v57 }
 0x921   : > { %v7286_v49 = vmul.f32 0.01, %v7232_v41  ;;  %v7339_v13 = vmax.f32 %v7231_v9, %v7285_v60 }
 0x922   : > { %v7024_v47 = vpop.f32.mrb[48].mxu1 }
 0x923   : > { %v7340_v17 = vmax.f32 %v7232_v41, %v7286_v49  ;;  %v7173_v53 = vmul.f32 %v12263_v36, %v7024_v47  ;;  %v8662_v45 = vpop.f32.mrb[49].mxu1 }
 0x924   : > { %v7027_v20 = vpop.f32.mrb[50].mxu1 }
 0x925   : > { %v8273_v38 = vpack.c.bf16 %v7340_v17, %v7339_v13  ;;  %v7233_v33 = vadd.f32 %v12268_v14, %v7173_v53  ;;  %v7174_v25 = vmul.f32 %v12263_v36, %v7027_v20  ;;  %v8663_v10 = vpop.f32.mrb[51].mxu1 }
 0x927   : > { %8386 = vst [vmem:[%s12280_s20 + $0x58] sm:$0xff] %v8273_v38   ;;  %v7287_v32 = vmul.f32 0.01, %v7233_v33  ;;  %v7234_v30 = vadd.f32 %v12268_v14, %v7174_v25 }
 0x929   : > { %v7288_v7 = vmul.f32 0.01, %v7234_v30  ;;  %v7341_v54 = vmax.f32 %v7233_v33, %v7287_v32 }
 0x92a   : > { %v7032_v6 = vpop.f32.mrb[52].mxu1 }
 0x92b   : > { %v7342_v26 = vmax.f32 %v7234_v30, %v7288_v7  ;;  %v7175_v55 = vmul.f32 %v12263_v36, %v7032_v6  ;;  %v8666_v37 = vpop.f32.mrb[53].mxu1 }
 0x92c   : > { %v7035_v56 = vpop.f32.mrb[54].mxu1 }
 0x92d   : > { %v8278_v23 = vpack.c.bf16 %v7342_v26, %v7341_v54  ;;  %v7235_v31 = vadd.f32 %v12268_v14, %v7175_v55  ;;  %v7176_v59 = vmul.f32 %v12263_v36, %v7035_v56  ;;  %v8667_v51 = vpop.f32.mrb[55].mxu1 }
 0x92f   : > { %8387 = vst [vmem:[%s12280_s20 + $0x60] sm:$0xff] %v8278_v23   ;;  %v7289_v19 = vmul.f32 0.01, %v7235_v31  ;;  %v7236_v3 = vadd.f32 %v12268_v14, %v7176_v59 }
 0x931   : > { %v7290_v0 = vmul.f32 0.01, %v7236_v3  ;;  %v7343_v52 = vmax.f32 %v7235_v31, %v7289_v19 }
 0x932   : > { %v7040_v11 = vpop.f32.mrb[56].mxu1 }
 0x933   : > { %v7344_v24 = vmax.f32 %v7236_v3, %v7290_v0  ;;  %v7177_v62 = vmul.f32 %v12263_v36, %v7040_v11  ;;  %v8670_v28 = vpop.f32.mrb[57].mxu1 }
 0x934   : > { %v7043_v16 = vpop.f32.mrb[58].mxu1 }
 0x935   : > { %v8283_v21 = vpack.c.bf16 %v7344_v24, %v7343_v52  ;;  %v7237_v40 = vadd.f32 %v12268_v14, %v7177_v62  ;;  %v7178_v29 = vmul.f32 %v12263_v36, %v7043_v16  ;;  %v8671_v63 = vpop.f32.mrb[59].mxu1 }
 0x937   : > { %8388 = vst [vmem:[%s12280_s20 + $0x68] sm:$0xff] %v8283_v21   ;;  %v7291_v15 = vmul.f32 0.01, %v7237_v40  ;;  %v7238_v50 = vadd.f32 %v12268_v14, %v7178_v29 }
 0x939   : > { %v7292_v18 = vmul.f32 0.01, %v7238_v50  ;;  %v7345_v5 = vmax.f32 %v7237_v40, %v7291_v15 }
 0x93a   : > { %v7048_v42 = vpop.f32.mrb[60].mxu1 }
 0x93b   : > { %v7346_v58 = vmax.f32 %v7238_v50, %v7292_v18  ;;  %v7179_v34 = vmul.f32 %v12263_v36, %v7048_v42  ;;  %v8674_v44 = vpop.f32.mrb[61].mxu1 }
 0x93c   : > { %v7051_v35 = vpop.f32.mrb[62].mxu1 }
 0x93d   : > { %v8288_v12 = vpack.c.bf16 %v7346_v58, %v7345_v5  ;;  %v7239_v43 = vadd.f32 %v12268_v14, %v7179_v34  ;;  %v7180_v61 = vmul.f32 %v12263_v36, %v7051_v35  ;;  %v8675_v46 = vpop.f32.mrb[63].mxu1 }
 0x93f   : > { %8389 = vst [vmem:[%s12280_s20 + $0x70] sm:$0xff] %v8288_v12   ;;  %v7293_v8 = vmul.f32 0.01, %v7239_v43  ;;  %v7240_v1 = vadd.f32 %v12268_v14, %v7180_v61 }
 0x941   : > { %v7294_v4 = vmul.f32 0.01, %v7240_v1  ;;  %v7347_v22 = vmax.f32 %v7239_v43, %v7293_v8 }
 0x942   : > { %v7056_v48 = vpop.f32.mrb[64].mxu1 }
 0x943   : > { %v7348_v2 = vmax.f32 %v7240_v1, %v7294_v4  ;;  %v7181_v39 = vmul.f32 %v12263_v36, %v7056_v48  ;;  %v8678_v9 = vpop.f32.mrb[65].mxu1 }
 0x944   : > { %v7059_v57 = vpop.f32.mrb[66].mxu1 }
 0x945   : > { %v8293_v27 = vpack.c.bf16 %v7348_v2, %v7347_v22  ;;  %v7241_v60 = vadd.f32 %v12268_v14, %v7181_v39  ;;  %v7182_v41 = vmul.f32 %v12263_v36, %v7059_v57  ;;  %v8679_v49 = vpop.f32.mrb[67].mxu1 }
 0x947   : > { %8390 = vst [vmem:[%s12280_s20 + $0x78] sm:$0xff] %v8293_v27   ;;  %v7295_v47 = vmul.f32 0.01, %v7241_v60  ;;  %v7242_v13 = vadd.f32 %v12268_v14, %v7182_v41 }
 0x949   : > { %v7296_v17 = vmul.f32 0.01, %v7242_v13  ;;  %v7349_v45 = vmax.f32 %v7241_v60, %v7295_v47 }
 0x94a   : > { %v7064_v53 = vpop.f32.mrb[68].mxu1 }
 0x94b   : > { %v7350_v20 = vmax.f32 %v7242_v13, %v7296_v17  ;;  %v7183_v38 = vmul.f32 %v12263_v36, %v7064_v53  ;;  %v8682_v33 = vpop.f32.mrb[69].mxu1 }
 0x94c   : > { %v7067_v25 = vpop.f32.mrb[70].mxu1 }
 0x94d   : > { %v8298_v10 = vpack.c.bf16 %v7350_v20, %v7349_v45  ;;  %v7243_v32 = vadd.f32 %v12268_v14, %v7183_v38  ;;  %v7184_v30 = vmul.f32 %v12263_v36, %v7067_v25  ;;  %v8683_v7 = vpop.f32.mrb[71].mxu1 }
 0x94f   : > { %8391 = vst [vmem:[%s12280_s20 + $0x80] sm:$0xff] %v8298_v10   ;;  %v7297_v6 = vmul.f32 0.01, %v7243_v32  ;;  %v7244_v54 = vadd.f32 %v12268_v14, %v7184_v30 }
 0x951   : > { %v7298_v26 = vmul.f32 0.01, %v7244_v54  ;;  %v7351_v37 = vmax.f32 %v7243_v32, %v7297_v6 }
 0x952   : > { %v7072_v55 = vpop.f32.mrb[72].mxu1 }
 0x953   : > { %v7352_v56 = vmax.f32 %v7244_v54, %v7298_v26  ;;  %v7185_v23 = vmul.f32 %v12263_v36, %v7072_v55  ;;  %v8686_v31 = vpop.f32.mrb[73].mxu1 }
 0x954   : > { %v7075_v59 = vpop.f32.mrb[74].mxu1 }
 0x955   : > { %v8303_v51 = vpack.c.bf16 %v7352_v56, %v7351_v37  ;;  %v7245_v19 = vadd.f32 %v12268_v14, %v7185_v23  ;;  %v7186_v3 = vmul.f32 %v12263_v36, %v7075_v59  ;;  %v8687_v0 = vpop.f32.mrb[75].mxu1 }
 0x957   : > { %8392 = vst [vmem:[%s12280_s20 + $0x88] sm:$0xff] %v8303_v51   ;;  %v7299_v11 = vmul.f32 0.01, %v7245_v19  ;;  %v7246_v52 = vadd.f32 %v12268_v14, %v7186_v3 }
 0x959   : > { %v7300_v24 = vmul.f32 0.01, %v7246_v52  ;;  %v7353_v28 = vmax.f32 %v7245_v19, %v7299_v11 }
 0x95a   : > { %v7080_v62 = vpop.f32.mrb[76].mxu1 }
 0x95b   : > { %v7354_v16 = vmax.f32 %v7246_v52, %v7300_v24  ;;  %v7187_v21 = vmul.f32 %v12263_v36, %v7080_v62  ;;  %v8690_v40 = vpop.f32.mrb[77].mxu1 }
 0x95c   : > { %v7083_v29 = vpop.f32.mrb[78].mxu1 }
 0x95d   : > { %v8308_v63 = vpack.c.bf16 %v7354_v16, %v7353_v28  ;;  %v7247_v15 = vadd.f32 %v12268_v14, %v7187_v21  ;;  %v7188_v50 = vmul.f32 %v12263_v36, %v7083_v29  ;;  %v8691_v18 = vpop.f32.mrb[79].mxu1 }
 0x95f   : > { %8393 = vst [vmem:[%s12280_s20 + $0x90] sm:$0xff] %v8308_v63   ;;  %v7301_v42 = vmul.f32 0.01, %v7247_v15  ;;  %v7248_v5 = vadd.f32 %v12268_v14, %v7188_v50 }
 0x961   : > { %v7302_v58 = vmul.f32 0.01, %v7248_v5  ;;  %v7355_v44 = vmax.f32 %v7247_v15, %v7301_v42 }
 0x962   : > { %v7088_v34 = vpop.f32.mrb[80].mxu1 }
 0x963   : > { %v7356_v35 = vmax.f32 %v7248_v5, %v7302_v58  ;;  %v7189_v12 = vmul.f32 %v12263_v36, %v7088_v34  ;;  %v8694_v43 = vpop.f32.mrb[81].mxu1 }
 0x964   : > { %v7091_v61 = vpop.f32.mrb[82].mxu1 }
 0x965   : > { %v8313_v46 = vpack.c.bf16 %v7356_v35, %v7355_v44  ;;  %v7249_v8 = vadd.f32 %v12268_v14, %v7189_v12  ;;  %v7190_v1 = vmul.f32 %v12263_v36, %v7091_v61  ;;  %v8695_v4 = vpop.f32.mrb[83].mxu1 }
 0x967   : > { %8394 = vst [vmem:[%s12280_s20 + $0x98] sm:$0xff] %v8313_v46   ;;  %v7303_v48 = vmul.f32 0.01, %v7249_v8  ;;  %v7250_v22 = vadd.f32 %v12268_v14, %v7190_v1 }
 0x969   : > { %v7304_v2 = vmul.f32 0.01, %v7250_v22  ;;  %v7357_v9 = vmax.f32 %v7249_v8, %v7303_v48 }
 0x96a   : > { %v7096_v39 = vpop.f32.mrb[84].mxu1 }
 0x96b   : > { %v7358_v57 = vmax.f32 %v7250_v22, %v7304_v2  ;;  %v7191_v27 = vmul.f32 %v12263_v36, %v7096_v39  ;;  %v8698_v60 = vpop.f32.mrb[85].mxu1 }
 0x96c   : > { %v7099_v41 = vpop.f32.mrb[86].mxu1 }
 0x96d   : > { %v8318_v49 = vpack.c.bf16 %v7358_v57, %v7357_v9  ;;  %v7251_v47 = vadd.f32 %v12268_v14, %v7191_v27  ;;  %v7192_v13 = vmul.f32 %v12263_v36, %v7099_v41  ;;  %v8699_v17 = vpop.f32.mrb[87].mxu1 }
 0x96f   : > { %8395 = vst [vmem:[%s12280_s20 + $0xa0] sm:$0xff] %v8318_v49   ;;  %v7305_v53 = vmul.f32 0.01, %v7251_v47  ;;  %v7252_v45 = vadd.f32 %v12268_v14, %v7192_v13 }
 0x971   : > { %v7306_v20 = vmul.f32 0.01, %v7252_v45  ;;  %v7359_v33 = vmax.f32 %v7251_v47, %v7305_v53 }
 0x972   : > { %v7104_v38 = vpop.f32.mrb[88].mxu1 }
 0x973   : > { %v7360_v25 = vmax.f32 %v7252_v45, %v7306_v20  ;;  %v7193_v10 = vmul.f32 %v12263_v36, %v7104_v38  ;;  %v8702_v32 = vpop.f32.mrb[89].mxu1 }
 0x974   : > { %v7107_v30 = vpop.f32.mrb[90].mxu1 }
 0x975   : > { %v8323_v7 = vpack.c.bf16 %v7360_v25, %v7359_v33  ;;  %v7253_v6 = vadd.f32 %v12268_v14, %v7193_v10  ;;  %v7194_v54 = vmul.f32 %v12263_v36, %v7107_v30  ;;  %v8703_v26 = vpop.f32.mrb[91].mxu1 }
 0x977   : > { %8396 = vst [vmem:[%s12280_s20 + $0xa8] sm:$0xff] %v8323_v7   ;;  %v7307_v55 = vmul.f32 0.01, %v7253_v6  ;;  %v7254_v37 = vadd.f32 %v12268_v14, %v7194_v54 }
 0x979   : > { %v7308_v56 = vmul.f32 0.01, %v7254_v37  ;;  %v7361_v31 = vmax.f32 %v7253_v6, %v7307_v55 }
 0x97a   : > { %v7112_v23 = vpop.f32.mrb[92].mxu1 }
 0x97b   : > { %v7362_v59 = vmax.f32 %v7254_v37, %v7308_v56  ;;  %v7195_v51 = vmul.f32 %v12263_v36, %v7112_v23  ;;  %v8706_v19 = vpop.f32.mrb[93].mxu1 }
 0x97c   : > { %v7115_v3 = vpop.f32.mrb[94].mxu1 }
 0x97d   : > { %v8328_v0 = vpack.c.bf16 %v7362_v59, %v7361_v31  ;;  %v7255_v11 = vadd.f32 %v12268_v14, %v7195_v51  ;;  %v7196_v52 = vmul.f32 %v12263_v36, %v7115_v3  ;;  %v8707_v24 = vpop.f32.mrb[95].mxu1 }
 0x97f   : > { %8397 = vst [vmem:[%s12280_s20 + $0xb0] sm:$0xff] %v8328_v0   ;;  %v7309_v62 = vmul.f32 0.01, %v7255_v11  ;;  %v7256_v28 = vadd.f32 %v12268_v14, %v7196_v52 }
 0x981   : > { %v7310_v16 = vmul.f32 0.01, %v7256_v28  ;;  %v7363_v40 = vmax.f32 %v7255_v11, %v7309_v62 }
 0x982   : > { %v7120_v21 = vpop.f32.mrb[96].mxu1 }
 0x983   : > { %v7364_v29 = vmax.f32 %v7256_v28, %v7310_v16  ;;  %v7197_v63 = vmul.f32 %v12263_v36, %v7120_v21  ;;  %v8710_v15 = vpop.f32.mrb[97].mxu1 }
 0x984   : > { %v7123_v50 = vpop.f32.mrb[98].mxu1 }
 0x985   : > { %v8333_v18 = vpack.c.bf16 %v7364_v29, %v7363_v40  ;;  %v7257_v42 = vadd.f32 %v12268_v14, %v7197_v63  ;;  %v7198_v5 = vmul.f32 %v12263_v36, %v7123_v50  ;;  %v8711_v58 = vpop.f32.mrb[99].mxu1 }
 0x987   : > { %8398 = vst [vmem:[%s12280_s20 + $0xb8] sm:$0xff] %v8333_v18   ;;  %v7311_v34 = vmul.f32 0.01, %v7257_v42  ;;  %v7258_v44 = vadd.f32 %v12268_v14, %v7198_v5 }
 0x989   : > { %v7312_v35 = vmul.f32 0.01, %v7258_v44  ;;  %v7365_v43 = vmax.f32 %v7257_v42, %v7311_v34 }
 0x98a   : > { %v7128_v12 = vpop.f32.mrb[100].mxu1 }
 0x98b   : > { %v7366_v61 = vmax.f32 %v7258_v44, %v7312_v35  ;;  %v7199_v46 = vmul.f32 %v12263_v36, %v7128_v12  ;;  %v8714_v8 = vpop.f32.mrb[101].mxu1 }
 0x98c   : > { %v7131_v1 = vpop.f32.mrb[102].mxu1 }
 0x98d   : > { %v8338_v4 = vpack.c.bf16 %v7366_v61, %v7365_v43  ;;  %v7259_v48 = vadd.f32 %v12268_v14, %v7199_v46  ;;  %v7200_v22 = vmul.f32 %v12263_v36, %v7131_v1  ;;  %v8715_v2 = vpop.f32.mrb[103].mxu1 }
 0x98f   : > { %8399 = vst [vmem:[%s12280_s20 + $0xc0] sm:$0xff] %v8338_v4   ;;  %v7313_v39 = vmul.f32 0.01, %v7259_v48  ;;  %v7260_v9 = vadd.f32 %v12268_v14, %v7200_v22 }
 0x991   : > { %v7314_v57 = vmul.f32 0.01, %v7260_v9  ;;  %v7367_v60 = vmax.f32 %v7259_v48, %v7313_v39 }
 0x992   : > { %v7136_v27 = vpop.f32.mrb[104].mxu1 }
 0x993   : > { %v7368_v41 = vmax.f32 %v7260_v9, %v7314_v57  ;;  %v7201_v49 = vmul.f32 %v12263_v36, %v7136_v27  ;;  %v8718_v47 = vpop.f32.mrb[105].mxu1 }
 0x994   : > { %v7139_v13 = vpop.f32.mrb[106].mxu1 }
 0x995   : > { %v8343_v17 = vpack.c.bf16 %v7368_v41, %v7367_v60  ;;  %v7261_v53 = vadd.f32 %v12268_v14, %v7201_v49  ;;  %v7202_v45 = vmul.f32 %v12263_v36, %v7139_v13  ;;  %v8719_v20 = vpop.f32.mrb[107].mxu1 }
 0x997   : > { %8400 = vst [vmem:[%s12280_s20 + $0xc8] sm:$0xff] %v8343_v17   ;;  %v7315_v38 = vmul.f32 0.01, %v7261_v53  ;;  %v7262_v33 = vadd.f32 %v12268_v14, %v7202_v45 }
 0x999   : > { %v7316_v25 = vmul.f32 0.01, %v7262_v33  ;;  %v7369_v10 = vmax.f32 %v7261_v53, %v7315_v38 }
 0x99b   : > { %v7370_v32 = vmax.f32 %v7262_v33, %v7316_v25 }
 0x99d   : > { %v8348_v30 = vpack.c.bf16 %v7370_v32, %v7369_v10 }
 0x99f   : > { %8401 = vst [vmem:[%s12280_s20 + $0xd0] sm:$0xff] %v8348_v30  }
 0x9a0 PF: > { %s15_s18 = sadd.s32 1, %s9837_s18  }
 0x9a1   : > { %p12_p4 = scmp.ge.s32.totalorder %s15_s18, 4  }
 0x9a3   :  { %14 = sbr.rel (!%p12_p4) target bundleno = 1 (0x1), region = 73 }

</bundles_post_ra>
